<compile_context>
chip_gen: v6e
topology: v6e:2x2x1
jax: 0.10.0
libtpu: 0.0.40
codegen_flags: <defaults>
</compile_context>

<pallas_src>
import functools
import math

import jax
import jax.numpy as jnp
from jax.experimental import pallas as pl
from jax.experimental.pallas import tpu as pltpu


# ---------------------------------------------------------------------------
# Kernel A: per-modality LayerNorm + cross-modal multi-head attention.
# One grid step m handles: query = LN_m(x_m), kv = LN_{kv[m]}(x_{kv[m]}),
# with the m-th set of (fresh) MHA parameters.
# ---------------------------------------------------------------------------

def _cross_attn_kernel(kv_idx_ref,            # scalar-prefetch (used by index_maps only)
                       xq_ref, xkv_ref,       # (S, D) raw query / key-value inputs
                       gq_ref, bq_ref,        # (1, D) LayerNorm params (query modality)
                       gkv_ref, bkv_ref,      # (1, D) LayerNorm params (kv modality)
                       wq_ref,                # (D, D)   Wq^T
                       wkv_ref,               # (D, 2D)  [Wk^T | Wv^T] fused
                       bqp_ref,               # (1, D)   q in-proj bias
                       bkvp_ref,              # (1, 2D)  k/v in-proj bias
                       wo_ref, bo_ref,        # (D, D), (1, D) out-projection
                       o_ref,                 # (S, D) output block
                       *, num_heads, eps):
    del kv_idx_ref
    D = xq_ref.shape[-1]
    dh = D // num_heads
    scale = 1.0 / math.sqrt(dh)

    def layernorm(x, g, b):
        x = x.astype(jnp.float32)
        mu = jnp.mean(x, axis=-1, keepdims=True)
        var = jnp.mean(jnp.square(x - mu), axis=-1, keepdims=True)
        return (x - mu) * jax.lax.rsqrt(var + eps) * g + b

    q_in = layernorm(xq_ref[...], gq_ref[...], bq_ref[...])       # (S, D)
    kv_in = layernorm(xkv_ref[...], gkv_ref[...], bkv_ref[...])   # (S, D)

    # Q projection and fused K|V projection (2 matmuls instead of 3).
    qp = jnp.dot(q_in, wq_ref[...], preferred_element_type=jnp.float32) + bqp_ref[...]
    kvp = jnp.dot(kv_in, wkv_ref[...], preferred_element_type=jnp.float32) + bkvp_ref[...]
    kp, vp = kvp[:, :D], kvp[:, D:]

    wo = wo_ref[...]
    attn_out = None
    for h in range(num_heads):          # static unrolled; everything stays in vregs
        lo = h * dh
        qh = qp[:, lo:lo + dh] * scale
        kh = kp[:, lo:lo + dh]
        vh = vp[:, lo:lo + dh]
        # scores = qh @ kh^T without an explicit transpose.
        s = jax.lax.dot_general(qh, kh, (((1,), (1,)), ((), ())),
                                preferred_element_type=jnp.float32)    # (S, S)
        s = s - jnp.max(s, axis=-1, keepdims=True)
        p = jnp.exp(s)
        p = p * pl.reciprocal(jnp.sum(p, axis=-1, keepdims=True), approx=True)
        ctx = jnp.dot(p, vh, preferred_element_type=jnp.float32)       # (S, dh)
        # Fold the out-projection in per head: concat(heads) @ Wo^T
        #   == sum_h head_h @ Wo^T[h*dh:(h+1)*dh, :]
        contrib = jnp.dot(ctx, wo[lo:lo + dh, :],
                          preferred_element_type=jnp.float32)          # (S, D)
        attn_out = contrib if attn_out is None else attn_out + contrib

    o_ref[...] = (attn_out + bo_ref[...]).astype(o_ref.dtype)


# ---------------------------------------------------------------------------
# Kernel B: self-attention over the 3 stacked modalities (seq len L=3,
# batch = S positions), final LayerNorm, fc chain, dropout-identity, sum.
# ---------------------------------------------------------------------------

def _self_attn_tail_kernel(mod_ref,                  # (3, S, D) cross-attn outputs
                           wqkv_ref, bqkv_ref,       # (D, 3D), (1, 3D) fused in-proj
                           wo_ref, bo_ref,           # (D, D), (1, D) out-projection
                           g_ref, b_ref,             # (1, D) final LayerNorm
                           fcw_ref, fcb_ref,         # (num_layers, D, D), (num_layers, 1, D)
                           o_ref,                    # (S, D)
                           *, num_heads, num_layers, eps):
    L, S, D = mod_ref.shape
    dh = D // num_heads
    scale = 1.0 / math.sqrt(dh)

    wqkv = wqkv_ref[...]
    bqkv = bqkv_ref[...]
    wo = wo_ref[...]
    bo = bo_ref[...]

    # Fused QKV projection per modality: one lane-dense (S, 3D) matmul each.
    qs, ks, vs = [], [], []
    for l in range(L):
        pr = jnp.dot(mod_ref[l].astype(jnp.float32), wqkv,
                     preferred_element_type=jnp.float32) + bqkv        # (S, 3D)
        qs.append(pr[:, :D])
        ks.append(pr[:, D:2 * D])
        vs.append(pr[:, 2 * D:])

    # Attention over the L=3 modality tokens, independently per position s.
    # L is tiny, so scores are per-position dot products (multiply + lane
    # reduce); all intermediates stay register-resident.
    rows = []
    for l in range(L):                                  # query modality
        ql = qs[l] * scale                              # (S, D)
        prods = [ql * ks[m] for m in range(L)]          # L x (S, D)
        out_row = None
        for h in range(num_heads):
            lo = h * dh
            sc = [jnp.sum(prods[m][:, lo:lo + dh], axis=-1, keepdims=True)
                  for m in range(L)]                    # L x (S, 1) scores
            mx = sc[0]
            for m in range(1, L):
                mx = jnp.maximum(mx, sc[m])
            es = [jnp.exp(s_ - mx) for s_ in sc]
            den = es[0]
            for m in range(1, L):
                den = den + es[m]
            inv = pl.reciprocal(den, approx=True)       # (S, 1)
            ctx = (es[0] * inv) * vs[0][:, lo:lo + dh]
            for m in range(1, L):
                ctx = ctx + (es[m] * inv) * vs[m][:, lo:lo + dh]       # (S, dh)
            contrib = jnp.dot(ctx, wo[lo:lo + dh, :],
                              preferred_element_type=jnp.float32)      # (S, D)
            out_row = contrib if out_row is None else out_row + contrib
        rows.append(out_row + bo)                       # (S, D)

    x = jnp.concatenate(rows, axis=0)                   # (L*S, D), row l*S+s <-> (l, s)

    # Final LayerNorm (over the hidden dim).
    mu = jnp.mean(x, axis=-1, keepdims=True)
    var = jnp.mean(jnp.square(x - mu), axis=-1, keepdims=True)
    x = (x - mu) * jax.lax.rsqrt(var + eps) * g_ref[...] + b_ref[...]

    # fc chain (fresh Linear(D, D) per layer).
    for i in range(num_layers):
        x = jnp.dot(x, fcw_ref[i], preferred_element_type=jnp.float32) + fcb_ref[i]

    # F.dropout(p=0.0) is the identity; sum over the modality axis.
    out = x[0:S, :]
    for l in range(1, L):
        out = out + x[l * S:(l + 1) * S, :]
    o_ref[...] = out.astype(o_ref.dtype)


# ---------------------------------------------------------------------------
# Wrapper: whole forward in 2 pallas_call launches.
# ---------------------------------------------------------------------------

def cross_modal_embedding(text, image, sound, params, *, num_heads, eps):
    S, D = text.shape
    x = jnp.stack([text, image, sound], axis=0)                        # (3, S, D)
    num_layers = params["fcw_t"].shape[0]

    def idx_q(m, kv):                       # this cross-attention's own modality
        return (m, 0, 0)

    def idx_kv(m, kv):                      # kv modality from the prefetch table
        return (kv[m], 0, 0)

    modalities = pl.pallas_call(
        functools.partial(_cross_attn_kernel, num_heads=num_heads, eps=eps),
        out_shape=jax.ShapeDtypeStruct((3, S, D), jnp.float32),
        grid_spec=pltpu.PrefetchScalarGridSpec(
            num_scalar_prefetch=1,
            grid=(3,),
            in_specs=[
                pl.BlockSpec((None, S, D), idx_q),          # query input
                pl.BlockSpec((None, S, D), idx_kv),         # key/value input
                pl.BlockSpec((None, 1, D), idx_q),          # LN gamma (query modality)
                pl.BlockSpec((None, 1, D), idx_q),          # LN beta
                pl.BlockSpec((None, 1, D), idx_kv),         # LN gamma (kv modality)
                pl.BlockSpec((None, 1, D), idx_kv),         # LN beta
                pl.BlockSpec((None, D, D), idx_q),          # Wq^T
                pl.BlockSpec((None, D, 2 * D), idx_q),      # [Wk^T | Wv^T]
                pl.BlockSpec((None, 1, D), idx_q),          # bq
                pl.BlockSpec((None, 1, 2 * D), idx_q),      # bkv
                pl.BlockSpec((None, D, D), idx_q),          # Wo^T
                pl.BlockSpec((None, 1, D), idx_q),          # bo
            ],
            out_specs=pl.BlockSpec((None, S, D), idx_q),
        ),
        compiler_params=pltpu.CompilerParams(
            dimension_semantics=("parallel",)),             # 3 independent steps (v7x megacore)
    )(params["kv_idx"], x, x,
      params["ln_g"], params["ln_b"], params["ln_g"], params["ln_b"],
      params["wq_t"], params["wkv_t"], params["bq"], params["bkv"],
      params["wo_t"], params["bo"])

    out = pl.pallas_call(
        functools.partial(_self_attn_tail_kernel, num_heads=num_heads,
                          num_layers=num_layers, eps=eps),
        out_shape=jax.ShapeDtypeStruct((S, D), jnp.float32),
    )(modalities, params["self_wqkv_t"], params["self_bqkv"],
      params["self_wo_t"], params["self_bo"],
      params["lnf_g"], params["lnf_b"], params["fcw_t"], params["fcb"])
    return out


# ---------------------------------------------------------------------------
# Parameter init (mirrors PyTorch defaults; deterministic).
# ---------------------------------------------------------------------------

def init_params(key, D, num_layers):
    ks = jax.random.split(key, 4 + num_layers)

    def mha_in_proj(k):
        # nn.MultiheadAttention: in_proj_weight (3D, D) xavier_uniform, bias zeros.
        bound = math.sqrt(6.0 / (3 * D + D))
        w = jax.random.uniform(k, (3 * D, D), jnp.float32, -bound, bound)
        return w[:D], w[D:2 * D], w[2 * D:]                 # Wq, Wk, Wv

    def out_proj(k):
        # out_proj Linear(D, D): weight ~ U(+-1/sqrt(D)); bias zero-initialized.
        bound = 1.0 / math.sqrt(D)
        return jax.random.uniform(k, (D, D), jnp.float32, -bound, bound)

    # 3 cross-modal MHAs (fresh params each), stacked on a leading modality axis.
    wq_t, wkv_t, wo_t = [], [], []
    for m in range(3):
        k_in, k_out = jax.random.split(ks[m], 2)
        wq, wk, wv = mha_in_proj(k_in)
        wq_t.append(wq.T)
        wkv_t.append(jnp.concatenate([wk.T, wv.T], axis=-1))
        wo_t.append(out_proj(k_out).T)

    # Modality self-attention MHA (4th fresh set), fused QKV.
    k_in, k_out = jax.random.split(ks[3], 2)
    wq, wk, wv = mha_in_proj(k_in)
    self_wqkv_t = jnp.concatenate([wq.T, wk.T, wv.T], axis=-1)         # (D, 3D)
    self_wo_t = out_proj(k_out).T

    # Fully-connected chain: nn.Linear defaults (weight & bias ~ U(+-1/sqrt(D))).
    bound = 1.0 / math.sqrt(D)
    fcw_t, fcb = [], []
    for i in range(num_layers):
        kw, kb = jax.random.split(ks[4 + i], 2)
        fcw_t.append(jax.random.uniform(kw, (D, D), jnp.float32, -bound, bound).T)
        fcb.append(jax.random.uniform(kb, (1, D), jnp.float32, -bound, bound))

    return {
        "kv_idx": jnp.array([1, 2, 0], jnp.int32),   # query modality m attends to kv_idx[m]
        # per-modality LayerNorms (nn.LayerNorm defaults: gamma=1, beta=0)
        "ln_g": jnp.ones((3, 1, D), jnp.float32),
        "ln_b": jnp.zeros((3, 1, D), jnp.float32),
        # 3 cross-modal MHAs (stacked)
        "wq_t": jnp.stack(wq_t), "wkv_t": jnp.stack(wkv_t),
        "bq": jnp.zeros((3, 1, D), jnp.float32),
        "bkv": jnp.zeros((3, 1, 2 * D), jnp.float32),
        "wo_t": jnp.stack(wo_t), "bo": jnp.zeros((3, 1, D), jnp.float32),
        # modality self-attention MHA
        "self_wqkv_t": self_wqkv_t,
        "self_bqkv": jnp.zeros((1, 3 * D), jnp.float32),
        "self_wo_t": self_wo_t,
        "self_bo": jnp.zeros((1, D), jnp.float32),
        # final LayerNorm
        "lnf_g": jnp.ones((1, D), jnp.float32),
        "lnf_b": jnp.zeros((1, D), jnp.float32),
        # fc chain (stacked)
        "fcw_t": jnp.stack(fcw_t), "fcb": jnp.stack(fcb),
    }


# ---------------------------------------------------------------------------
# Pure-JAX reference (same params) for a correctness cross-check.
# ---------------------------------------------------------------------------

def _mha_ref(q, k, v, w_in_t, b_in, wo_t, bo, num_heads):
    # q: (L, B, D) seq-first (batch_first=False); k/v: (Lk, B, D).
    L, B, D = q.shape
    Lk = k.shape[0]
    dh = D // num_heads
    hp = jax.lax.Precision.HIGHEST
    qp = jnp.einsum("lbd,de->lbe", q, w_in_t[:, :D], precision=hp) + b_in[:, :D]
    kp = jnp.einsum("lbd,de->lbe", k, w_in_t[:, D:2 * D], precision=hp) + b_in[:, D:2 * D]
    vp = jnp.einsum("lbd,de->lbe", v, w_in_t[:, 2 * D:], precision=hp) + b_in[:, 2 * D:]
    qh = qp.reshape(L, B, num_heads, dh)
    kh = kp.reshape(Lk, B, num_heads, dh)
    vh = vp.reshape(Lk, B, num_heads, dh)
    s = jnp.einsum("lbhd,mbhd->bhlm", qh, kh, precision=hp) / math.sqrt(dh)
    p = jax.nn.softmax(s, axis=-1)
    o = jnp.einsum("bhlm,mbhd->lbhd", p, vh, precision=hp).reshape(L, B, D)
    return jnp.einsum("lbd,de->lbe", o, wo_t, precision=hp) + bo


def reference_forward(text, image, sound, P, *, num_heads, eps):
    def layernorm(x, g, b):
        mu = x.mean(-1, keepdims=True)
        var = ((x - mu) ** 2).mean(-1, keepdims=True)
        return (x - mu) / jnp.sqrt(var + eps) * g + b

    inputs = [text, image, sound]
    projs = [layernorm(inputs[i], P["ln_g"][i], P["ln_b"][i]) for i in range(3)]

    outs = []
    for m in range(3):
        w_in_t = jnp.concatenate([P["wq_t"][m], P["wkv_t"][m]], axis=-1)
        b_in = jnp.concatenate([P["bq"][m], P["bkv"][m]], axis=-1)
        q = projs[m][:, None, :]
        kv = projs[int(P["kv_idx"][m])][:, None, :]
        o = _mha_ref(q, kv, kv, w_in_t, b_in, P["wo_t"][m], P["bo"][m], num_heads)
        outs.append(o[:, 0, :])

    mod = jnp.stack(outs, axis=0)                                      # (3, S, D)
    attn = _mha_ref(mod, mod, mod, P["self_wqkv_t"], P["self_bqkv"],
                    P["self_wo_t"], P["self_bo"], num_heads)
    x = layernorm(attn, P["lnf_g"], P["lnf_b"])
    hp = jax.lax.Precision.HIGHEST
    for i in range(P["fcw_t"].shape[0]):
        x = jnp.einsum("lbd,de->lbe", x, P["fcw_t"][i], precision=hp) + P["fcb"][i]
    return x.sum(axis=0)


# ---------------------------------------------------------------------------

if __name__ == "__main__":
    S, D, NUM_HEADS, NUM_LAYERS = 8, 32, 4, 2
    EPS = 1e-5

    key = jax.random.PRNGKey(0)
    k_text, k_img, k_snd, k_par = jax.random.split(key, 4)
    text = jax.random.normal(k_text, (S, D), jnp.float32)
    image = jax.random.normal(k_img, (S, D), jnp.float32)
    sound = jax.random.normal(k_snd, (S, D), jnp.float32)

    params = init_params(k_par, D, NUM_LAYERS)

    fwd = jax.jit(functools.partial(cross_modal_embedding,
                                    num_heads=NUM_HEADS, eps=EPS))
    out = jax.block_until_ready(fwd(text, image, sound, params))

    assert out.shape == (S, D) and out.dtype == jnp.float32
    assert bool(jnp.all(jnp.isfinite(out)))

    # Cross-check against a pure-JAX reference (approx-reciprocal softmax and
    # MXU f32 paths introduce only tiny deviations).
    ref = reference_forward(text, image, sound, params, num_heads=NUM_HEADS, eps=EPS)
    assert bool(jnp.allclose(out, ref, rtol=2e-2, atol=2e-2)), (
        "max abs diff vs reference: %e" % float(jnp.max(jnp.abs(out - ref))))

    print("KERNEL_OK")
</pallas_src>

<mosaic_0001>
module attributes {stable_mosaic.version = 11 : i64} {
  func.func @_cross_attn_kernel(%arg0: i32, %arg1: memref<3xi32, #tpu.memory_space<smem>>, %arg2: memref<1x8x32xf32, #tpu.memory_space<vmem>>, %arg3: memref<1x8x32xf32, #tpu.memory_space<vmem>>, %arg4: memref<1x1x32xf32, #tpu.memory_space<vmem>>, %arg5: memref<1x1x32xf32, #tpu.memory_space<vmem>>, %arg6: memref<1x1x32xf32, #tpu.memory_space<vmem>>, %arg7: memref<1x1x32xf32, #tpu.memory_space<vmem>>, %arg8: memref<1x32x32xf32, #tpu.memory_space<vmem>>, %arg9: memref<1x32x64xf32, #tpu.memory_space<vmem>>, %arg10: memref<1x1x32xf32, #tpu.memory_space<vmem>>, %arg11: memref<1x1x64xf32, #tpu.memory_space<vmem>>, %arg12: memref<1x32x32xf32, #tpu.memory_space<vmem>>, %arg13: memref<1x1x32xf32, #tpu.memory_space<vmem>>, %arg14: memref<1x8x32xf32, #tpu.memory_space<vmem>>) attributes {dimension_semantics = [#tpu.dimension_semantics<parallel>], iteration_bounds = array<i64: 3>, scalar_prefetch = 1 : i64, scratch_operands = 0 : i64, tpu.core_type = #tpu.core_type<tc>, window_params = [{transform_indices = @transform_0, window_bounds = array<i64: 1, 8, 32>}, {transform_indices = @transform_1, window_bounds = array<i64: 1, 8, 32>}, {transform_indices = @transform_2, window_bounds = array<i64: 1, 1, 32>}, {transform_indices = @transform_3, window_bounds = array<i64: 1, 1, 32>}, {transform_indices = @transform_4, window_bounds = array<i64: 1, 1, 32>}, {transform_indices = @transform_5, window_bounds = array<i64: 1, 1, 32>}, {transform_indices = @transform_6, window_bounds = array<i64: 1, 32, 32>}, {transform_indices = @transform_7, window_bounds = array<i64: 1, 32, 64>}, {transform_indices = @transform_8, window_bounds = array<i64: 1, 1, 32>}, {transform_indices = @transform_9, window_bounds = array<i64: 1, 1, 64>}, {transform_indices = @transform_10, window_bounds = array<i64: 1, 32, 32>}, {transform_indices = @transform_11, window_bounds = array<i64: 1, 1, 32>}, {transform_indices = @transform_12, window_bounds = array<i64: 1, 8, 32>}]} {
    %c0 = arith.constant 0 : index
    %c0_0 = arith.constant 0 : index
    %c0_1 = arith.constant 0 : index
    %0 = vector.load %arg2[%c0, %c0_0, %c0_1] : memref<1x8x32xf32, #tpu.memory_space<vmem>>, vector<1x8x32xf32>
    %1 = vector.shape_cast %0 : vector<1x8x32xf32> to vector<8x32xf32>
    %c0_2 = arith.constant 0 : index
    %c0_3 = arith.constant 0 : index
    %c0_4 = arith.constant 0 : index
    %2 = vector.load %arg4[%c0_2, %c0_3, %c0_4] : memref<1x1x32xf32, #tpu.memory_space<vmem>>, vector<1x1x32xf32>
    %3 = vector.shape_cast %2 : vector<1x1x32xf32> to vector<1x32xf32>
    %c0_5 = arith.constant 0 : index
    %c0_6 = arith.constant 0 : index
    %c0_7 = arith.constant 0 : index
    %4 = vector.load %arg5[%c0_5, %c0_6, %c0_7] : memref<1x1x32xf32, #tpu.memory_space<vmem>>, vector<1x1x32xf32>
    %5 = vector.shape_cast %4 : vector<1x1x32xf32> to vector<1x32xf32>
    %cst = arith.constant dense<0.000000e+00> : vector<8xf32>
    %6 = vector.multi_reduction <add>, %1, %cst [1] : vector<8x32xf32> to vector<8xf32>
    %7 = vector.shape_cast %6 : vector<8xf32> to vector<8x1xf32>
    %cst_8 = arith.constant 3.200000e+01 : f32
    %8 = vector.broadcast %cst_8 : f32 to vector<8x1xf32>
    %9 = arith.divf %7, %8 : vector<8x1xf32>
    %10 = vector.broadcast %9 : vector<8x1xf32> to vector<8x32xf32>
    %11 = arith.subf %1, %10 : vector<8x32xf32>
    %12 = arith.mulf %11, %11 : vector<8x32xf32>
    %cst_9 = arith.constant dense<0.000000e+00> : vector<8xf32>
    %13 = vector.multi_reduction <add>, %12, %cst_9 [1] : vector<8x32xf32> to vector<8xf32>
    %14 = vector.shape_cast %13 : vector<8xf32> to vector<8x1xf32>
    %cst_10 = arith.constant 3.200000e+01 : f32
    %15 = vector.broadcast %cst_10 : f32 to vector<8x1xf32>
    %16 = arith.divf %14, %15 : vector<8x1xf32>
    %17 = vector.broadcast %9 : vector<8x1xf32> to vector<8x32xf32>
    %18 = arith.subf %1, %17 : vector<8x32xf32>
    %cst_11 = arith.constant 9.99999974E-6 : f32
    %19 = vector.broadcast %cst_11 : f32 to vector<8x1xf32>
    %20 = arith.addf %16, %19 : vector<8x1xf32>
    %21 = math.rsqrt %20 : vector<8x1xf32>
    %22 = vector.broadcast %21 : vector<8x1xf32> to vector<8x32xf32>
    %23 = arith.mulf %18, %22 : vector<8x32xf32>
    %24 = vector.broadcast %3 : vector<1x32xf32> to vector<8x32xf32>
    %25 = arith.mulf %23, %24 : vector<8x32xf32>
    %26 = vector.broadcast %5 : vector<1x32xf32> to vector<8x32xf32>
    %27 = arith.addf %25, %26 : vector<8x32xf32>
    %c0_12 = arith.constant 0 : index
    %c0_13 = arith.constant 0 : index
    %c0_14 = arith.constant 0 : index
    %28 = vector.load %arg3[%c0_12, %c0_13, %c0_14] : memref<1x8x32xf32, #tpu.memory_space<vmem>>, vector<1x8x32xf32>
    %29 = vector.shape_cast %28 : vector<1x8x32xf32> to vector<8x32xf32>
    %c0_15 = arith.constant 0 : index
    %c0_16 = arith.constant 0 : index
    %c0_17 = arith.constant 0 : index
    %30 = vector.load %arg6[%c0_15, %c0_16, %c0_17] : memref<1x1x32xf32, #tpu.memory_space<vmem>>, vector<1x1x32xf32>
    %31 = vector.shape_cast %30 : vector<1x1x32xf32> to vector<1x32xf32>
    %c0_18 = arith.constant 0 : index
    %c0_19 = arith.constant 0 : index
    %c0_20 = arith.constant 0 : index
    %32 = vector.load %arg7[%c0_18, %c0_19, %c0_20] : memref<1x1x32xf32, #tpu.memory_space<vmem>>, vector<1x1x32xf32>
    %33 = vector.shape_cast %32 : vector<1x1x32xf32> to vector<1x32xf32>
    %cst_21 = arith.constant dense<0.000000e+00> : vector<8xf32>
    %34 = vector.multi_reduction <add>, %29, %cst_21 [1] : vector<8x32xf32> to vector<8xf32>
    %35 = vector.shape_cast %34 : vector<8xf32> to vector<8x1xf32>
    %cst_22 = arith.constant 3.200000e+01 : f32
    %36 = vector.broadcast %cst_22 : f32 to vector<8x1xf32>
    %37 = arith.divf %35, %36 : vector<8x1xf32>
    %38 = vector.broadcast %37 : vector<8x1xf32> to vector<8x32xf32>
    %39 = arith.subf %29, %38 : vector<8x32xf32>
    %40 = arith.mulf %39, %39 : vector<8x32xf32>
    %cst_23 = arith.constant dense<0.000000e+00> : vector<8xf32>
    %41 = vector.multi_reduction <add>, %40, %cst_23 [1] : vector<8x32xf32> to vector<8xf32>
    %42 = vector.shape_cast %41 : vector<8xf32> to vector<8x1xf32>
    %cst_24 = arith.constant 3.200000e+01 : f32
    %43 = vector.broadcast %cst_24 : f32 to vector<8x1xf32>
    %44 = arith.divf %42, %43 : vector<8x1xf32>
    %45 = vector.broadcast %37 : vector<8x1xf32> to vector<8x32xf32>
    %46 = arith.subf %29, %45 : vector<8x32xf32>
    %cst_25 = arith.constant 9.99999974E-6 : f32
    %47 = vector.broadcast %cst_25 : f32 to vector<8x1xf32>
    %48 = arith.addf %44, %47 : vector<8x1xf32>
    %49 = math.rsqrt %48 : vector<8x1xf32>
    %50 = vector.broadcast %49 : vector<8x1xf32> to vector<8x32xf32>
    %51 = arith.mulf %46, %50 : vector<8x32xf32>
    %52 = vector.broadcast %31 : vector<1x32xf32> to vector<8x32xf32>
    %53 = arith.mulf %51, %52 : vector<8x32xf32>
    %54 = vector.broadcast %33 : vector<1x32xf32> to vector<8x32xf32>
    %55 = arith.addf %53, %54 : vector<8x32xf32>
    %c0_26 = arith.constant 0 : index
    %c0_27 = arith.constant 0 : index
    %c0_28 = arith.constant 0 : index
    %56 = vector.load %arg8[%c0_26, %c0_27, %c0_28] : memref<1x32x32xf32, #tpu.memory_space<vmem>>, vector<1x32x32xf32>
    %57 = vector.shape_cast %56 : vector<1x32x32xf32> to vector<32x32xf32>
    %cst_29 = arith.constant dense<0.000000e+00> : vector<8x32xf32>
    %58 = tpu.matmul %27, %57, %cst_29 {dimension_numbers = #tpu.dot_dimension_numbers<[1], [0], [0], [1], [0, 0, 1, 1], [], []>} : vector<8x32xf32>, vector<32x32xf32>, vector<8x32xf32> -> vector<8x32xf32>
    %c0_30 = arith.constant 0 : index
    %c0_31 = arith.constant 0 : index
    %c0_32 = arith.constant 0 : index
    %59 = vector.load %arg10[%c0_30, %c0_31, %c0_32] : memref<1x1x32xf32, #tpu.memory_space<vmem>>, vector<1x1x32xf32>
    %60 = vector.shape_cast %59 : vector<1x1x32xf32> to vector<1x32xf32>
    %61 = vector.broadcast %60 : vector<1x32xf32> to vector<8x32xf32>
    %62 = arith.addf %58, %61 : vector<8x32xf32>
    %c0_33 = arith.constant 0 : index
    %c0_34 = arith.constant 0 : index
    %c0_35 = arith.constant 0 : index
    %63 = vector.load %arg9[%c0_33, %c0_34, %c0_35] : memref<1x32x64xf32, #tpu.memory_space<vmem>>, vector<1x32x64xf32>
    %64 = vector.shape_cast %63 : vector<1x32x64xf32> to vector<32x64xf32>
    %cst_36 = arith.constant dense<0.000000e+00> : vector<8x64xf32>
    %65 = tpu.matmul %55, %64, %cst_36 {dimension_numbers = #tpu.dot_dimension_numbers<[1], [0], [0], [1], [0, 0, 1, 1], [], []>} : vector<8x32xf32>, vector<32x64xf32>, vector<8x64xf32> -> vector<8x64xf32>
    %c0_37 = arith.constant 0 : index
    %c0_38 = arith.constant 0 : index
    %c0_39 = arith.constant 0 : index
    %66 = vector.load %arg11[%c0_37, %c0_38, %c0_39] : memref<1x1x64xf32, #tpu.memory_space<vmem>>, vector<1x1x64xf32>
    %67 = vector.shape_cast %66 : vector<1x1x64xf32> to vector<1x64xf32>
    %68 = vector.broadcast %67 : vector<1x64xf32> to vector<8x64xf32>
    %69 = arith.addf %65, %68 : vector<8x64xf32>
    %70 = vector.extract_strided_slice %69 {offsets = [0, 0], sizes = [8, 32], strides = [1, 1]} : vector<8x64xf32> to vector<8x32xf32>
    %71 = vector.extract_strided_slice %69 {offsets = [0, 32], sizes = [8, 32], strides = [1, 1]} : vector<8x64xf32> to vector<8x32xf32>
    %c0_40 = arith.constant 0 : index
    %c0_41 = arith.constant 0 : index
    %c0_42 = arith.constant 0 : index
    %72 = vector.load %arg12[%c0_40, %c0_41, %c0_42] : memref<1x32x32xf32, #tpu.memory_space<vmem>>, vector<1x32x32xf32>
    %73 = vector.shape_cast %72 : vector<1x32x32xf32> to vector<32x32xf32>
    %74 = vector.extract_strided_slice %62 {offsets = [0, 0], sizes = [8, 8], strides = [1, 1]} : vector<8x32xf32> to vector<8x8xf32>
    %cst_43 = arith.constant 0.353553385 : f32
    %75 = vector.broadcast %cst_43 : f32 to vector<8x8xf32>
    %76 = arith.mulf %74, %75 : vector<8x8xf32>
    %77 = vector.extract_strided_slice %70 {offsets = [0, 0], sizes = [8, 8], strides = [1, 1]} : vector<8x32xf32> to vector<8x8xf32>
    %78 = vector.extract_strided_slice %71 {offsets = [0, 0], sizes = [8, 8], strides = [1, 1]} : vector<8x32xf32> to vector<8x8xf32>
    %cst_44 = arith.constant dense<0.000000e+00> : vector<8x8xf32>
    %79 = tpu.matmul %76, %77, %cst_44 {dimension_numbers = #tpu.dot_dimension_numbers<[1], [1], [0], [0], [0, 0, 1, 0], [], []>} : vector<8x8xf32>, vector<8x8xf32>, vector<8x8xf32> -> vector<8x8xf32>
    %cst_45 = arith.constant dense<0xFF800000> : vector<8xf32>
    %80 = vector.multi_reduction <maximumf>, %79, %cst_45 [1] : vector<8x8xf32> to vector<8xf32>
    %81 = vector.shape_cast %80 : vector<8xf32> to vector<8x1xf32>
    %82 = vector.broadcast %81 : vector<8x1xf32> to vector<8x8xf32>
    %83 = arith.subf %79, %82 : vector<8x8xf32>
    %84 = math.exp %83 : vector<8x8xf32>
    %cst_46 = arith.constant dense<0.000000e+00> : vector<8xf32>
    %85 = vector.multi_reduction <add>, %84, %cst_46 [1] : vector<8x8xf32> to vector<8xf32>
    %86 = vector.shape_cast %85 : vector<8xf32> to vector<8x1xf32>
    %87 = tpu.reciprocal %86 {approx = true} : vector<8x1xf32> -> vector<8x1xf32>
    %88 = vector.broadcast %87 : vector<8x1xf32> to vector<8x8xf32>
    %89 = arith.mulf %84, %88 : vector<8x8xf32>
    %cst_47 = arith.constant dense<0.000000e+00> : vector<8x8xf32>
    %90 = tpu.matmul %89, %78, %cst_47 {dimension_numbers = #tpu.dot_dimension_numbers<[1], [0], [0], [1], [0, 0, 1, 1], [], []>} : vector<8x8xf32>, vector<8x8xf32>, vector<8x8xf32> -> vector<8x8xf32>
    %91 = vector.extract_strided_slice %73 {offsets = [0, 0], sizes = [8, 32], strides = [1, 1]} : vector<32x32xf32> to vector<8x32xf32>
    %cst_48 = arith.constant dense<0.000000e+00> : vector<8x32xf32>
    %92 = tpu.matmul %90, %91, %cst_48 {dimension_numbers = #tpu.dot_dimension_numbers<[1], [0], [0], [1], [0, 0, 1, 1], [], []>} : vector<8x8xf32>, vector<8x32xf32>, vector<8x32xf32> -> vector<8x32xf32>
    %93 = vector.extract_strided_slice %62 {offsets = [0, 8], sizes = [8, 8], strides = [1, 1]} : vector<8x32xf32> to vector<8x8xf32>
    %cst_49 = arith.constant 0.353553385 : f32
    %94 = vector.broadcast %cst_49 : f32 to vector<8x8xf32>
    %95 = arith.mulf %93, %94 : vector<8x8xf32>
    %96 = vector.extract_strided_slice %70 {offsets = [0, 8], sizes = [8, 8], strides = [1, 1]} : vector<8x32xf32> to vector<8x8xf32>
    %97 = vector.extract_strided_slice %71 {offsets = [0, 8], sizes = [8, 8], strides = [1, 1]} : vector<8x32xf32> to vector<8x8xf32>
    %cst_50 = arith.constant dense<0.000000e+00> : vector<8x8xf32>
    %98 = tpu.matmul %95, %96, %cst_50 {dimension_numbers = #tpu.dot_dimension_numbers<[1], [1], [0], [0], [0, 0, 1, 0], [], []>} : vector<8x8xf32>, vector<8x8xf32>, vector<8x8xf32> -> vector<8x8xf32>
    %cst_51 = arith.constant dense<0xFF800000> : vector<8xf32>
    %99 = vector.multi_reduction <maximumf>, %98, %cst_51 [1] : vector<8x8xf32> to vector<8xf32>
    %100 = vector.shape_cast %99 : vector<8xf32> to vector<8x1xf32>
    %101 = vector.broadcast %100 : vector<8x1xf32> to vector<8x8xf32>
    %102 = arith.subf %98, %101 : vector<8x8xf32>
    %103 = math.exp %102 : vector<8x8xf32>
    %cst_52 = arith.constant dense<0.000000e+00> : vector<8xf32>
    %104 = vector.multi_reduction <add>, %103, %cst_52 [1] : vector<8x8xf32> to vector<8xf32>
    %105 = vector.shape_cast %104 : vector<8xf32> to vector<8x1xf32>
    %106 = tpu.reciprocal %105 {approx = true} : vector<8x1xf32> -> vector<8x1xf32>
    %107 = vector.broadcast %106 : vector<8x1xf32> to vector<8x8xf32>
    %108 = arith.mulf %103, %107 : vector<8x8xf32>
    %cst_53 = arith.constant dense<0.000000e+00> : vector<8x8xf32>
    %109 = tpu.matmul %108, %97, %cst_53 {dimension_numbers = #tpu.dot_dimension_numbers<[1], [0], [0], [1], [0, 0, 1, 1], [], []>} : vector<8x8xf32>, vector<8x8xf32>, vector<8x8xf32> -> vector<8x8xf32>
    %110 = vector.extract_strided_slice %73 {offsets = [8, 0], sizes = [8, 32], strides = [1, 1]} : vector<32x32xf32> to vector<8x32xf32>
    %cst_54 = arith.constant dense<0.000000e+00> : vector<8x32xf32>
    %111 = tpu.matmul %109, %110, %cst_54 {dimension_numbers = #tpu.dot_dimension_numbers<[1], [0], [0], [1], [0, 0, 1, 1], [], []>} : vector<8x8xf32>, vector<8x32xf32>, vector<8x32xf32> -> vector<8x32xf32>
    %112 = arith.addf %92, %111 : vector<8x32xf32>
    %113 = vector.extract_strided_slice %62 {offsets = [0, 16], sizes = [8, 8], strides = [1, 1]} : vector<8x32xf32> to vector<8x8xf32>
    %cst_55 = arith.constant 0.353553385 : f32
    %114 = vector.broadcast %cst_55 : f32 to vector<8x8xf32>
    %115 = arith.mulf %113, %114 : vector<8x8xf32>
    %116 = vector.extract_strided_slice %70 {offsets = [0, 16], sizes = [8, 8], strides = [1, 1]} : vector<8x32xf32> to vector<8x8xf32>
    %117 = vector.extract_strided_slice %71 {offsets = [0, 16], sizes = [8, 8], strides = [1, 1]} : vector<8x32xf32> to vector<8x8xf32>
    %cst_56 = arith.constant dense<0.000000e+00> : vector<8x8xf32>
    %118 = tpu.matmul %115, %116, %cst_56 {dimension_numbers = #tpu.dot_dimension_numbers<[1], [1], [0], [0], [0, 0, 1, 0], [], []>} : vector<8x8xf32>, vector<8x8xf32>, vector<8x8xf32> -> vector<8x8xf32>
    %cst_57 = arith.constant dense<0xFF800000> : vector<8xf32>
    %119 = vector.multi_reduction <maximumf>, %118, %cst_57 [1] : vector<8x8xf32> to vector<8xf32>
    %120 = vector.shape_cast %119 : vector<8xf32> to vector<8x1xf32>
    %121 = vector.broadcast %120 : vector<8x1xf32> to vector<8x8xf32>
    %122 = arith.subf %118, %121 : vector<8x8xf32>
    %123 = math.exp %122 : vector<8x8xf32>
    %cst_58 = arith.constant dense<0.000000e+00> : vector<8xf32>
    %124 = vector.multi_reduction <add>, %123, %cst_58 [1] : vector<8x8xf32> to vector<8xf32>
    %125 = vector.shape_cast %124 : vector<8xf32> to vector<8x1xf32>
    %126 = tpu.reciprocal %125 {approx = true} : vector<8x1xf32> -> vector<8x1xf32>
    %127 = vector.broadcast %126 : vector<8x1xf32> to vector<8x8xf32>
    %128 = arith.mulf %123, %127 : vector<8x8xf32>
    %cst_59 = arith.constant dense<0.000000e+00> : vector<8x8xf32>
    %129 = tpu.matmul %128, %117, %cst_59 {dimension_numbers = #tpu.dot_dimension_numbers<[1], [0], [0], [1], [0, 0, 1, 1], [], []>} : vector<8x8xf32>, vector<8x8xf32>, vector<8x8xf32> -> vector<8x8xf32>
    %130 = vector.extract_strided_slice %73 {offsets = [16, 0], sizes = [8, 32], strides = [1, 1]} : vector<32x32xf32> to vector<8x32xf32>
    %cst_60 = arith.constant dense<0.000000e+00> : vector<8x32xf32>
    %131 = tpu.matmul %129, %130, %cst_60 {dimension_numbers = #tpu.dot_dimension_numbers<[1], [0], [0], [1], [0, 0, 1, 1], [], []>} : vector<8x8xf32>, vector<8x32xf32>, vector<8x32xf32> -> vector<8x32xf32>
    %132 = arith.addf %112, %131 : vector<8x32xf32>
    %133 = vector.extract_strided_slice %62 {offsets = [0, 24], sizes = [8, 8], strides = [1, 1]} : vector<8x32xf32> to vector<8x8xf32>
    %cst_61 = arith.constant 0.353553385 : f32
    %134 = vector.broadcast %cst_61 : f32 to vector<8x8xf32>
    %135 = arith.mulf %133, %134 : vector<8x8xf32>
    %136 = vector.extract_strided_slice %70 {offsets = [0, 24], sizes = [8, 8], strides = [1, 1]} : vector<8x32xf32> to vector<8x8xf32>
    %137 = vector.extract_strided_slice %71 {offsets = [0, 24], sizes = [8, 8], strides = [1, 1]} : vector<8x32xf32> to vector<8x8xf32>
    %cst_62 = arith.constant dense<0.000000e+00> : vector<8x8xf32>
    %138 = tpu.matmul %135, %136, %cst_62 {dimension_numbers = #tpu.dot_dimension_numbers<[1], [1], [0], [0], [0, 0, 1, 0], [], []>} : vector<8x8xf32>, vector<8x8xf32>, vector<8x8xf32> -> vector<8x8xf32>
    %cst_63 = arith.constant dense<0xFF800000> : vector<8xf32>
    %139 = vector.multi_reduction <maximumf>, %138, %cst_63 [1] : vector<8x8xf32> to vector<8xf32>
    %140 = vector.shape_cast %139 : vector<8xf32> to vector<8x1xf32>
    %141 = vector.broadcast %140 : vector<8x1xf32> to vector<8x8xf32>
    %142 = arith.subf %138, %141 : vector<8x8xf32>
    %143 = math.exp %142 : vector<8x8xf32>
    %cst_64 = arith.constant dense<0.000000e+00> : vector<8xf32>
    %144 = vector.multi_reduction <add>, %143, %cst_64 [1] : vector<8x8xf32> to vector<8xf32>
    %145 = vector.shape_cast %144 : vector<8xf32> to vector<8x1xf32>
    %146 = tpu.reciprocal %145 {approx = true} : vector<8x1xf32> -> vector<8x1xf32>
    %147 = vector.broadcast %146 : vector<8x1xf32> to vector<8x8xf32>
    %148 = arith.mulf %143, %147 : vector<8x8xf32>
    %cst_65 = arith.constant dense<0.000000e+00> : vector<8x8xf32>
    %149 = tpu.matmul %148, %137, %cst_65 {dimension_numbers = #tpu.dot_dimension_numbers<[1], [0], [0], [1], [0, 0, 1, 1], [], []>} : vector<8x8xf32>, vector<8x8xf32>, vector<8x8xf32> -> vector<8x8xf32>
    %150 = vector.extract_strided_slice %73 {offsets = [24, 0], sizes = [8, 32], strides = [1, 1]} : vector<32x32xf32> to vector<8x32xf32>
    %cst_66 = arith.constant dense<0.000000e+00> : vector<8x32xf32>
    %151 = tpu.matmul %149, %150, %cst_66 {dimension_numbers = #tpu.dot_dimension_numbers<[1], [0], [0], [1], [0, 0, 1, 1], [], []>} : vector<8x8xf32>, vector<8x32xf32>, vector<8x32xf32> -> vector<8x32xf32>
    %152 = arith.addf %132, %151 : vector<8x32xf32>
    %c0_67 = arith.constant 0 : index
    %c0_68 = arith.constant 0 : index
    %c0_69 = arith.constant 0 : index
    %153 = vector.load %arg13[%c0_67, %c0_68, %c0_69] : memref<1x1x32xf32, #tpu.memory_space<vmem>>, vector<1x1x32xf32>
    %154 = vector.shape_cast %153 : vector<1x1x32xf32> to vector<1x32xf32>
    %155 = vector.broadcast %154 : vector<1x32xf32> to vector<8x32xf32>
    %156 = arith.addf %152, %155 : vector<8x32xf32>
    %c0_70 = arith.constant 0 : index
    %c0_71 = arith.constant 0 : index
    %c0_72 = arith.constant 0 : index
    %157 = vector.load %arg14[%c0_70, %c0_71, %c0_72] : memref<1x8x32xf32, #tpu.memory_space<vmem>>, vector<1x8x32xf32>
    %158 = vector.shape_cast %157 : vector<1x8x32xf32> to vector<8x32xf32>
    %159 = vector.shape_cast %156 : vector<8x32xf32> to vector<1x8x32xf32>
    tpu.vector_store %arg14[%c0_70, %c0_71, %c0_72], %159 {strides = array<i32>} : memref<1x8x32xf32, #tpu.memory_space<vmem>>, vector<1x8x32xf32>,
    return
  }
  func.func @transform_0(%arg0: i32, %arg1: memref<3xi32, #tpu.memory_space<smem>>) -> (i32, i32, i32) {
    %c0_i32 = arith.constant 0 : i32
    %c0_i32_0 = arith.constant 0 : i32
    %c0_i32_1 = arith.constant 0 : i32
    return %arg0, %c0_i32, %c0_i32_0 : i32, i32, i32
  }
  func.func @transform_1(%arg0: i32, %arg1: memref<3xi32, #tpu.memory_space<smem>>) -> (i32, i32, i32) {
    %0 = arith.index_cast %arg0 : i32 to index
    %1 = memref.load %arg1[%0] : memref<3xi32, #tpu.memory_space<smem>>
    %c0_i32 = arith.constant 0 : i32
    %c0_i32_0 = arith.constant 0 : i32
    %c0_i32_1 = arith.constant 0 : i32
    return %1, %c0_i32, %c0_i32_0 : i32, i32, i32
  }
  func.func @transform_2(%arg0: i32, %arg1: memref<3xi32, #tpu.memory_space<smem>>) -> (i32, i32, i32) {
    %c0_i32 = arith.constant 0 : i32
    %c0_i32_0 = arith.constant 0 : i32
    %c0_i32_1 = arith.constant 0 : i32
    return %arg0, %c0_i32, %c0_i32_0 : i32, i32, i32
  }
  func.func @transform_3(%arg0: i32, %arg1: memref<3xi32, #tpu.memory_space<smem>>) -> (i32, i32, i32) {
    %c0_i32 = arith.constant 0 : i32
    %c0_i32_0 = arith.constant 0 : i32
    %c0_i32_1 = arith.constant 0 : i32
    return %arg0, %c0_i32, %c0_i32_0 : i32, i32, i32
  }
  func.func @transform_4(%arg0: i32, %arg1: memref<3xi32, #tpu.memory_space<smem>>) -> (i32, i32, i32) {
    %0 = arith.index_cast %arg0 : i32 to index
    %1 = memref.load %arg1[%0] : memref<3xi32, #tpu.memory_space<smem>>
    %c0_i32 = arith.constant 0 : i32
    %c0_i32_0 = arith.constant 0 : i32
    %c0_i32_1 = arith.constant 0 : i32
    return %1, %c0_i32, %c0_i32_0 : i32, i32, i32
  }
  func.func @transform_5(%arg0: i32, %arg1: memref<3xi32, #tpu.memory_space<smem>>) -> (i32, i32, i32) {
    %0 = arith.index_cast %arg0 : i32 to index
    %1 = memref.load %arg1[%0] : memref<3xi32, #tpu.memory_space<smem>>
    %c0_i32 = arith.constant 0 : i32
    %c0_i32_0 = arith.constant 0 : i32
    %c0_i32_1 = arith.constant 0 : i32
    return %1, %c0_i32, %c0_i32_0 : i32, i32, i32
  }
  func.func @transform_6(%arg0: i32, %arg1: memref<3xi32, #tpu.memory_space<smem>>) -> (i32, i32, i32) {
    %c0_i32 = arith.constant 0 : i32
    %c0_i32_0 = arith.constant 0 : i32
    %c0_i32_1 = arith.constant 0 : i32
    return %arg0, %c0_i32, %c0_i32_0 : i32, i32, i32
  }
  func.func @transform_7(%arg0: i32, %arg1: memref<3xi32, #tpu.memory_space<smem>>) -> (i32, i32, i32) {
    %c0_i32 = arith.constant 0 : i32
    %c0_i32_0 = arith.constant 0 : i32
    %c0_i32_1 = arith.constant 0 : i32
    return %arg0, %c0_i32, %c0_i32_0 : i32, i32, i32
  }
  func.func @transform_8(%arg0: i32, %arg1: memref<3xi32, #tpu.memory_space<smem>>) -> (i32, i32, i32) {
    %c0_i32 = arith.constant 0 : i32
    %c0_i32_0 = arith.constant 0 : i32
    %c0_i32_1 = arith.constant 0 : i32
    return %arg0, %c0_i32, %c0_i32_0 : i32, i32, i32
  }
  func.func @transform_9(%arg0: i32, %arg1: memref<3xi32, #tpu.memory_space<smem>>) -> (i32, i32, i32) {
    %c0_i32 = arith.constant 0 : i32
    %c0_i32_0 = arith.constant 0 : i32
    %c0_i32_1 = arith.constant 0 : i32
    return %arg0, %c0_i32, %c0_i32_0 : i32, i32, i32
  }
  func.func @transform_10(%arg0: i32, %arg1: memref<3xi32, #tpu.memory_space<smem>>) -> (i32, i32, i32) {
    %c0_i32 = arith.constant 0 : i32
    %c0_i32_0 = arith.constant 0 : i32
    %c0_i32_1 = arith.constant 0 : i32
    return %arg0, %c0_i32, %c0_i32_0 : i32, i32, i32
  }
  func.func @transform_11(%arg0: i32, %arg1: memref<3xi32, #tpu.memory_space<smem>>) -> (i32, i32, i32) {
    %c0_i32 = arith.constant 0 : i32
    %c0_i32_0 = arith.constant 0 : i32
    %c0_i32_1 = arith.constant 0 : i32
    return %arg0, %c0_i32, %c0_i32_0 : i32, i32, i32
  }
  func.func @transform_12(%arg0: i32, %arg1: memref<3xi32, #tpu.memory_space<smem>>) -> (i32, i32, i32) {
    %c0_i32 = arith.constant 0 : i32
    %c0_i32_0 = arith.constant 0 : i32
    %c0_i32_1 = arith.constant 0 : i32
    return %arg0, %c0_i32, %c0_i32_0 : i32, i32, i32
  }
}

module attributes {stable_mosaic.version = 11 : i64} {
  func.func @_self_attn_tail_kernel(%arg0: memref<3x8x32xf32, #tpu.memory_space<vmem>>, %arg1: memref<32x96xf32, #tpu.memory_space<vmem>>, %arg2: memref<1x96xf32, #tpu.memory_space<vmem>>, %arg3: memref<32x32xf32, #tpu.memory_space<vmem>>, %arg4: memref<1x32xf32, #tpu.memory_space<vmem>>, %arg5: memref<1x32xf32, #tpu.memory_space<vmem>>, %arg6: memref<1x32xf32, #tpu.memory_space<vmem>>, %arg7: memref<2x32x32xf32, #tpu.memory_space<vmem>>, %arg8: memref<2x1x32xf32, #tpu.memory_space<vmem>>, %arg9: memref<8x32xf32, #tpu.memory_space<vmem>>) attributes {dimension_semantics = [], scalar_prefetch = 0 : i64, scratch_operands = 0 : i64, tpu.core_type = #tpu.core_type<tc>} {
    %c0 = arith.constant 0 : index
    %c0_0 = arith.constant 0 : index
    %0 = vector.load %arg1[%c0, %c0_0] : memref<32x96xf32, #tpu.memory_space<vmem>>, vector<32x96xf32>
    %c0_1 = arith.constant 0 : index
    %c0_2 = arith.constant 0 : index
    %1 = vector.load %arg2[%c0_1, %c0_2] : memref<1x96xf32, #tpu.memory_space<vmem>>, vector<1x96xf32>
    %c0_3 = arith.constant 0 : index
    %c0_4 = arith.constant 0 : index
    %2 = vector.load %arg3[%c0_3, %c0_4] : memref<32x32xf32, #tpu.memory_space<vmem>>, vector<32x32xf32>
    %c0_5 = arith.constant 0 : index
    %c0_6 = arith.constant 0 : index
    %3 = vector.load %arg4[%c0_5, %c0_6] : memref<1x32xf32, #tpu.memory_space<vmem>>, vector<1x32xf32>
    %c0_7 = arith.constant 0 : index
    %c0_8 = arith.constant 0 : index
    %c0_9 = arith.constant 0 : index
    %4 = vector.load %arg0[%c0_7, %c0_8, %c0_9] : memref<3x8x32xf32, #tpu.memory_space<vmem>>, vector<1x8x32xf32>
    %5 = vector.shape_cast %4 : vector<1x8x32xf32> to vector<8x32xf32>
    %cst = arith.constant dense<0.000000e+00> : vector<8x96xf32>
    %6 = tpu.matmul %5, %0, %cst {dimension_numbers = #tpu.dot_dimension_numbers<[1], [0], [0], [1], [0, 0, 1, 1], [], []>} : vector<8x32xf32>, vector<32x96xf32>, vector<8x96xf32> -> vector<8x96xf32>
    %7 = vector.broadcast %1 : vector<1x96xf32> to vector<8x96xf32>
    %8 = arith.addf %6, %7 : vector<8x96xf32>
    %9 = vector.extract_strided_slice %8 {offsets = [0, 0], sizes = [8, 32], strides = [1, 1]} : vector<8x96xf32> to vector<8x32xf32>
    %10 = vector.extract_strided_slice %8 {offsets = [0, 32], sizes = [8, 32], strides = [1, 1]} : vector<8x96xf32> to vector<8x32xf32>
    %11 = vector.extract_strided_slice %8 {offsets = [0, 64], sizes = [8, 32], strides = [1, 1]} : vector<8x96xf32> to vector<8x32xf32>
    %c1 = arith.constant 1 : index
    %c0_10 = arith.constant 0 : index
    %c0_11 = arith.constant 0 : index
    %12 = vector.load %arg0[%c1, %c0_10, %c0_11] : memref<3x8x32xf32, #tpu.memory_space<vmem>>, vector<1x8x32xf32>
    %13 = vector.shape_cast %12 : vector<1x8x32xf32> to vector<8x32xf32>
    %cst_12 = arith.constant dense<0.000000e+00> : vector<8x96xf32>
    %14 = tpu.matmul %13, %0, %cst_12 {dimension_numbers = #tpu.dot_dimension_numbers<[1], [0], [0], [1], [0, 0, 1, 1], [], []>} : vector<8x32xf32>, vector<32x96xf32>, vector<8x96xf32> -> vector<8x96xf32>
    %15 = vector.broadcast %1 : vector<1x96xf32> to vector<8x96xf32>
    %16 = arith.addf %14, %15 : vector<8x96xf32>
    %17 = vector.extract_strided_slice %16 {offsets = [0, 0], sizes = [8, 32], strides = [1, 1]} : vector<8x96xf32> to vector<8x32xf32>
    %18 = vector.extract_strided_slice %16 {offsets = [0, 32], sizes = [8, 32], strides = [1, 1]} : vector<8x96xf32> to vector<8x32xf32>
    %19 = vector.extract_strided_slice %16 {offsets = [0, 64], sizes = [8, 32], strides = [1, 1]} : vector<8x96xf32> to vector<8x32xf32>
    %c2 = arith.constant 2 : index
    %c0_13 = arith.constant 0 : index
    %c0_14 = arith.constant 0 : index
    %20 = vector.load %arg0[%c2, %c0_13, %c0_14] : memref<3x8x32xf32, #tpu.memory_space<vmem>>, vector<1x8x32xf32>
    %21 = vector.shape_cast %20 : vector<1x8x32xf32> to vector<8x32xf32>
    %cst_15 = arith.constant dense<0.000000e+00> : vector<8x96xf32>
    %22 = tpu.matmul %21, %0, %cst_15 {dimension_numbers = #tpu.dot_dimension_numbers<[1], [0], [0], [1], [0, 0, 1, 1], [], []>} : vector<8x32xf32>, vector<32x96xf32>, vector<8x96xf32> -> vector<8x96xf32>
    %23 = vector.broadcast %1 : vector<1x96xf32> to vector<8x96xf32>
    %24 = arith.addf %22, %23 : vector<8x96xf32>
    %25 = vector.extract_strided_slice %24 {offsets = [0, 0], sizes = [8, 32], strides = [1, 1]} : vector<8x96xf32> to vector<8x32xf32>
    %26 = vector.extract_strided_slice %24 {offsets = [0, 32], sizes = [8, 32], strides = [1, 1]} : vector<8x96xf32> to vector<8x32xf32>
    %27 = vector.extract_strided_slice %24 {offsets = [0, 64], sizes = [8, 32], strides = [1, 1]} : vector<8x96xf32> to vector<8x32xf32>
    %cst_16 = arith.constant 0.353553385 : f32
    %28 = vector.broadcast %cst_16 : f32 to vector<8x32xf32>
    %29 = arith.mulf %9, %28 : vector<8x32xf32>
    %30 = arith.mulf %29, %10 : vector<8x32xf32>
    %31 = arith.mulf %29, %18 : vector<8x32xf32>
    %32 = arith.mulf %29, %26 : vector<8x32xf32>
    %33 = vector.extract_strided_slice %30 {offsets = [0, 0], sizes = [8, 8], strides = [1, 1]} : vector<8x32xf32> to vector<8x8xf32>
    %cst_17 = arith.constant dense<0.000000e+00> : vector<8xf32>
    %34 = vector.multi_reduction <add>, %33, %cst_17 [1] : vector<8x8xf32> to vector<8xf32>
    %35 = vector.shape_cast %34 : vector<8xf32> to vector<8x1xf32>
    %36 = vector.extract_strided_slice %31 {offsets = [0, 0], sizes = [8, 8], strides = [1, 1]} : vector<8x32xf32> to vector<8x8xf32>
    %cst_18 = arith.constant dense<0.000000e+00> : vector<8xf32>
    %37 = vector.multi_reduction <add>, %36, %cst_18 [1] : vector<8x8xf32> to vector<8xf32>
    %38 = vector.shape_cast %37 : vector<8xf32> to vector<8x1xf32>
    %39 = vector.extract_strided_slice %32 {offsets = [0, 0], sizes = [8, 8], strides = [1, 1]} : vector<8x32xf32> to vector<8x8xf32>
    %cst_19 = arith.constant dense<0.000000e+00> : vector<8xf32>
    %40 = vector.multi_reduction <add>, %39, %cst_19 [1] : vector<8x8xf32> to vector<8xf32>
    %41 = vector.shape_cast %40 : vector<8xf32> to vector<8x1xf32>
    %42 = arith.maximumf %35, %38 : vector<8x1xf32>
    %43 = arith.maximumf %42, %41 : vector<8x1xf32>
    %44 = arith.subf %35, %43 : vector<8x1xf32>
    %45 = math.exp %44 : vector<8x1xf32>
    %46 = arith.subf %38, %43 : vector<8x1xf32>
    %47 = math.exp %46 : vector<8x1xf32>
    %48 = arith.subf %41, %43 : vector<8x1xf32>
    %49 = math.exp %48 : vector<8x1xf32>
    %50 = arith.addf %45, %47 : vector<8x1xf32>
    %51 = arith.addf %50, %49 : vector<8x1xf32>
    %52 = tpu.reciprocal %51 {approx = true} : vector<8x1xf32> -> vector<8x1xf32>
    %53 = arith.mulf %45, %52 : vector<8x1xf32>
    %54 = vector.extract_strided_slice %11 {offsets = [0, 0], sizes = [8, 8], strides = [1, 1]} : vector<8x32xf32> to vector<8x8xf32>
    %55 = vector.broadcast %53 : vector<8x1xf32> to vector<8x8xf32>
    %56 = arith.mulf %55, %54 : vector<8x8xf32>
    %57 = arith.mulf %47, %52 : vector<8x1xf32>
    %58 = vector.extract_strided_slice %19 {offsets = [0, 0], sizes = [8, 8], strides = [1, 1]} : vector<8x32xf32> to vector<8x8xf32>
    %59 = vector.broadcast %57 : vector<8x1xf32> to vector<8x8xf32>
    %60 = arith.mulf %59, %58 : vector<8x8xf32>
    %61 = arith.addf %56, %60 : vector<8x8xf32>
    %62 = arith.mulf %49, %52 : vector<8x1xf32>
    %63 = vector.extract_strided_slice %27 {offsets = [0, 0], sizes = [8, 8], strides = [1, 1]} : vector<8x32xf32> to vector<8x8xf32>
    %64 = vector.broadcast %62 : vector<8x1xf32> to vector<8x8xf32>
    %65 = arith.mulf %64, %63 : vector<8x8xf32>
    %66 = arith.addf %61, %65 : vector<8x8xf32>
    %67 = vector.extract_strided_slice %2 {offsets = [0, 0], sizes = [8, 32], strides = [1, 1]} : vector<32x32xf32> to vector<8x32xf32>
    %cst_20 = arith.constant dense<0.000000e+00> : vector<8x32xf32>
    %68 = tpu.matmul %66, %67, %cst_20 {dimension_numbers = #tpu.dot_dimension_numbers<[1], [0], [0], [1], [0, 0, 1, 1], [], []>} : vector<8x8xf32>, vector<8x32xf32>, vector<8x32xf32> -> vector<8x32xf32>
    %69 = vector.extract_strided_slice %30 {offsets = [0, 8], sizes = [8, 8], strides = [1, 1]} : vector<8x32xf32> to vector<8x8xf32>
    %cst_21 = arith.constant dense<0.000000e+00> : vector<8xf32>
    %70 = vector.multi_reduction <add>, %69, %cst_21 [1] : vector<8x8xf32> to vector<8xf32>
    %71 = vector.shape_cast %70 : vector<8xf32> to vector<8x1xf32>
    %72 = vector.extract_strided_slice %31 {offsets = [0, 8], sizes = [8, 8], strides = [1, 1]} : vector<8x32xf32> to vector<8x8xf32>
    %cst_22 = arith.constant dense<0.000000e+00> : vector<8xf32>
    %73 = vector.multi_reduction <add>, %72, %cst_22 [1] : vector<8x8xf32> to vector<8xf32>
    %74 = vector.shape_cast %73 : vector<8xf32> to vector<8x1xf32>
    %75 = vector.extract_strided_slice %32 {offsets = [0, 8], sizes = [8, 8], strides = [1, 1]} : vector<8x32xf32> to vector<8x8xf32>
    %cst_23 = arith.constant dense<0.000000e+00> : vector<8xf32>
    %76 = vector.multi_reduction <add>, %75, %cst_23 [1] : vector<8x8xf32> to vector<8xf32>
    %77 = vector.shape_cast %76 : vector<8xf32> to vector<8x1xf32>
    %78 = arith.maximumf %71, %74 : vector<8x1xf32>
    %79 = arith.maximumf %78, %77 : vector<8x1xf32>
    %80 = arith.subf %71, %79 : vector<8x1xf32>
    %81 = math.exp %80 : vector<8x1xf32>
    %82 = arith.subf %74, %79 : vector<8x1xf32>
    %83 = math.exp %82 : vector<8x1xf32>
    %84 = arith.subf %77, %79 : vector<8x1xf32>
    %85 = math.exp %84 : vector<8x1xf32>
    %86 = arith.addf %81, %83 : vector<8x1xf32>
    %87 = arith.addf %86, %85 : vector<8x1xf32>
    %88 = tpu.reciprocal %87 {approx = true} : vector<8x1xf32> -> vector<8x1xf32>
    %89 = arith.mulf %81, %88 : vector<8x1xf32>
    %90 = vector.extract_strided_slice %11 {offsets = [0, 8], sizes = [8, 8], strides = [1, 1]} : vector<8x32xf32> to vector<8x8xf32>
    %91 = vector.broadcast %89 : vector<8x1xf32> to vector<8x8xf32>
    %92 = arith.mulf %91, %90 : vector<8x8xf32>
    %93 = arith.mulf %83, %88 : vector<8x1xf32>
    %94 = vector.extract_strided_slice %19 {offsets = [0, 8], sizes = [8, 8], strides = [1, 1]} : vector<8x32xf32> to vector<8x8xf32>
    %95 = vector.broadcast %93 : vector<8x1xf32> to vector<8x8xf32>
    %96 = arith.mulf %95, %94 : vector<8x8xf32>
    %97 = arith.addf %92, %96 : vector<8x8xf32>
    %98 = arith.mulf %85, %88 : vector<8x1xf32>
    %99 = vector.extract_strided_slice %27 {offsets = [0, 8], sizes = [8, 8], strides = [1, 1]} : vector<8x32xf32> to vector<8x8xf32>
    %100 = vector.broadcast %98 : vector<8x1xf32> to vector<8x8xf32>
    %101 = arith.mulf %100, %99 : vector<8x8xf32>
    %102 = arith.addf %97, %101 : vector<8x8xf32>
    %103 = vector.extract_strided_slice %2 {offsets = [8, 0], sizes = [8, 32], strides = [1, 1]} : vector<32x32xf32> to vector<8x32xf32>
    %cst_24 = arith.constant dense<0.000000e+00> : vector<8x32xf32>
    %104 = tpu.matmul %102, %103, %cst_24 {dimension_numbers = #tpu.dot_dimension_numbers<[1], [0], [0], [1], [0, 0, 1, 1], [], []>} : vector<8x8xf32>, vector<8x32xf32>, vector<8x32xf32> -> vector<8x32xf32>
    %105 = arith.addf %68, %104 : vector<8x32xf32>
    %106 = vector.extract_strided_slice %30 {offsets = [0, 16], sizes = [8, 8], strides = [1, 1]} : vector<8x32xf32> to vector<8x8xf32>
    %cst_25 = arith.constant dense<0.000000e+00> : vector<8xf32>
    %107 = vector.multi_reduction <add>, %106, %cst_25 [1] : vector<8x8xf32> to vector<8xf32>
    %108 = vector.shape_cast %107 : vector<8xf32> to vector<8x1xf32>
    %109 = vector.extract_strided_slice %31 {offsets = [0, 16], sizes = [8, 8], strides = [1, 1]} : vector<8x32xf32> to vector<8x8xf32>
    %cst_26 = arith.constant dense<0.000000e+00> : vector<8xf32>
    %110 = vector.multi_reduction <add>, %109, %cst_26 [1] : vector<8x8xf32> to vector<8xf32>
    %111 = vector.shape_cast %110 : vector<8xf32> to vector<8x1xf32>
    %112 = vector.extract_strided_slice %32 {offsets = [0, 16], sizes = [8, 8], strides = [1, 1]} : vector<8x32xf32> to vector<8x8xf32>
    %cst_27 = arith.constant dense<0.000000e+00> : vector<8xf32>
    %113 = vector.multi_reduction <add>, %112, %cst_27 [1] : vector<8x8xf32> to vector<8xf32>
    %114 = vector.shape_cast %113 : vector<8xf32> to vector<8x1xf32>
    %115 = arith.maximumf %108, %111 : vector<8x1xf32>
    %116 = arith.maximumf %115, %114 : vector<8x1xf32>
    %117 = arith.subf %108, %116 : vector<8x1xf32>
    %118 = math.exp %117 : vector<8x1xf32>
    %119 = arith.subf %111, %116 : vector<8x1xf32>
    %120 = math.exp %119 : vector<8x1xf32>
    %121 = arith.subf %114, %116 : vector<8x1xf32>
    %122 = math.exp %121 : vector<8x1xf32>
    %123 = arith.addf %118, %120 : vector<8x1xf32>
    %124 = arith.addf %123, %122 : vector<8x1xf32>
    %125 = tpu.reciprocal %124 {approx = true} : vector<8x1xf32> -> vector<8x1xf32>
    %126 = arith.mulf %118, %125 : vector<8x1xf32>
    %127 = vector.extract_strided_slice %11 {offsets = [0, 16], sizes = [8, 8], strides = [1, 1]} : vector<8x32xf32> to vector<8x8xf32>
    %128 = vector.broadcast %126 : vector<8x1xf32> to vector<8x8xf32>
    %129 = arith.mulf %128, %127 : vector<8x8xf32>
    %130 = arith.mulf %120, %125 : vector<8x1xf32>
    %131 = vector.extract_strided_slice %19 {offsets = [0, 16], sizes = [8, 8], strides = [1, 1]} : vector<8x32xf32> to vector<8x8xf32>
    %132 = vector.broadcast %130 : vector<8x1xf32> to vector<8x8xf32>
    %133 = arith.mulf %132, %131 : vector<8x8xf32>
    %134 = arith.addf %129, %133 : vector<8x8xf32>
    %135 = arith.mulf %122, %125 : vector<8x1xf32>
    %136 = vector.extract_strided_slice %27 {offsets = [0, 16], sizes = [8, 8], strides = [1, 1]} : vector<8x32xf32> to vector<8x8xf32>
    %137 = vector.broadcast %135 : vector<8x1xf32> to vector<8x8xf32>
    %138 = arith.mulf %137, %136 : vector<8x8xf32>
    %139 = arith.addf %134, %138 : vector<8x8xf32>
    %140 = vector.extract_strided_slice %2 {offsets = [16, 0], sizes = [8, 32], strides = [1, 1]} : vector<32x32xf32> to vector<8x32xf32>
    %cst_28 = arith.constant dense<0.000000e+00> : vector<8x32xf32>
    %141 = tpu.matmul %139, %140, %cst_28 {dimension_numbers = #tpu.dot_dimension_numbers<[1], [0], [0], [1], [0, 0, 1, 1], [], []>} : vector<8x8xf32>, vector<8x32xf32>, vector<8x32xf32> -> vector<8x32xf32>
    %142 = arith.addf %105, %141 : vector<8x32xf32>
    %143 = vector.extract_strided_slice %30 {offsets = [0, 24], sizes = [8, 8], strides = [1, 1]} : vector<8x32xf32> to vector<8x8xf32>
    %cst_29 = arith.constant dense<0.000000e+00> : vector<8xf32>
    %144 = vector.multi_reduction <add>, %143, %cst_29 [1] : vector<8x8xf32> to vector<8xf32>
    %145 = vector.shape_cast %144 : vector<8xf32> to vector<8x1xf32>
    %146 = vector.extract_strided_slice %31 {offsets = [0, 24], sizes = [8, 8], strides = [1, 1]} : vector<8x32xf32> to vector<8x8xf32>
    %cst_30 = arith.constant dense<0.000000e+00> : vector<8xf32>
    %147 = vector.multi_reduction <add>, %146, %cst_30 [1] : vector<8x8xf32> to vector<8xf32>
    %148 = vector.shape_cast %147 : vector<8xf32> to vector<8x1xf32>
    %149 = vector.extract_strided_slice %32 {offsets = [0, 24], sizes = [8, 8], strides = [1, 1]} : vector<8x32xf32> to vector<8x8xf32>
    %cst_31 = arith.constant dense<0.000000e+00> : vector<8xf32>
    %150 = vector.multi_reduction <add>, %149, %cst_31 [1] : vector<8x8xf32> to vector<8xf32>
    %151 = vector.shape_cast %150 : vector<8xf32> to vector<8x1xf32>
    %152 = arith.maximumf %145, %148 : vector<8x1xf32>
    %153 = arith.maximumf %152, %151 : vector<8x1xf32>
    %154 = arith.subf %145, %153 : vector<8x1xf32>
    %155 = math.exp %154 : vector<8x1xf32>
    %156 = arith.subf %148, %153 : vector<8x1xf32>
    %157 = math.exp %156 : vector<8x1xf32>
    %158 = arith.subf %151, %153 : vector<8x1xf32>
    %159 = math.exp %158 : vector<8x1xf32>
    %160 = arith.addf %155, %157 : vector<8x1xf32>
    %161 = arith.addf %160, %159 : vector<8x1xf32>
    %162 = tpu.reciprocal %161 {approx = true} : vector<8x1xf32> -> vector<8x1xf32>
    %163 = arith.mulf %155, %162 : vector<8x1xf32>
    %164 = vector.extract_strided_slice %11 {offsets = [0, 24], sizes = [8, 8], strides = [1, 1]} : vector<8x32xf32> to vector<8x8xf32>
    %165 = vector.broadcast %163 : vector<8x1xf32> to vector<8x8xf32>
    %166 = arith.mulf %165, %164 : vector<8x8xf32>
    %167 = arith.mulf %157, %162 : vector<8x1xf32>
    %168 = vector.extract_strided_slice %19 {offsets = [0, 24], sizes = [8, 8], strides = [1, 1]} : vector<8x32xf32> to vector<8x8xf32>
    %169 = vector.broadcast %167 : vector<8x1xf32> to vector<8x8xf32>
    %170 = arith.mulf %169, %168 : vector<8x8xf32>
    %171 = arith.addf %166, %170 : vector<8x8xf32>
    %172 = arith.mulf %159, %162 : vector<8x1xf32>
    %173 = vector.extract_strided_slice %27 {offsets = [0, 24], sizes = [8, 8], strides = [1, 1]} : vector<8x32xf32> to vector<8x8xf32>
    %174 = vector.broadcast %172 : vector<8x1xf32> to vector<8x8xf32>
    %175 = arith.mulf %174, %173 : vector<8x8xf32>
    %176 = arith.addf %171, %175 : vector<8x8xf32>
    %177 = vector.extract_strided_slice %2 {offsets = [24, 0], sizes = [8, 32], strides = [1, 1]} : vector<32x32xf32> to vector<8x32xf32>
    %cst_32 = arith.constant dense<0.000000e+00> : vector<8x32xf32>
    %178 = tpu.matmul %176, %177, %cst_32 {dimension_numbers = #tpu.dot_dimension_numbers<[1], [0], [0], [1], [0, 0, 1, 1], [], []>} : vector<8x8xf32>, vector<8x32xf32>, vector<8x32xf32> -> vector<8x32xf32>
    %179 = arith.addf %142, %178 : vector<8x32xf32>
    %180 = vector.broadcast %3 : vector<1x32xf32> to vector<8x32xf32>
    %181 = arith.addf %179, %180 : vector<8x32xf32>
    %cst_33 = arith.constant 0.353553385 : f32
    %182 = vector.broadcast %cst_33 : f32 to vector<8x32xf32>
    %183 = arith.mulf %17, %182 : vector<8x32xf32>
    %184 = arith.mulf %183, %10 : vector<8x32xf32>
    %185 = arith.mulf %183, %18 : vector<8x32xf32>
    %186 = arith.mulf %183, %26 : vector<8x32xf32>
    %187 = vector.extract_strided_slice %184 {offsets = [0, 0], sizes = [8, 8], strides = [1, 1]} : vector<8x32xf32> to vector<8x8xf32>
    %cst_34 = arith.constant dense<0.000000e+00> : vector<8xf32>
    %188 = vector.multi_reduction <add>, %187, %cst_34 [1] : vector<8x8xf32> to vector<8xf32>
    %189 = vector.shape_cast %188 : vector<8xf32> to vector<8x1xf32>
    %190 = vector.extract_strided_slice %185 {offsets = [0, 0], sizes = [8, 8], strides = [1, 1]} : vector<8x32xf32> to vector<8x8xf32>
    %cst_35 = arith.constant dense<0.000000e+00> : vector<8xf32>
    %191 = vector.multi_reduction <add>, %190, %cst_35 [1] : vector<8x8xf32> to vector<8xf32>
    %192 = vector.shape_cast %191 : vector<8xf32> to vector<8x1xf32>
    %193 = vector.extract_strided_slice %186 {offsets = [0, 0], sizes = [8, 8], strides = [1, 1]} : vector<8x32xf32> to vector<8x8xf32>
    %cst_36 = arith.constant dense<0.000000e+00> : vector<8xf32>
    %194 = vector.multi_reduction <add>, %193, %cst_36 [1] : vector<8x8xf32> to vector<8xf32>
    %195 = vector.shape_cast %194 : vector<8xf32> to vector<8x1xf32>
    %196 = arith.maximumf %189, %192 : vector<8x1xf32>
    %197 = arith.maximumf %196, %195 : vector<8x1xf32>
    %198 = arith.subf %189, %197 : vector<8x1xf32>
    %199 = math.exp %198 : vector<8x1xf32>
    %200 = arith.subf %192, %197 : vector<8x1xf32>
    %201 = math.exp %200 : vector<8x1xf32>
    %202 = arith.subf %195, %197 : vector<8x1xf32>
    %203 = math.exp %202 : vector<8x1xf32>
    %204 = arith.addf %199, %201 : vector<8x1xf32>
    %205 = arith.addf %204, %203 : vector<8x1xf32>
    %206 = tpu.reciprocal %205 {approx = true} : vector<8x1xf32> -> vector<8x1xf32>
    %207 = arith.mulf %199, %206 : vector<8x1xf32>
    %208 = vector.extract_strided_slice %11 {offsets = [0, 0], sizes = [8, 8], strides = [1, 1]} : vector<8x32xf32> to vector<8x8xf32>
    %209 = vector.broadcast %207 : vector<8x1xf32> to vector<8x8xf32>
    %210 = arith.mulf %209, %208 : vector<8x8xf32>
    %211 = arith.mulf %201, %206 : vector<8x1xf32>
    %212 = vector.extract_strided_slice %19 {offsets = [0, 0], sizes = [8, 8], strides = [1, 1]} : vector<8x32xf32> to vector<8x8xf32>
    %213 = vector.broadcast %211 : vector<8x1xf32> to vector<8x8xf32>
    %214 = arith.mulf %213, %212 : vector<8x8xf32>
    %215 = arith.addf %210, %214 : vector<8x8xf32>
    %216 = arith.mulf %203, %206 : vector<8x1xf32>
    %217 = vector.extract_strided_slice %27 {offsets = [0, 0], sizes = [8, 8], strides = [1, 1]} : vector<8x32xf32> to vector<8x8xf32>
    %218 = vector.broadcast %216 : vector<8x1xf32> to vector<8x8xf32>
    %219 = arith.mulf %218, %217 : vector<8x8xf32>
    %220 = arith.addf %215, %219 : vector<8x8xf32>
    %221 = vector.extract_strided_slice %2 {offsets = [0, 0], sizes = [8, 32], strides = [1, 1]} : vector<32x32xf32> to vector<8x32xf32>
    %cst_37 = arith.constant dense<0.000000e+00> : vector<8x32xf32>
    %222 = tpu.matmul %220, %221, %cst_37 {dimension_numbers = #tpu.dot_dimension_numbers<[1], [0], [0], [1], [0, 0, 1, 1], [], []>} : vector<8x8xf32>, vector<8x32xf32>, vector<8x32xf32> -> vector<8x32xf32>
    %223 = vector.extract_strided_slice %184 {offsets = [0, 8], sizes = [8, 8], strides = [1, 1]} : vector<8x32xf32> to vector<8x8xf32>
    %cst_38 = arith.constant dense<0.000000e+00> : vector<8xf32>
    %224 = vector.multi_reduction <add>, %223, %cst_38 [1] : vector<8x8xf32> to vector<8xf32>
    %225 = vector.shape_cast %224 : vector<8xf32> to vector<8x1xf32>
    %226 = vector.extract_strided_slice %185 {offsets = [0, 8], sizes = [8, 8], strides = [1, 1]} : vector<8x32xf32> to vector<8x8xf32>
    %cst_39 = arith.constant dense<0.000000e+00> : vector<8xf32>
    %227 = vector.multi_reduction <add>, %226, %cst_39 [1] : vector<8x8xf32> to vector<8xf32>
    %228 = vector.shape_cast %227 : vector<8xf32> to vector<8x1xf32>
    %229 = vector.extract_strided_slice %186 {offsets = [0, 8], sizes = [8, 8], strides = [1, 1]} : vector<8x32xf32> to vector<8x8xf32>
    %cst_40 = arith.constant dense<0.000000e+00> : vector<8xf32>
    %230 = vector.multi_reduction <add>, %229, %cst_40 [1] : vector<8x8xf32> to vector<8xf32>
    %231 = vector.shape_cast %230 : vector<8xf32> to vector<8x1xf32>
    %232 = arith.maximumf %225, %228 : vector<8x1xf32>
    %233 = arith.maximumf %232, %231 : vector<8x1xf32>
    %234 = arith.subf %225, %233 : vector<8x1xf32>
    %235 = math.exp %234 : vector<8x1xf32>
    %236 = arith.subf %228, %233 : vector<8x1xf32>
    %237 = math.exp %236 : vector<8x1xf32>
    %238 = arith.subf %231, %233 : vector<8x1xf32>
    %239 = math.exp %238 : vector<8x1xf32>
    %240 = arith.addf %235, %237 : vector<8x1xf32>
    %241 = arith.addf %240, %239 : vector<8x1xf32>
    %242 = tpu.reciprocal %241 {approx = true} : vector<8x1xf32> -> vector<8x1xf32>
    %243 = arith.mulf %235, %242 : vector<8x1xf32>
    %244 = vector.extract_strided_slice %11 {offsets = [0, 8], sizes = [8, 8], strides = [1, 1]} : vector<8x32xf32> to vector<8x8xf32>
    %245 = vector.broadcast %243 : vector<8x1xf32> to vector<8x8xf32>
    %246 = arith.mulf %245, %244 : vector<8x8xf32>
    %247 = arith.mulf %237, %242 : vector<8x1xf32>
    %248 = vector.extract_strided_slice %19 {offsets = [0, 8], sizes = [8, 8], strides = [1, 1]} : vector<8x32xf32> to vector<8x8xf32>
    %249 = vector.broadcast %247 : vector<8x1xf32> to vector<8x8xf32>
    %250 = arith.mulf %249, %248 : vector<8x8xf32>
    %251 = arith.addf %246, %250 : vector<8x8xf32>
    %252 = arith.mulf %239, %242 : vector<8x1xf32>
    %253 = vector.extract_strided_slice %27 {offsets = [0, 8], sizes = [8, 8], strides = [1, 1]} : vector<8x32xf32> to vector<8x8xf32>
    %254 = vector.broadcast %252 : vector<8x1xf32> to vector<8x8xf32>
    %255 = arith.mulf %254, %253 : vector<8x8xf32>
    %256 = arith.addf %251, %255 : vector<8x8xf32>
    %257 = vector.extract_strided_slice %2 {offsets = [8, 0], sizes = [8, 32], strides = [1, 1]} : vector<32x32xf32> to vector<8x32xf32>
    %cst_41 = arith.constant dense<0.000000e+00> : vector<8x32xf32>
    %258 = tpu.matmul %256, %257, %cst_41 {dimension_numbers = #tpu.dot_dimension_numbers<[1], [0], [0], [1], [0, 0, 1, 1], [], []>} : vector<8x8xf32>, vector<8x32xf32>, vector<8x32xf32> -> vector<8x32xf32>
    %259 = arith.addf %222, %258 : vector<8x32xf32>
    %260 = vector.extract_strided_slice %184 {offsets = [0, 16], sizes = [8, 8], strides = [1, 1]} : vector<8x32xf32> to vector<8x8xf32>
    %cst_42 = arith.constant dense<0.000000e+00> : vector<8xf32>
    %261 = vector.multi_reduction <add>, %260, %cst_42 [1] : vector<8x8xf32> to vector<8xf32>
    %262 = vector.shape_cast %261 : vector<8xf32> to vector<8x1xf32>
    %263 = vector.extract_strided_slice %185 {offsets = [0, 16], sizes = [8, 8], strides = [1, 1]} : vector<8x32xf32> to vector<8x8xf32>
    %cst_43 = arith.constant dense<0.000000e+00> : vector<8xf32>
    %264 = vector.multi_reduction <add>, %263, %cst_43 [1] : vector<8x8xf32> to vector<8xf32>
    %265 = vector.shape_cast %264 : vector<8xf32> to vector<8x1xf32>
    %266 = vector.extract_strided_slice %186 {offsets = [0, 16], sizes = [8, 8], strides = [1, 1]} : vector<8x32xf32> to vector<8x8xf32>
    %cst_44 = arith.constant dense<0.000000e+00> : vector<8xf32>
    %267 = vector.multi_reduction <add>, %266, %cst_44 [1] : vector<8x8xf32> to vector<8xf32>
    %268 = vector.shape_cast %267 : vector<8xf32> to vector<8x1xf32>
    %269 = arith.maximumf %262, %265 : vector<8x1xf32>
    %270 = arith.maximumf %269, %268 : vector<8x1xf32>
    %271 = arith.subf %262, %270 : vector<8x1xf32>
    %272 = math.exp %271 : vector<8x1xf32>
    %273 = arith.subf %265, %270 : vector<8x1xf32>
    %274 = math.exp %273 : vector<8x1xf32>
    %275 = arith.subf %268, %270 : vector<8x1xf32>
    %276 = math.exp %275 : vector<8x1xf32>
    %277 = arith.addf %272, %274 : vector<8x1xf32>
    %278 = arith.addf %277, %276 : vector<8x1xf32>
    %279 = tpu.reciprocal %278 {approx = true} : vector<8x1xf32> -> vector<8x1xf32>
    %280 = arith.mulf %272, %279 : vector<8x1xf32>
    %281 = vector.extract_strided_slice %11 {offsets = [0, 16], sizes = [8, 8], strides = [1, 1]} : vector<8x32xf32> to vector<8x8xf32>
    %282 = vector.broadcast %280 : vector<8x1xf32> to vector<8x8xf32>
    %283 = arith.mulf %282, %281 : vector<8x8xf32>
    %284 = arith.mulf %274, %279 : vector<8x1xf32>
    %285 = vector.extract_strided_slice %19 {offsets = [0, 16], sizes = [8, 8], strides = [1, 1]} : vector<8x32xf32> to vector<8x8xf32>
    %286 = vector.broadcast %284 : vector<8x1xf32> to vector<8x8xf32>
    %287 = arith.mulf %286, %285 : vector<8x8xf32>
    %288 = arith.addf %283, %287 : vector<8x8xf32>
    %289 = arith.mulf %276, %279 : vector<8x1xf32>
    %290 = vector.extract_strided_slice %27 {offsets = [0, 16], sizes = [8, 8], strides = [1, 1]} : vector<8x32xf32> to vector<8x8xf32>
    %291 = vector.broadcast %289 : vector<8x1xf32> to vector<8x8xf32>
    %292 = arith.mulf %291, %290 : vector<8x8xf32>
    %293 = arith.addf %288, %292 : vector<8x8xf32>
    %294 = vector.extract_strided_slice %2 {offsets = [16, 0], sizes = [8, 32], strides = [1, 1]} : vector<32x32xf32> to vector<8x32xf32>
    %cst_45 = arith.constant dense<0.000000e+00> : vector<8x32xf32>
    %295 = tpu.matmul %293, %294, %cst_45 {dimension_numbers = #tpu.dot_dimension_numbers<[1], [0], [0], [1], [0, 0, 1, 1], [], []>} : vector<8x8xf32>, vector<8x32xf32>, vector<8x32xf32> -> vector<8x32xf32>
    %296 = arith.addf %259, %295 : vector<8x32xf32>
    %297 = vector.extract_strided_slice %184 {offsets = [0, 24], sizes = [8, 8], strides = [1, 1]} : vector<8x32xf32> to vector<8x8xf32>
    %cst_46 = arith.constant dense<0.000000e+00> : vector<8xf32>
    %298 = vector.multi_reduction <add>, %297, %cst_46 [1] : vector<8x8xf32> to vector<8xf32>
    %299 = vector.shape_cast %298 : vector<8xf32> to vector<8x1xf32>
    %300 = vector.extract_strided_slice %185 {offsets = [0, 24], sizes = [8, 8], strides = [1, 1]} : vector<8x32xf32> to vector<8x8xf32>
    %cst_47 = arith.constant dense<0.000000e+00> : vector<8xf32>
    %301 = vector.multi_reduction <add>, %300, %cst_47 [1] : vector<8x8xf32> to vector<8xf32>
    %302 = vector.shape_cast %301 : vector<8xf32> to vector<8x1xf32>
    %303 = vector.extract_strided_slice %186 {offsets = [0, 24], sizes = [8, 8], strides = [1, 1]} : vector<8x32xf32> to vector<8x8xf32>
    %cst_48 = arith.constant dense<0.000000e+00> : vector<8xf32>
    %304 = vector.multi_reduction <add>, %303, %cst_48 [1] : vector<8x8xf32> to vector<8xf32>
    %305 = vector.shape_cast %304 : vector<8xf32> to vector<8x1xf32>
    %306 = arith.maximumf %299, %302 : vector<8x1xf32>
    %307 = arith.maximumf %306, %305 : vector<8x1xf32>
    %308 = arith.subf %299, %307 : vector<8x1xf32>
    %309 = math.exp %308 : vector<8x1xf32>
    %310 = arith.subf %302, %307 : vector<8x1xf32>
    %311 = math.exp %310 : vector<8x1xf32>
    %312 = arith.subf %305, %307 : vector<8x1xf32>
    %313 = math.exp %312 : vector<8x1xf32>
    %314 = arith.addf %309, %311 : vector<8x1xf32>
    %315 = arith.addf %314, %313 : vector<8x1xf32>
    %316 = tpu.reciprocal %315 {approx = true} : vector<8x1xf32> -> vector<8x1xf32>
    %317 = arith.mulf %309, %316 : vector<8x1xf32>
    %318 = vector.extract_strided_slice %11 {offsets = [0, 24], sizes = [8, 8], strides = [1, 1]} : vector<8x32xf32> to vector<8x8xf32>
    %319 = vector.broadcast %317 : vector<8x1xf32> to vector<8x8xf32>
    %320 = arith.mulf %319, %318 : vector<8x8xf32>
    %321 = arith.mulf %311, %316 : vector<8x1xf32>
    %322 = vector.extract_strided_slice %19 {offsets = [0, 24], sizes = [8, 8], strides = [1, 1]} : vector<8x32xf32> to vector<8x8xf32>
    %323 = vector.broadcast %321 : vector<8x1xf32> to vector<8x8xf32>
    %324 = arith.mulf %323, %322 : vector<8x8xf32>
    %325 = arith.addf %320, %324 : vector<8x8xf32>
    %326 = arith.mulf %313, %316 : vector<8x1xf32>
    %327 = vector.extract_strided_slice %27 {offsets = [0, 24], sizes = [8, 8], strides = [1, 1]} : vector<8x32xf32> to vector<8x8xf32>
    %328 = vector.broadcast %326 : vector<8x1xf32> to vector<8x8xf32>
    %329 = arith.mulf %328, %327 : vector<8x8xf32>
    %330 = arith.addf %325, %329 : vector<8x8xf32>
    %331 = vector.extract_strided_slice %2 {offsets = [24, 0], sizes = [8, 32], strides = [1, 1]} : vector<32x32xf32> to vector<8x32xf32>
    %cst_49 = arith.constant dense<0.000000e+00> : vector<8x32xf32>
    %332 = tpu.matmul %330, %331, %cst_49 {dimension_numbers = #tpu.dot_dimension_numbers<[1], [0], [0], [1], [0, 0, 1, 1], [], []>} : vector<8x8xf32>, vector<8x32xf32>, vector<8x32xf32> -> vector<8x32xf32>
    %333 = arith.addf %296, %332 : vector<8x32xf32>
    %334 = vector.broadcast %3 : vector<1x32xf32> to vector<8x32xf32>
    %335 = arith.addf %333, %334 : vector<8x32xf32>
    %cst_50 = arith.constant 0.353553385 : f32
    %336 = vector.broadcast %cst_50 : f32 to vector<8x32xf32>
    %337 = arith.mulf %25, %336 : vector<8x32xf32>
    %338 = arith.mulf %337, %10 : vector<8x32xf32>
    %339 = arith.mulf %337, %18 : vector<8x32xf32>
    %340 = arith.mulf %337, %26 : vector<8x32xf32>
    %341 = vector.extract_strided_slice %338 {offsets = [0, 0], sizes = [8, 8], strides = [1, 1]} : vector<8x32xf32> to vector<8x8xf32>
    %cst_51 = arith.constant dense<0.000000e+00> : vector<8xf32>
    %342 = vector.multi_reduction <add>, %341, %cst_51 [1] : vector<8x8xf32> to vector<8xf32>
    %343 = vector.shape_cast %342 : vector<8xf32> to vector<8x1xf32>
    %344 = vector.extract_strided_slice %339 {offsets = [0, 0], sizes = [8, 8], strides = [1, 1]} : vector<8x32xf32> to vector<8x8xf32>
    %cst_52 = arith.constant dense<0.000000e+00> : vector<8xf32>
    %345 = vector.multi_reduction <add>, %344, %cst_52 [1] : vector<8x8xf32> to vector<8xf32>
    %346 = vector.shape_cast %345 : vector<8xf32> to vector<8x1xf32>
    %347 = vector.extract_strided_slice %340 {offsets = [0, 0], sizes = [8, 8], strides = [1, 1]} : vector<8x32xf32> to vector<8x8xf32>
    %cst_53 = arith.constant dense<0.000000e+00> : vector<8xf32>
    %348 = vector.multi_reduction <add>, %347, %cst_53 [1] : vector<8x8xf32> to vector<8xf32>
    %349 = vector.shape_cast %348 : vector<8xf32> to vector<8x1xf32>
    %350 = arith.maximumf %343, %346 : vector<8x1xf32>
    %351 = arith.maximumf %350, %349 : vector<8x1xf32>
    %352 = arith.subf %343, %351 : vector<8x1xf32>
    %353 = math.exp %352 : vector<8x1xf32>
    %354 = arith.subf %346, %351 : vector<8x1xf32>
    %355 = math.exp %354 : vector<8x1xf32>
    %356 = arith.subf %349, %351 : vector<8x1xf32>
    %357 = math.exp %356 : vector<8x1xf32>
    %358 = arith.addf %353, %355 : vector<8x1xf32>
    %359 = arith.addf %358, %357 : vector<8x1xf32>
    %360 = tpu.reciprocal %359 {approx = true} : vector<8x1xf32> -> vector<8x1xf32>
    %361 = arith.mulf %353, %360 : vector<8x1xf32>
    %362 = vector.extract_strided_slice %11 {offsets = [0, 0], sizes = [8, 8], strides = [1, 1]} : vector<8x32xf32> to vector<8x8xf32>
    %363 = vector.broadcast %361 : vector<8x1xf32> to vector<8x8xf32>
    %364 = arith.mulf %363, %362 : vector<8x8xf32>
    %365 = arith.mulf %355, %360 : vector<8x1xf32>
    %366 = vector.extract_strided_slice %19 {offsets = [0, 0], sizes = [8, 8], strides = [1, 1]} : vector<8x32xf32> to vector<8x8xf32>
    %367 = vector.broadcast %365 : vector<8x1xf32> to vector<8x8xf32>
    %368 = arith.mulf %367, %366 : vector<8x8xf32>
    %369 = arith.addf %364, %368 : vector<8x8xf32>
    %370 = arith.mulf %357, %360 : vector<8x1xf32>
    %371 = vector.extract_strided_slice %27 {offsets = [0, 0], sizes = [8, 8], strides = [1, 1]} : vector<8x32xf32> to vector<8x8xf32>
    %372 = vector.broadcast %370 : vector<8x1xf32> to vector<8x8xf32>
    %373 = arith.mulf %372, %371 : vector<8x8xf32>
    %374 = arith.addf %369, %373 : vector<8x8xf32>
    %375 = vector.extract_strided_slice %2 {offsets = [0, 0], sizes = [8, 32], strides = [1, 1]} : vector<32x32xf32> to vector<8x32xf32>
    %cst_54 = arith.constant dense<0.000000e+00> : vector<8x32xf32>
    %376 = tpu.matmul %374, %375, %cst_54 {dimension_numbers = #tpu.dot_dimension_numbers<[1], [0], [0], [1], [0, 0, 1, 1], [], []>} : vector<8x8xf32>, vector<8x32xf32>, vector<8x32xf32> -> vector<8x32xf32>
    %377 = vector.extract_strided_slice %338 {offsets = [0, 8], sizes = [8, 8], strides = [1, 1]} : vector<8x32xf32> to vector<8x8xf32>
    %cst_55 = arith.constant dense<0.000000e+00> : vector<8xf32>
    %378 = vector.multi_reduction <add>, %377, %cst_55 [1] : vector<8x8xf32> to vector<8xf32>
    %379 = vector.shape_cast %378 : vector<8xf32> to vector<8x1xf32>
    %380 = vector.extract_strided_slice %339 {offsets = [0, 8], sizes = [8, 8], strides = [1, 1]} : vector<8x32xf32> to vector<8x8xf32>
    %cst_56 = arith.constant dense<0.000000e+00> : vector<8xf32>
    %381 = vector.multi_reduction <add>, %380, %cst_56 [1] : vector<8x8xf32> to vector<8xf32>
    %382 = vector.shape_cast %381 : vector<8xf32> to vector<8x1xf32>
    %383 = vector.extract_strided_slice %340 {offsets = [0, 8], sizes = [8, 8], strides = [1, 1]} : vector<8x32xf32> to vector<8x8xf32>
    %cst_57 = arith.constant dense<0.000000e+00> : vector<8xf32>
    %384 = vector.multi_reduction <add>, %383, %cst_57 [1] : vector<8x8xf32> to vector<8xf32>
    %385 = vector.shape_cast %384 : vector<8xf32> to vector<8x1xf32>
    %386 = arith.maximumf %379, %382 : vector<8x1xf32>
    %387 = arith.maximumf %386, %385 : vector<8x1xf32>
    %388 = arith.subf %379, %387 : vector<8x1xf32>
    %389 = math.exp %388 : vector<8x1xf32>
    %390 = arith.subf %382, %387 : vector<8x1xf32>
    %391 = math.exp %390 : vector<8x1xf32>
    %392 = arith.subf %385, %387 : vector<8x1xf32>
    %393 = math.exp %392 : vector<8x1xf32>
    %394 = arith.addf %389, %391 : vector<8x1xf32>
    %395 = arith.addf %394, %393 : vector<8x1xf32>
    %396 = tpu.reciprocal %395 {approx = true} : vector<8x1xf32> -> vector<8x1xf32>
    %397 = arith.mulf %389, %396 : vector<8x1xf32>
    %398 = vector.extract_strided_slice %11 {offsets = [0, 8], sizes = [8, 8], strides = [1, 1]} : vector<8x32xf32> to vector<8x8xf32>
    %399 = vector.broadcast %397 : vector<8x1xf32> to vector<8x8xf32>
    %400 = arith.mulf %399, %398 : vector<8x8xf32>
    %401 = arith.mulf %391, %396 : vector<8x1xf32>
    %402 = vector.extract_strided_slice %19 {offsets = [0, 8], sizes = [8, 8], strides = [1, 1]} : vector<8x32xf32> to vector<8x8xf32>
    %403 = vector.broadcast %401 : vector<8x1xf32> to vector<8x8xf32>
    %404 = arith.mulf %403, %402 : vector<8x8xf32>
    %405 = arith.addf %400, %404 : vector<8x8xf32>
    %406 = arith.mulf %393, %396 : vector<8x1xf32>
    %407 = vector.extract_strided_slice %27 {offsets = [0, 8], sizes = [8, 8], strides = [1, 1]} : vector<8x32xf32> to vector<8x8xf32>
    %408 = vector.broadcast %406 : vector<8x1xf32> to vector<8x8xf32>
    %409 = arith.mulf %408, %407 : vector<8x8xf32>
    %410 = arith.addf %405, %409 : vector<8x8xf32>
    %411 = vector.extract_strided_slice %2 {offsets = [8, 0], sizes = [8, 32], strides = [1, 1]} : vector<32x32xf32> to vector<8x32xf32>
    %cst_58 = arith.constant dense<0.000000e+00> : vector<8x32xf32>
    %412 = tpu.matmul %410, %411, %cst_58 {dimension_numbers = #tpu.dot_dimension_numbers<[1], [0], [0], [1], [0, 0, 1, 1], [], []>} : vector<8x8xf32>, vector<8x32xf32>, vector<8x32xf32> -> vector<8x32xf32>
    %413 = arith.addf %376, %412 : vector<8x32xf32>
    %414 = vector.extract_strided_slice %338 {offsets = [0, 16], sizes = [8, 8], strides = [1, 1]} : vector<8x32xf32> to vector<8x8xf32>
    %cst_59 = arith.constant dense<0.000000e+00> : vector<8xf32>
    %415 = vector.multi_reduction <add>, %414, %cst_59 [1] : vector<8x8xf32> to vector<8xf32>
    %416 = vector.shape_cast %415 : vector<8xf32> to vector<8x1xf32>
    %417 = vector.extract_strided_slice %339 {offsets = [0, 16], sizes = [8, 8], strides = [1, 1]} : vector<8x32xf32> to vector<8x8xf32>
    %cst_60 = arith.constant dense<0.000000e+00> : vector<8xf32>
    %418 = vector.multi_reduction <add>, %417, %cst_60 [1] : vector<8x8xf32> to vector<8xf32>
    %419 = vector.shape_cast %418 : vector<8xf32> to vector<8x1xf32>
    %420 = vector.extract_strided_slice %340 {offsets = [0, 16], sizes = [8, 8], strides = [1, 1]} : vector<8x32xf32> to vector<8x8xf32>
    %cst_61 = arith.constant dense<0.000000e+00> : vector<8xf32>
    %421 = vector.multi_reduction <add>, %420, %cst_61 [1] : vector<8x8xf32> to vector<8xf32>
    %422 = vector.shape_cast %421 : vector<8xf32> to vector<8x1xf32>
    %423 = arith.maximumf %416, %419 : vector<8x1xf32>
    %424 = arith.maximumf %423, %422 : vector<8x1xf32>
    %425 = arith.subf %416, %424 : vector<8x1xf32>
    %426 = math.exp %425 : vector<8x1xf32>
    %427 = arith.subf %419, %424 : vector<8x1xf32>
    %428 = math.exp %427 : vector<8x1xf32>
    %429 = arith.subf %422, %424 : vector<8x1xf32>
    %430 = math.exp %429 : vector<8x1xf32>
    %431 = arith.addf %426, %428 : vector<8x1xf32>
    %432 = arith.addf %431, %430 : vector<8x1xf32>
    %433 = tpu.reciprocal %432 {approx = true} : vector<8x1xf32> -> vector<8x1xf32>
    %434 = arith.mulf %426, %433 : vector<8x1xf32>
    %435 = vector.extract_strided_slice %11 {offsets = [0, 16], sizes = [8, 8], strides = [1, 1]} : vector<8x32xf32> to vector<8x8xf32>
    %436 = vector.broadcast %434 : vector<8x1xf32> to vector<8x8xf32>
    %437 = arith.mulf %436, %435 : vector<8x8xf32>
    %438 = arith.mulf %428, %433 : vector<8x1xf32>
    %439 = vector.extract_strided_slice %19 {offsets = [0, 16], sizes = [8, 8], strides = [1, 1]} : vector<8x32xf32> to vector<8x8xf32>
    %440 = vector.broadcast %438 : vector<8x1xf32> to vector<8x8xf32>
    %441 = arith.mulf %440, %439 : vector<8x8xf32>
    %442 = arith.addf %437, %441 : vector<8x8xf32>
    %443 = arith.mulf %430, %433 : vector<8x1xf32>
    %444 = vector.extract_strided_slice %27 {offsets = [0, 16], sizes = [8, 8], strides = [1, 1]} : vector<8x32xf32> to vector<8x8xf32>
    %445 = vector.broadcast %443 : vector<8x1xf32> to vector<8x8xf32>
    %446 = arith.mulf %445, %444 : vector<8x8xf32>
    %447 = arith.addf %442, %446 : vector<8x8xf32>
    %448 = vector.extract_strided_slice %2 {offsets = [16, 0], sizes = [8, 32], strides = [1, 1]} : vector<32x32xf32> to vector<8x32xf32>
    %cst_62 = arith.constant dense<0.000000e+00> : vector<8x32xf32>
    %449 = tpu.matmul %447, %448, %cst_62 {dimension_numbers = #tpu.dot_dimension_numbers<[1], [0], [0], [1], [0, 0, 1, 1], [], []>} : vector<8x8xf32>, vector<8x32xf32>, vector<8x32xf32> -> vector<8x32xf32>
    %450 = arith.addf %413, %449 : vector<8x32xf32>
    %451 = vector.extract_strided_slice %338 {offsets = [0, 24], sizes = [8, 8], strides = [1, 1]} : vector<8x32xf32> to vector<8x8xf32>
    %cst_63 = arith.constant dense<0.000000e+00> : vector<8xf32>
    %452 = vector.multi_reduction <add>, %451, %cst_63 [1] : vector<8x8xf32> to vector<8xf32>
    %453 = vector.shape_cast %452 : vector<8xf32> to vector<8x1xf32>
    %454 = vector.extract_strided_slice %339 {offsets = [0, 24], sizes = [8, 8], strides = [1, 1]} : vector<8x32xf32> to vector<8x8xf32>
    %cst_64 = arith.constant dense<0.000000e+00> : vector<8xf32>
    %455 = vector.multi_reduction <add>, %454, %cst_64 [1] : vector<8x8xf32> to vector<8xf32>
    %456 = vector.shape_cast %455 : vector<8xf32> to vector<8x1xf32>
    %457 = vector.extract_strided_slice %340 {offsets = [0, 24], sizes = [8, 8], strides = [1, 1]} : vector<8x32xf32> to vector<8x8xf32>
    %cst_65 = arith.constant dense<0.000000e+00> : vector<8xf32>
    %458 = vector.multi_reduction <add>, %457, %cst_65 [1] : vector<8x8xf32> to vector<8xf32>
    %459 = vector.shape_cast %458 : vector<8xf32> to vector<8x1xf32>
    %460 = arith.maximumf %453, %456 : vector<8x1xf32>
    %461 = arith.maximumf %460, %459 : vector<8x1xf32>
    %462 = arith.subf %453, %461 : vector<8x1xf32>
    %463 = math.exp %462 : vector<8x1xf32>
    %464 = arith.subf %456, %461 : vector<8x1xf32>
    %465 = math.exp %464 : vector<8x1xf32>
    %466 = arith.subf %459, %461 : vector<8x1xf32>
    %467 = math.exp %466 : vector<8x1xf32>
    %468 = arith.addf %463, %465 : vector<8x1xf32>
    %469 = arith.addf %468, %467 : vector<8x1xf32>
    %470 = tpu.reciprocal %469 {approx = true} : vector<8x1xf32> -> vector<8x1xf32>
    %471 = arith.mulf %463, %470 : vector<8x1xf32>
    %472 = vector.extract_strided_slice %11 {offsets = [0, 24], sizes = [8, 8], strides = [1, 1]} : vector<8x32xf32> to vector<8x8xf32>
    %473 = vector.broadcast %471 : vector<8x1xf32> to vector<8x8xf32>
    %474 = arith.mulf %473, %472 : vector<8x8xf32>
    %475 = arith.mulf %465, %470 : vector<8x1xf32>
    %476 = vector.extract_strided_slice %19 {offsets = [0, 24], sizes = [8, 8], strides = [1, 1]} : vector<8x32xf32> to vector<8x8xf32>
    %477 = vector.broadcast %475 : vector<8x1xf32> to vector<8x8xf32>
    %478 = arith.mulf %477, %476 : vector<8x8xf32>
    %479 = arith.addf %474, %478 : vector<8x8xf32>
    %480 = arith.mulf %467, %470 : vector<8x1xf32>
    %481 = vector.extract_strided_slice %27 {offsets = [0, 24], sizes = [8, 8], strides = [1, 1]} : vector<8x32xf32> to vector<8x8xf32>
    %482 = vector.broadcast %480 : vector<8x1xf32> to vector<8x8xf32>
    %483 = arith.mulf %482, %481 : vector<8x8xf32>
    %484 = arith.addf %479, %483 : vector<8x8xf32>
    %485 = vector.extract_strided_slice %2 {offsets = [24, 0], sizes = [8, 32], strides = [1, 1]} : vector<32x32xf32> to vector<8x32xf32>
    %cst_66 = arith.constant dense<0.000000e+00> : vector<8x32xf32>
    %486 = tpu.matmul %484, %485, %cst_66 {dimension_numbers = #tpu.dot_dimension_numbers<[1], [0], [0], [1], [0, 0, 1, 1], [], []>} : vector<8x8xf32>, vector<8x32xf32>, vector<8x32xf32> -> vector<8x32xf32>
    %487 = arith.addf %450, %486 : vector<8x32xf32>
    %488 = vector.broadcast %3 : vector<1x32xf32> to vector<8x32xf32>
    %489 = arith.addf %487, %488 : vector<8x32xf32>
    %490 = tpu.concatenate %181, %335, %489 in 0 : vector<8x32xf32>, vector<8x32xf32>, vector<8x32xf32> -> vector<24x32xf32>
    %cst_67 = arith.constant dense<0.000000e+00> : vector<24xf32>
    %491 = vector.multi_reduction <add>, %490, %cst_67 [1] : vector<24x32xf32> to vector<24xf32>
    %492 = vector.shape_cast %491 : vector<24xf32> to vector<24x1xf32>
    %cst_68 = arith.constant 3.200000e+01 : f32
    %493 = vector.broadcast %cst_68 : f32 to vector<24x1xf32>
    %494 = arith.divf %492, %493 : vector<24x1xf32>
    %495 = vector.broadcast %494 : vector<24x1xf32> to vector<24x32xf32>
    %496 = arith.subf %490, %495 : vector<24x32xf32>
    %497 = arith.mulf %496, %496 : vector<24x32xf32>
    %cst_69 = arith.constant dense<0.000000e+00> : vector<24xf32>
    %498 = vector.multi_reduction <add>, %497, %cst_69 [1] : vector<24x32xf32> to vector<24xf32>
    %499 = vector.shape_cast %498 : vector<24xf32> to vector<24x1xf32>
    %cst_70 = arith.constant 3.200000e+01 : f32
    %500 = vector.broadcast %cst_70 : f32 to vector<24x1xf32>
    %501 = arith.divf %499, %500 : vector<24x1xf32>
    %502 = vector.broadcast %494 : vector<24x1xf32> to vector<24x32xf32>
    %503 = arith.subf %490, %502 : vector<24x32xf32>
    %cst_71 = arith.constant 9.99999974E-6 : f32
    %504 = vector.broadcast %cst_71 : f32 to vector<24x1xf32>
    %505 = arith.addf %501, %504 : vector<24x1xf32>
    %506 = math.rsqrt %505 : vector<24x1xf32>
    %507 = vector.broadcast %506 : vector<24x1xf32> to vector<24x32xf32>
    %508 = arith.mulf %503, %507 : vector<24x32xf32>
    %c0_72 = arith.constant 0 : index
    %c0_73 = arith.constant 0 : index
    %509 = vector.load %arg5[%c0_72, %c0_73] : memref<1x32xf32, #tpu.memory_space<vmem>>, vector<1x32xf32>
    %510 = vector.broadcast %509 : vector<1x32xf32> to vector<24x32xf32>
    %511 = arith.mulf %508, %510 : vector<24x32xf32>
    %c0_74 = arith.constant 0 : index
    %c0_75 = arith.constant 0 : index
    %512 = vector.load %arg6[%c0_74, %c0_75] : memref<1x32xf32, #tpu.memory_space<vmem>>, vector<1x32xf32>
    %513 = vector.broadcast %512 : vector<1x32xf32> to vector<24x32xf32>
    %514 = arith.addf %511, %513 : vector<24x32xf32>
    %c0_76 = arith.constant 0 : index
    %c0_77 = arith.constant 0 : index
    %c0_78 = arith.constant 0 : index
    %515 = vector.load %arg7[%c0_76, %c0_77, %c0_78] : memref<2x32x32xf32, #tpu.memory_space<vmem>>, vector<1x32x32xf32>
    %516 = vector.shape_cast %515 : vector<1x32x32xf32> to vector<32x32xf32>
    %cst_79 = arith.constant dense<0.000000e+00> : vector<24x32xf32>
    %517 = tpu.matmul %514, %516, %cst_79 {dimension_numbers = #tpu.dot_dimension_numbers<[1], [0], [0], [1], [0, 0, 1, 1], [], []>} : vector<24x32xf32>, vector<32x32xf32>, vector<24x32xf32> -> vector<24x32xf32>
    %c0_80 = arith.constant 0 : index
    %c0_81 = arith.constant 0 : index
    %c0_82 = arith.constant 0 : index
    %518 = vector.load %arg8[%c0_80, %c0_81, %c0_82] : memref<2x1x32xf32, #tpu.memory_space<vmem>>, vector<1x1x32xf32>
    %519 = vector.shape_cast %518 : vector<1x1x32xf32> to vector<1x32xf32>
    %520 = vector.broadcast %519 : vector<1x32xf32> to vector<24x32xf32>
    %521 = arith.addf %517, %520 : vector<24x32xf32>
    %c1_83 = arith.constant 1 : index
    %c0_84 = arith.constant 0 : index
    %c0_85 = arith.constant 0 : index
    %522 = vector.load %arg7[%c1_83, %c0_84, %c0_85] : memref<2x32x32xf32, #tpu.memory_space<vmem>>, vector<1x32x32xf32>
    %523 = vector.shape_cast %522 : vector<1x32x32xf32> to vector<32x32xf32>
    %cst_86 = arith.constant dense<0.000000e+00> : vector<24x32xf32>
    %524 = tpu.matmul %521, %523, %cst_86 {dimension_numbers = #tpu.dot_dimension_numbers<[1], [0], [0], [1], [0, 0, 1, 1], [], []>} : vector<24x32xf32>, vector<32x32xf32>, vector<24x32xf32> -> vector<24x32xf32>
    %c1_87 = arith.constant 1 : index
    %c0_88 = arith.constant 0 : index
    %c0_89 = arith.constant 0 : index
    %525 = vector.load %arg8[%c1_87, %c0_88, %c0_89] : memref<2x1x32xf32, #tpu.memory_space<vmem>>, vector<1x1x32xf32>
    %526 = vector.shape_cast %525 : vector<1x1x32xf32> to vector<1x32xf32>
    %527 = vector.broadcast %526 : vector<1x32xf32> to vector<24x32xf32>
    %528 = arith.addf %524, %527 : vector<24x32xf32>
    %529 = vector.extract_strided_slice %528 {offsets = [0, 0], sizes = [8, 32], strides = [1, 1]} : vector<24x32xf32> to vector<8x32xf32>
    %530 = vector.extract_strided_slice %528 {offsets = [8, 0], sizes = [8, 32], strides = [1, 1]} : vector<24x32xf32> to vector<8x32xf32>
    %531 = arith.addf %529, %530 : vector<8x32xf32>
    %532 = vector.extract_strided_slice %528 {offsets = [16, 0], sizes = [8, 32], strides = [1, 1]} : vector<24x32xf32> to vector<8x32xf32>
    %533 = arith.addf %531, %532 : vector<8x32xf32>
    %c0_90 = arith.constant 0 : index
    %c0_91 = arith.constant 0 : index
    %534 = vector.load %arg9[%c0_90, %c0_91] : memref<8x32xf32, #tpu.memory_space<vmem>>, vector<8x32xf32>
    tpu.vector_store %arg9[%c0_90, %c0_91], %533 {strides = array<i32>} : memref<8x32xf32, #tpu.memory_space<vmem>>, vector<8x32xf32>,
    return
  }
}

</mosaic_0001>

<bundles_post_ra>
// kernel: cross_modal_embedding.2
= control target key start
LH: loop header
LB: loop body
LE: loop exit
PB: predicated region body
PF: predicated region fallthrough
CT: control target
= control target key end

     0   :  { %s2888_s0 = inlined_call_operand.vmem [shape: s32[3], index: 0, kind: input, shape index: {}]   ;;  %s2889_s1 = inlined_call_operand.vmem [shape: f32[3,8,32], index: 1, kind: input, shape index: {}, may-alias: {1,2}]   ;;  %s2890_s2 = inlined_call_operand.vmem [shape: f32[3,8,32], index: 2, kind: input, shape index: {}, may-alias: {1,2}]   ;;  %s2891_s3 = inlined_call_operand.vmem [shape: f32[3,1,32], index: 3, kind: input, shape index: {}, may-alias: {3,5}]   ;;  %s2892_s4 = inlined_call_operand.vmem [shape: f32[3,1,32], index: 4, kind: input, shape index: {}, may-alias: {4,6}]   ;;  %s2893_s5 = inlined_call_operand.vmem [shape: f32[3,1,32], index: 5, kind: input, shape index: {}, may-alias: {3,5}]   ;;  %s2894_s6 = inlined_call_operand.vmem [shape: f32[3,1,32], index: 6, kind: input, shape index: {}, may-alias: {4,6}]   ;;  %s2895_s7 = inlined_call_operand.hbm [shape: f32[3,32,32], index: 7, kind: input, shape index: {}]   ;;  %s2896_s8 = inlined_call_operand.hbm [shape: f32[3,32,64], index: 8, kind: input, shape index: {}]   ;;  %s2897_s9 = inlined_call_operand.vmem [shape: f32[3,1,32], index: 9, kind: input, shape index: {}]   ;;  %s2898_s10 = inlined_call_operand.vmem [shape: f32[3,1,64], index: 10, kind: input, shape index: {}]   ;;  %s2899_s11 = inlined_call_operand.hbm [shape: f32[3,32,32], index: 11, kind: input, shape index: {}]   ;;  %s2900_s12 = inlined_call_operand.vmem [shape: f32[3,1,32], index: 12, kind: input, shape index: {}]   ;;  %s2901_s13 = inlined_call_operand.vmem [shape: f32[3,8,32], index: 13, kind: output, shape index: {}]  }
   0x1   :  { %2910 = sst [smem:[#allocation14_spill]] %s2896_s8  ;;  %s18_s27 = sshll.u32 %s2888_s0, 4  ;;  %s19_s27 = int_to_ptr.vmem [resolvable:$true] %s18_s27 }
   0x2   :  { %2911 = sst [smem:[#allocation15_spill]] %s2897_s9  ;;  %s2307_s28 = scalar_lea.vmem %s19_s27, 16 }
   0x3   :  { %2912 = sst [smem:[#allocation16_spill]] %s2898_s10  ;;  %p2308_p0 = scmp.ne.s32.totalorder %s19_s27, %s2307_s28 }
   0x4   :  { %2913 = sst [smem:[#allocation17_spill]] %s2900_s12  ;;  %p2312_p1 = scmp.lt.s32.totalorder %s19_s27, %s19_s27 }
   0x5   :  { %2914 = sst [smem:[#allocation18_spill]] %s2901_s13  ;;  %p2313_p2 = scmp.lt.s32.totalorder %s2307_s28, %s2307_s28 }
   0x7   :  { %p2314_p3 = por %p2313_p2, %p2312_p1 }
   0x9   :  { %p2315_p4 = pnand %p2314_p3, %p2308_p0 }
   0xb   :  { %2318 = shalt.err (!%p2315_p4)  }
   0xc   :  { %s2445_s29 = smov [#allocation3]  }
   0xd   :  { %21 = dma.vmem_to_smem %s19_s27, 16, %s2445_s29, [#allocation2] }
   0xe   :  { %2419 = dma.done.wait [#allocation2], 16 }
   0xf   :  { %2420 = vsyncadd [#allocation2], 4294967280 }
  0x10   :  { %23 = sfence }
  0x11   :  { %24 = vsyncpa [#allocation5], 0 }
  0x12   :  { %26 = vsyncpa [#allocation5 + $0x1], 0 }
  0x13   :  { %27 = vsyncpa [#allocation7], 0 }
  0x14   :  { %29 = vsyncpa [#allocation7 + $0x1], 0  ;;  %s2533_s30 = smov 0   ;;  %s2535_s0 = smov 0  }
  0x15   :  { %s2537_s14 = smov 0   ;;  %s2539_s15 = smov 0  }
  0x16 LB: > { %s2552_s16 = sadd.s32 4294967295, %s2443_s15   ;;  %s2555_s17 = sadd.s32 1, %s2443_s15   ;;  %s2443_s15 = sphi %s2539_s15, %s2933_s15   ;;  %s2439_s14 = sphi %s2537_s14, %s2937_s14   ;;  %s2435_s0 = sphi %s2535_s0, %s2936_s0   ;;  %s2431_s30 = sphi %s2533_s30, %s2935_s30  }
  0x17   : > { %2915 = sst [smem:[#allocation12_spill]] %s2555_s17  ;;  %s201_s18 = ssub.s32 %s2443_s15, %s2555_s17 }
  0x18   : > { %s204_s19 = sadd.s32 1, %s2439_s14  ;;  %p202_p5 = scmp.eq.s32.totalorder %s201_s18, 0 }
  0x19   : > { %p211_p6 = scmp.ne.s32.totalorder %s2439_s14, %s2435_s0  ;;  %p212_p7 = scmp.eq.s32.totalorder %s2443_s15, 0 }
  0x1a   : > { %p217_p8 = scmp.ne.s32.totalorder %s2435_s0, %s2431_s30  ;;  %p218_p10 = scmp.eq.s32.totalorder %s2552_s16, 0 }
  0x1b   : > { %s2565_s20 = scalar_select %p202_p5, %s2439_s14, %s204_s19  }
  0x1c   : > { %p213_p9 = por %p212_p7, %p211_p6  ;;  %p2242_p11 = scmp.lt.s32.totalorder %s2443_s15, 3 }
  0x1d   : > { %2916 = sst [smem:[#allocation13_spill]] %s2565_s20  ;;  %p2569_p12 = por %p218_p10, %p217_p8 }
  0x1e   : > { %s2902_s22 = sand.u32 1, %s2439_s14   ;;  %s2579_s24 = sshll.u32 %s2443_s15, 9 }
  0x1f   : > { %s2917_s21 = scalar_select %p2569_p12, 1, 0 }
  0x20   : > { %s2576_s23 = sshll.u32 %s2902_s22, 5  ;;  %p2581_p13 = pnand %p2242_p11, %p213_p9 }
  0x21   : > { %s462_s26 = sand.u32 1, %s2443_s15   ;;  %s2919_s8 = sld [smem:[#allocation14_spill]] }
  0x22   : > { %s466_s30 = scalar_lea.vmem [#allocation6], %s2576_s23  ;;  %s2597_s19 = scalar_lea.sflag [#allocation7], %s462_s26 }
  0x23   : > { %s473_s18 = sshll.u32 %s466_s30, 4  ;;  %p2603_p3 = pneg %p2581_p13  ;;  %s2594_s18 = int_to_ptr.vmem [resolvable:$true] %s473_s18 }
  0x27   : > { %s2590_s29 = scalar_lea.hbm %s2919_s8, %s2579_s24  ;;  %s2324_s30 = scalar_lea.hbm %s2919_s8, 1536 }
  0x28   : > { %s2319_s22 = scalar_lea.hbm %s2590_s29, 512  ;;  %p2325_p6 = scmp.lt.s32.totalorder %s2590_s29, %s2919_s8 }
  0x29   : > { %p2320_p2 = scmp.ne.s32.totalorder %s2590_s29, %s2319_s22  ;;  %p2326_p7 = scmp.lt.s32.totalorder %s2324_s30, %s2319_s22 }
  0x2b   : > { %p2322_p4 = pnand %p2603_p3, %p2320_p2  ;;  %p2327_p8 = por %p2326_p7, %p2325_p6 }
  0x2d   : > { %p2323_p5 = pneg %p2322_p4 }
  0x2f   : > { %p2328_p9 = pnand %p2327_p8, %p2323_p5 }
  0x31   : > { %2331 = shalt.err (!%p2328_p9)
}
  0x32   : > { %s2332_s26 = scalar_lea.vmem %s2594_s18, 512  ;;  %s2446_s12 = smov [#allocation6]  }
  0x33   : > { %p2333_p10 = scmp.ne.s32.totalorder %s2594_s18, %s2332_s26  ;;  %s2337_s27 = sshll.u32 %s2446_s12, 4  ;;  %s2338_s27 = int_to_ptr.vmem [resolvable:$false] %s2337_s27 }
  0x34   : > { %s2339_s28 = scalar_lea.vmem %s2338_s27, 1024  ;;  %p2340_p4 = scmp.lt.s32.totalorder %s2594_s18, %s2338_s27 }
  0x35   : > { %p2335_p11 = pnand %p2333_p10, %p2603_p3  ;;  %p2341_p0 = scmp.lt.s32.totalorder %s2339_s28, %s2332_s26 }
  0x37   : > { %p2336_p2 = pneg %p2335_p11  ;;  %p2342_p1 = por %p2341_p0, %p2340_p4 }
  0x39   : > { %p2343_p12 = pnand %p2342_p1, %p2336_p2 }
  0x3b   : > { %2346 = shalt.err (!%p2343_p12)
}
  0x3c   : > { %s2906_s13 = smov 128   ;;  %s2908_s12 = smov 8  }
  0x3d   : > { %2238 = dma.hbm_to_vmem [thread:$0]  (!%p2581_p13), %s2590_s29, 512, %s2594_s18, %s2597_s19, %s2906_s13, %s2906_s13, %s2908_s12  }
  0x3e   : > { %p2921_p0 = scmp.lt.s32.totalorder %s2443_s15, 4  ;;  %p2922_p12 = scmp.ge.s32.totalorder %s2443_s15, 1 }
  0x3f   : > { %s2641_s26 = scalar_lea.hbm %s2895_s7, %s2579_s24  ;;  %s445_s27 = scalar_lea.vmem [#allocation4], %s2576_s23 }
  0x40   : > { %p2633_p1 = pnand %p2922_p12, %p2921_p0  ;;  %s452_s28 = sshll.u32 %s445_s27, 4  ;;  %s2644_s28 = int_to_ptr.vmem [resolvable:$true] %s452_s28 }
  0x41   : > { %s2650_s15 = scalar_lea.hbm %s2899_s11, %s2579_s24  ;;  %s2924_s18 = sand.u32 1, %s2439_s14  }
  0x42   : > { %s2923_s17 = scalar_select %p2633_p1, 1, 0 }
  0x43   : > { %s442_s13 = scalar_lea.sflag [#allocation5], %s2924_s18  ;;  %s2347_s12 = scalar_lea.hbm %s2641_s26, 512 }
  0x44   : > { %p2348_p5 = scmp.ne.s32.totalorder %s2641_s26, %s2347_s12  ;;  %s2352_s9 = scalar_lea.hbm %s2895_s7, 1536 }
  0x45   : > { %p2353_p8 = scmp.lt.s32.totalorder %s2641_s26, %s2895_s7  ;;  %p2354_p9 = scmp.lt.s32.totalorder %s2352_s9, %s2347_s12 }
  0x46   : > { %p2350_p6 = pnand %p2348_p5, %p2603_p3 }
  0x47   : > { %p2355_p10 = por %p2354_p9, %p2353_p8 }
  0x48   : > { %p2351_p7 = pneg %p2350_p6 }
  0x4a   : > { %p2356_p11 = pnand %p2355_p10, %p2351_p7 }
  0x4c   : > { %2359 = shalt.err (!%p2356_p11)
}
  0x4d   : > { %s2360_s8 = scalar_lea.vmem %s2644_s28, 512  ;;  %s2449_s24 = smov [#allocation4]  }
  0x4e   : > { %p2361_p2 = scmp.ne.s32.totalorder %s2644_s28, %s2360_s8  ;;  %s2365_s29 = sshll.u32 %s2449_s24, 4  ;;  %s2366_s29 = int_to_ptr.vmem [resolvable:$false] %s2365_s29 }
  0x4f   : > { %s2367_s18 = scalar_lea.vmem %s2366_s29, 1024  ;;  %p2368_p12 = scmp.lt.s32.totalorder %s2644_s28, %s2366_s29 }
  0x50   : > { %p2363_p4 = pnand %p2361_p2, %p2603_p3  ;;  %p2369_p5 = scmp.lt.s32.totalorder %s2367_s18, %s2360_s8 }
  0x52   : > { %p2364_p0 = pneg %p2363_p4  ;;  %p2370_p6 = por %p2369_p5, %p2368_p12 }
  0x54   : > { %p2371_p1 = pnand %p2370_p6, %p2364_p0 }
  0x56   : > { %2374 = shalt.err (!%p2371_p1)
}
  0x57   : > { %s2925_s9 = smov 8   ;;  %s2926_s10 = smov 128  }
  0x58   : > { %2235 = dma.hbm_to_vmem [thread:$0]  (!%p2581_p13), %s2641_s26, 512, %s2644_s28, %s442_s13, %s2926_s10, %s2926_s10, %s2925_s9  }
  0x59   : > { %s499_s12 = scalar_lea.vmem [#allocation8], %s2576_s23  ;;  %s2375_s30 = scalar_lea.hbm %s2650_s15, 512 }
  0x5a   : > { %s506_s22 = sshll.u32 %s499_s12, 4  ;;  %p2376_p7 = scmp.ne.s32.totalorder %s2650_s15, %s2375_s30  ;;  %s507_s22 = int_to_ptr.vmem [resolvable:$true] %s506_s22 }
  0x5b   : > { %s2380_s24 = scalar_lea.hbm %s2899_s11, 1536  ;;  %p2381_p9 = scmp.lt.s32.totalorder %s2650_s15, %s2899_s11 }
  0x5c   : > { %p2378_p1 = pnand %p2376_p7, %p2603_p3  ;;  %p2382_p10 = scmp.lt.s32.totalorder %s2380_s24, %s2375_s30 }
  0x5e   : > { %p2379_p8 = pneg %p2378_p1  ;;  %p2383_p11 = por %p2382_p10, %p2381_p9 }
  0x60   : > { %p2384_p2 = pnand %p2383_p11, %p2379_p8 }
  0x62   : > { %2387 = shalt.err (!%p2384_p2)
}
  0x63   : > { %s2388_s23 = scalar_lea.vmem %s507_s22, 512  ;;  %s2450_s13 = smov [#allocation8]  }
  0x64   : > { %p2389_p4 = scmp.ne.s32.totalorder %s507_s22, %s2388_s23  ;;  %s2393_s26 = sshll.u32 %s2450_s13, 4  ;;  %s2394_s26 = int_to_ptr.vmem [resolvable:$false] %s2393_s26 }
  0x65   : > { %s2395_s28 = scalar_lea.vmem %s2394_s26, 1024  ;;  %p2396_p5 = scmp.lt.s32.totalorder %s507_s22, %s2394_s26 }
  0x66   : > { %p2391_p0 = pnand %p2389_p4, %p2603_p3  ;;  %p2397_p6 = scmp.lt.s32.totalorder %s2395_s28, %s2388_s23 }
  0x68   : > { %p2392_p12 = pneg %p2391_p0  ;;  %p2398_p7 = por %p2397_p6, %p2396_p5 }
  0x6a   : > { %p2399_p1 = pnand %p2398_p7, %p2392_p12 }
  0x6c   : > { %2402 = shalt.err (!%p2399_p1)
}
  0x6d   : > { %2241 = dma.hbm_to_vmem [thread:$0]  (!%p2581_p13), %s2650_s15, 512, %s507_s22, %s2597_s19, %s2926_s10, %s2926_s10, %s2925_s9  }
  0x6e   : > { %p2927_p3 = scmp.ne.s32.totalorder %s2923_s17, 0 }
  0x6f   : > { %s526_s20 = sand.u32 (!%p2927_p3), 1, %s2435_s0   ;;  %p2928_p8 = scmp.ne.s32.totalorder (!%p2927_p3), %s2917_s21, 0 }
  0x70   : > { %524 = sbr.rel (%p2927_p3) target bundleno = 2864 (0xb30), region = 68  ;;  %s2701_s12 = sshll.u32 (!%p2927_p3), %s526_s20, 5 }
  0x71   : > { %s527_s30 = scalar_lea.sflag (!%p2927_p3), [#allocation5], %s526_s20  ;;  %s2704_s27 = scalar_lea.vmem (!%p2927_p3), [#allocation4], %s2701_s12 }
  0x75   : > { %2422 = dma.done.wait (%p2928_p8), %s527_s30, 512  }
  0x76   : > { %2424 = vsyncadd (%p2928_p8), %s527_s30, 4294966784  ;;  %s535_s25 = sand.u32 1, %s2552_s16   ;;  %s2712_s17 = scalar_lea.vmem [#allocation6], %s2701_s12 }
  0x77   : > { %s536_s19 = scalar_lea.sflag [#allocation7], %s535_s25 }
  0x78   : > { %2426 = dma.done.wait (%p2928_p8), %s536_s19, 1024  }
  0x79   : > { %2428 = vsyncadd (%p2928_p8), %s536_s19, 4294966272  ;;  %p630_p13 = scmp.lt.s32.totalorder %s2552_s16, 2  ;;  %s634_s15 = sld [smem:[#allocation3 + %s2552_s16]]  ;;  %vm672_vm0 = vcmask 261120   ;;  %v818_v14 = vld [vmem:[%s2712_s17 + $0x18] sm:$0xff]  ;;  %v2451_v16 = vmov 0.0  }
  0x7a   : > { %v734_v15 = vld [vmem:[%s2704_s27 + $0x18] sm:$0xff]  ;;  %2155 = vmatprep.subr.mxu1 %v2451_v16  ;;  %v817_v17 = vld [vmem:[%s2712_s17 + $0x10] sm:$0xff]  ;;  %2144 = vmatprep.subr.mxu0 %v2451_v16  ;;  %v816_v19 = vld [vmem:[%s2712_s17 + $0x8] sm:$0xff]  ;;  %vm2452_vm1 = vmmov 0   ;;  %s646_s13 = sld [smem:[#allocation3 + %s2552_s16]]  ;;  %vm904_vm2 = vcmask 64512  }
  0x7b   : > { %s2721_s9 = scalar_select %p630_p13, %s2552_s16, 2  ;;  %v733_v18 = vld [vmem:[%s2704_s27 + $0x10] sm:$0xff]  ;;  %2156 = vmatpush3.msra.mxu1 %v818_v14  ;;  %2145 = vmatpush3.msra.mxu0 %v734_v15  ;;  %v815_v20 = vld [vmem:[%s2712_s17] sm:$0xff]  ;;  %v732_v21 = vld [vmem:[%s2704_s27 + $0x8] sm:$0xff] }
  0x7c   : > { %2157 = vmatprep.subr.mxu1 %v2451_v16  ;;  %2146 = vmatprep.subr.mxu0 %v2451_v16  ;;  %v731_v22 = vld [vmem:[%s2704_s27] sm:$0xff]  ;;  %s651_s26 = sld [smem:[#allocation3 + %s2552_s16]]  ;;  %s2454_s27 = smov 96  }
  0x7d   : > { %s2077_s10 = sshll.u32 %s2721_s9, 3  ;;  %2158 = vmatpush3.msra.mxu1 %v817_v17  ;;  %2147 = vmatpush3.msra.mxu0 %v733_v18  ;;  %s2929_s18 = sld [smem:[#allocation16_spill]] }
  0x7e   : > { %s633_s24 = scalar_lea.vmem %s2889_s1, %s2077_s10  ;;  %2159 = vmatprep.subr.mxu1 %v2451_v16  ;;  %2163 = vmatprep.mubr.msk.f32.mxu1 %vm2452_vm1, %v2451_v16  ;;  %s2930_s28 = sld [smem:[#allocation15_spill]] }
  0x7f   : > { %p635_p9 = scmp.lt.s32.totalorder %s634_s15, 2  ;;  %v669_v1 = vld [vmem:[%s633_s24] sm:$0xff]  ;;  %2160 = vmatpush3.msra.mxu1 %v816_v19  ;;  %2148 = vmatprep.subr.mxu0 %v2451_v16  ;;  %s645_s24 = scalar_lea.vmem %s2892_s4, %s2721_s9 }
  0x80   : > { %v673_v3 = vsel %vm672_vm0, %v669_v1, 0.0  ;;  %2161 = vmatprep.subr.mxu1 %v2451_v16  ;;  %2152 = vmatprep.mubr.msk.f32.mxu0 %vm2452_vm1, %v2451_v16  ;;  %p647_p10 = scmp.lt.s32.totalorder %s646_s13, 2  ;;  %v2081_v38 = vld [vmem:[%s645_s24] ss:$0 sm:$0xff]  ;;  %s2455_s25 = smov 88  }
  0x81   : > { %s2939_s15 = smov (!%p635_p9, %s634_s15), 2  ;;  %2162 = vmatpush3.msra.mxu1 %v815_v20  ;;  %2149 = vmatpush3.msra.mxu0 %v732_v21  ;;  %s2819_s19 = scalar_lea.vmem [#allocation8], %s2701_s12 }
  0x82   : > { %s2078_s29 = sshll.u32 %s2939_s15, 3  ;;  %2171 = vmatprep.subr.mxu1 %v2451_v16  ;;  %2150 = vmatprep.subr.mxu0 %v2451_v16  ;;  %p652_p11 = scmp.lt.s32.totalorder %s651_s26, 2 }
  0x83   : > { %s638_s23 = scalar_lea.vmem %s2890_s2, %s2078_s29  ;;  %2151 = vmatpush3.msra.mxu0 %v731_v22  ;;  %s2941_s13 = smov (!%p647_p10, %s646_s13), 2 }
  0x84   : > { %v701_v0 = vld [vmem:[%s638_s23] sm:$0xff]  ;;  %2166 = vmatprep.subr.mxu0 %v2451_v16  ;;  %s2943_s26 = smov (!%p652_p11, %s651_s26), 2  ;;  %s649_s30 = scalar_lea.vmem %s2893_s5, %s2941_s13 }
  0x85   : > { %v704_v2 = vsel %vm672_vm0, %v701_v0, 0.0  ;;  %s654_s16 = scalar_lea.vmem %s2894_s6, %s2943_s26  ;;  %v2082_v30 = vld [vmem:[%s649_s30] ss:$0 sm:$0xff]  ;;  %s642_s15 = scalar_lea.vmem %s2891_s3, %s2721_s9 }
  0x86   : > { %705 = vadd.xlane.f32.xlu0 %v704_v2  ;;  %v2083_v32 = vld [vmem:[%s654_s16] ss:$0 sm:$0xff]  ;;  %s661_s23 = scalar_lea.vmem %s2929_s18, %s2721_s9  ;;  %s658_s20 = scalar_lea.vmem %s2930_s28, %s2721_s9 }
  0x87   : > { %v2080_v35 = vld [vmem:[%s642_s15] ss:$0 sm:$0xff]  ;;  %s2453_s30 = smov 120   ;;  %s2456_s16 = smov 112  }
  0x88   : > { %v2086_v41 = vld [vmem:[%s661_s23] ss:$0 sm:$0xff]  ;;  %s2457_s12 = smov 80   ;;  %s2458_s17 = smov 104  }
  0x89   : > { %v2084_v45 = vld [vmem:[%s658_s20] ss:$0 sm:$0xff]  ;;  %s2459_s15 = smov 72   ;;  %s2931_s24 = sld [smem:[#allocation17_spill]] }
  0x8a   : > { %674 = vadd.xlane.f32.xlu0 %v673_v3  ;;  %s2932_s23 = sld [smem:[#allocation18_spill]] }
  0x8f   : > { %s664_s29 = scalar_lea.vmem %s2931_s24, %s2721_s9 }
  0x90   : > { %s668_s13 = scalar_lea.vmem %s2932_s23, %s2077_s10 }
 0x10f   : > { %v706_v4 = vpop.xlane.xlu0 %705 }
 0x110   : > { %v707_v5 = vmul.f32 0.03125, %v706_v4 }
 0x112   : > { %v708_v6 = vsub.f32 %v701_v0, %v707_v5 }
 0x113   : > { %v675_v7 = vpop.xlane.xlu0 %674 }
 0x114   : > { %v677_v8 = vmul.f32 0.03125, %v675_v7  ;;  %v709_v9 = vmul.f32 %v708_v6, %v708_v6 }
 0x116   : > { %v678_v10 = vsub.f32 %v669_v1, %v677_v8  ;;  %v710_v11 = vsel %vm672_vm0, %v709_v9, 0.0  ;;  %v900_v8 = vld [vmem:[%s2819_s19 + $0x8] sm:$0xff] }
 0x117   : > { %711 = vadd.xlane.f32.xlu1 %v710_v11 }
 0x118   : > { %v679_v12 = vmul.f32 %v678_v10, %v678_v10 }
 0x11a   : > { %v680_v13 = vsel %vm672_vm0, %v679_v12, 0.0 }
 0x11b   : > { %681 = vadd.xlane.f32.xlu1 %v680_v13  ;;  %v899_v13 = vld [vmem:[%s2819_s19] sm:$0xff] }
 0x1a0   : > { %v712_v23 = vpop.xlane.xlu1 %711 }
 0x1a1   : > { %v713_v24 = vmul.f32 0.03125, %v712_v23 }
 0x1a3   : > { %v714_v25 = vadd.f32 1e-05, %v713_v24 }
 0x1a4   : > { %v682_v26 = vpop.xlane.xlu1 %681 }
 0x1a5   : > { %2287 = vrsqrt.f32 %v714_v25  ;;  %v683_v27 = vmul.f32 0.03125, %v682_v26 }
 0x1a7   : > { %v684_v28 = vadd.f32 1e-05, %v683_v27 }
 0x1a9   : > { %2289 = vrsqrt.f32 %v684_v28 }
 0x1b2   : > { %v2288_v29 = vpop.eup %2287 }
 0x1b3   : > { %v716_v31 = vmul.f32 %v2288_v29, %v708_v6 }
 0x1b5   : > { %v723_v33 = vmul.f32 %v2082_v30, %v716_v31 }
 0x1b6   : > { %v2290_v34 = vpop.eup %2289 }
 0x1b7   : > { %v730_v36 = vadd.f32 %v2083_v32, %v723_v33  ;;  %v686_v37 = vmul.f32 %v2290_v34, %v678_v10 }
 0x1b9   : > { %2164 = vmatmul.mubr.msk.f32.vlgmr.msra.gmra.mxu1 %vm672_vm0, %v730_v36  ;;  %v693_v39 = vmul.f32 %v2080_v35, %v686_v37 }
 0x1ba   : > { %2173 = vmatprep.mubr.msk.f32.mxu1 %vm2452_vm1, %v2451_v16 }
 0x1bb   : > { %v700_v40 = vadd.f32 %v2081_v38, %v693_v39  ;;  %v901_v39 = vld [vmem:[%s2819_s19 + $0x10] sm:$0xff] }
 0x1bd   : > { %2153 = vmatmul.mubr.msk.f32.vlgmr.msra.gmra.mxu0 %vm672_vm0, %v700_v40 }
 0x1be   : > { %2168 = vmatprep.mubr.msk.f32.mxu0 %vm2452_vm1, %v2451_v16 }
 0x279   : > { %v895_v42 = vpop.f32.mrf.mxu1 }
 0x27a   : > { %v2788_v43 = vadd.f32 %v2086_v41, %v895_v42 }
 0x27b   : > { %v2165_v44 = vpop.f32.mrf.mxu1 }
 0x27c   : > { %1070 = vrot.lane.b32.xlu0 %v2788_v43, %s2453_s30  ;;  %2167 = vmatpush3.xpose.msk.msra.mxu0 %vm904_vm2, %v2788_v43 }
 0x27d   : > { %v811_v46 = vpop.f32.mrf.mxu0  ;;  %2176 = vmatprep.subr.mxu0 %v2451_v16 }
 0x27e   : > { %v812_v47 = vadd.f32 %v2084_v45, %v811_v46 }
 0x27f   : > { %v2154_v48 = vpop.f32.mrf.mxu0 }
 0x280   : > { %v2794_v49 = vmul.f32 0.35355338, %v812_v47 }
 0x282   : > { %1068 = vrot.lane.b32.xlu1 %v2794_v49, %s2453_s30  ;;  %2169 = vmatmul.mubr.msk.f32.vlgmr.msra.gmra.mxu0 %vm904_vm2, %v2794_v49 }
 0x283   : > { %2178 = vmatprep.mubr.msk.f32.mxu0 %vm2452_vm1, %v2451_v16 }
 0x2ee   : > { %v1071_v50 = vpop.permute.xlu0 %1070 }
 0x2ef   : > { %2177 = vmatpush3.xpose.msk.msra.mxu0 %vm904_vm2, %v1071_v50 }
 0x2f0   : > { %2186 = vmatprep.subr.mxu0 %v2451_v16 }
 0x2f4   : > { %v1069_v51 = vpop.permute.xlu1 %1068 }
 0x2f5   : > { %2179 = vmatmul.mubr.msk.f32.vlgmr.msra.gmra.mxu0 %vm904_vm2, %v1069_v51  ;;  %v902_v51 = vld [vmem:[%s2819_s19 + $0x18] sm:$0xff] }
 0x2f6   : > { %2188 = vmatprep.mubr.msk.f32.mxu0 %vm2452_vm1, %v2451_v16  ;;  %2187 = vmatpush3.msra.mxu0 %v900_v8 }
 0x2f7   : > { %2196 = vmatprep.subr.mxu0 %v2451_v16 }
 0x342   : > { %v977_v52 = vpop.f32.mrf.mxu0 }
 0x343   : > { %v981_v53 = vsel %vm904_vm2, %v977_v52, -inf }
 0x344   : > { %982 = vmax.xlane.f32.xlu1 %v981_v53  ;;  %v2170_v54 = vpop.f32.mrf.mxu0 }
 0x3b5   : > { %v1142_v55 = vpop.f32.mrf.mxu0 }
 0x3b6   : > { %v1146_v56 = vsel %vm904_vm2, %v1142_v55, -inf }
 0x3b7   : > { %1147 = vmax.xlane.f32.xlu0 %v1146_v56  ;;  %v2180_v57 = vpop.f32.mrf.mxu0 }
 0x3cd   : > { %v983_v58 = vpop.xlane.xlu1 %982 }
 0x3ce   : > { %v984_v59 = vsub.f32 %v977_v52, %v983_v58 }
 0x3d0   : > { %v985_v60 = vmul.f32 1.442695, %v984_v59 }
 0x3d2   : > { %2291 = vpow2.f32 %v985_v60 }
 0x3df   : > { %v2292_v61 = vpop.eup %2291 }
 0x3e0   : > { %v987_v62 = vsel %vm904_vm2, %v2292_v61, 0.0 }
 0x3e1   : > { %988 = vadd.xlane.f32.xlu0 %v987_v62 }
 0x3f7   : > { %992 = vrot.lane.b32.xlu0 %v2788_v43, %s2454_s27 }
 0x440   : > { %v1148_v63 = vpop.xlane.xlu0 %1147 }
 0x441   : > { %v1149_v0 = vsub.f32 %v1142_v55, %v1148_v63 }
 0x443   : > { %v1150_v1 = vmul.f32 1.442695, %v1149_v0 }
 0x445   : > { %2293 = vpow2.f32 %v1150_v1 }
 0x452   : > { %v2294_v2 = vpop.eup %2293 }
 0x453   : > { %v1152_v3 = vsel %vm904_vm2, %v2294_v2, 0.0 }
 0x454   : > { %1153 = vadd.xlane.f32.xlu1 %v1152_v3 }
 0x465   : > { %1157 = vrot.lane.b32.xlu1 %v2788_v43, %s2455_s25 }
 0x469   : > { %1381 = vrot.lane.b32.xlu1 %v2788_v43, %s2456_s16 }
 0x46a   : > { %v989_v4 = vpop.xlane.xlu0 %988 }
 0x46b   : > { %2295 = vrcp.f32 %v989_v4 }
 0x46d   : > { %1379 = vrot.lane.b32.xlu1 %v2794_v49, %s2456_s16 }
 0x46e   : > { %v993_v5 = vpop.permute.xlu0 %992 }
 0x46f   : > { %2172 = vmatpush3.msra.mxu1 %v993_v5 }
 0x470   : > { %2181 = vmatprep.subr.mxu1 %v2451_v16 }
 0x478   : > { %v2296_v6 = vpop.eup %2295 }
 0x479   : > { %v991_v7 = vmul.f32 %v2296_v6, %v2292_v61  ;;  %v2104_v61 = vld [vmem:[%s664_s29] ss:$0 sm:$0xff] }
 0x47b   : > { %2174 = vmatmul.mubr.msk.f32.vlgmr.msra.gmra.mxu1 %vm904_vm2, %v991_v7 }
 0x47c   : > { %2183 = vmatprep.mubr.msk.f32.mxu1 %vm2452_vm1, %v2451_v16 }
 0x4dd   : > { %v1154_v9 = vpop.xlane.xlu1 %1153 }
 0x4de   : > { %2297 = vrcp.f32 %v1154_v9 }
 0x4e1   : > { %v1158_v10 = vpop.permute.xlu1 %1157 }
 0x4e2   : > { %2182 = vmatpush3.msra.mxu1 %v1158_v10 }
 0x4e3   : > { %2191 = vmatprep.subr.mxu1 %v2451_v16 }
 0x4e5   : > { %v1382_v17 = vpop.permute.xlu1 %1381 }
 0x4e9   : > { %v1380_v20 = vpop.permute.xlu1 %1379 }
 0x4eb   : > { %v2298_v11 = vpop.eup %2297 }
 0x4ec   : > { %v1156_v12 = vmul.f32 %v2298_v11, %v2294_v2 }
 0x4ee   : > { %2184 = vmatmul.mubr.msk.f32.vlgmr.msra.gmra.mxu1 %vm904_vm2, %v1156_v12 }
 0x4ef   : > { %2192 = vmatpush3.msra.mxu1 %v899_v13  ;;  %2193 = vmatprep.mubr.msk.f32.mxu1 %vm2452_vm1, %v2451_v16 }
 0x4f0   : > { %2201 = vmatprep.subr.mxu1 %v2451_v16 }
 0x53b   : > { %v1064_v14 = vpop.f32.mrf.mxu1 }
 0x53c   : > { %2194 = vmatmul.mubr.msk.f32.vlgmr.msra.gmra.mxu1 %vm904_vm2, %v1064_v14 }
 0x53d   : > { %v2175_v15 = vpop.f32.mrf.mxu1  ;;  %2203 = vmatprep.mubr.msk.f32.mxu1 %vm2452_vm1, %v2451_v16 }
 0x5ae   : > { %v1229_v18 = vpop.f32.mrf.mxu1 }
 0x5af   : > { %2189 = vmatmul.mubr.msk.f32.vlgmr.msra.gmra.mxu0 %vm904_vm2, %v1229_v18 }
 0x5b0   : > { %2197 = vmatpush3.xpose.msk.msra.mxu0 %vm904_vm2, %v1382_v17  ;;  %v2185_v19 = vpop.f32.mrf.mxu1  ;;  %2198 = vmatprep.mubr.msk.f32.mxu0 %vm2452_vm1, %v2451_v16 }
 0x5b1   : > { %2206 = vmatprep.subr.mxu0 %v2451_v16 }
 0x5b3   : > { %2199 = vmatmul.mubr.msk.f32.vlgmr.msra.gmra.mxu0 %vm904_vm2, %v1380_v20 }
 0x5b4   : > { %2208 = vmatprep.mubr.msk.f32.mxu0 %vm2452_vm1, %v2451_v16  ;;  %2207 = vmatpush3.msra.mxu0 %v901_v39 }
 0x5b5   : > { %2216 = vmatprep.subr.mxu0 %v2451_v16 }
 0x5fc   : > { %v1375_v21 = vpop.f32.mrf.mxu1 }
 0x5fe   : > { %v2195_v22 = vpop.f32.mrf.mxu1 }
 0x66f   : > { %v1302_v23 = vpop.f32.mrf.mxu0 }
 0x671   : > { %v2190_v24 = vpop.f32.mrf.mxu0 }
 0x673   : > { %v1453_v25 = vpop.f32.mrf.mxu0 }
 0x674   : > { %v1457_v26 = vsel %vm904_vm2, %v1453_v25, -inf }
 0x675   : > { %1458 = vmax.xlane.f32.xlu0 %v1457_v26  ;;  %v2200_v27 = vpop.f32.mrf.mxu0 }
 0x68b   : > { %1468 = vrot.lane.b32.xlu0 %v2788_v43, %s2457_s12 }
 0x68f   : > { %1618 = vrot.lane.b32.xlu0 %v2794_v49, %s2458_s17 }
 0x6fe   : > { %v1459_v28 = vpop.xlane.xlu0 %1458 }
 0x6ff   : > { %v1460_v29 = vsub.f32 %v1453_v25, %v1459_v28 }
 0x701   : > { %v1461_v30 = vmul.f32 1.442695, %v1460_v29 }
 0x702   : > { %v1469_v31 = vpop.permute.xlu0 %1468 }
 0x703   : > { %2299 = vpow2.f32 %v1461_v30  ;;  %2202 = vmatpush3.msra.mxu1 %v1469_v31 }
 0x704   : > { %2211 = vmatprep.subr.mxu1 %v2451_v16 }
 0x706   : > { %v1619_v38 = vpop.permute.xlu0 %1618 }
 0x710   : > { %v2300_v32 = vpop.eup %2299 }
 0x711   : > { %v1463_v33 = vsel %vm904_vm2, %v2300_v32, 0.0 }
 0x712   : > { %1464 = vadd.xlane.f32.xlu1 %v1463_v33 }
 0x723   : > { %1620 = vrot.lane.b32.xlu1 %v2788_v43, %s2458_s17 }
 0x79b   : > { %v1465_v34 = vpop.xlane.xlu1 %1464 }
 0x79c   : > { %2301 = vrcp.f32 %v1465_v34 }
 0x79f   : > { %v1621_v37 = vpop.permute.xlu1 %1620 }
 0x7a9   : > { %v2302_v35 = vpop.eup %2301 }
 0x7aa   : > { %v1467_v36 = vmul.f32 %v2302_v35, %v2300_v32 }
 0x7ac   : > { %2204 = vmatmul.mubr.msk.f32.vlgmr.msra.gmra.mxu1 %vm904_vm2, %v1467_v36 }
 0x7ad   : > { %2212 = vmatpush3.xpose.msk.msra.mxu1 %vm904_vm2, %v1621_v37  ;;  %2213 = vmatprep.mubr.msk.f32.mxu1 %vm2452_vm1, %v2451_v16 }
 0x7ae   : > { %2221 = vmatprep.subr.mxu1 %v2451_v16 }
 0x7b0   : > { %2214 = vmatmul.mubr.msk.f32.vlgmr.msra.gmra.mxu1 %vm904_vm2, %v1619_v38 }
 0x7b1   : > { %2223 = vmatprep.mubr.msk.f32.mxu1 %vm2452_vm1, %v2451_v16  ;;  %2222 = vmatpush3.msra.mxu1 %v902_v51 }
 0x86c   : > { %v1540_v40 = vpop.f32.mrf.mxu1 }
 0x86d   : > { %2209 = vmatmul.mubr.msk.f32.vlgmr.msra.gmra.mxu0 %vm904_vm2, %v1540_v40 }
 0x86e   : > { %v2205_v41 = vpop.f32.mrf.mxu1  ;;  %2218 = vmatprep.mubr.msk.f32.mxu0 %vm2452_vm1, %v2451_v16  ;;  %v1376_v16 = vadd.f32 %v1375_v21, %v1302_v23 }
 0x870   : > { %v1692_v42 = vpop.f32.mrf.mxu1 }
 0x871   : > { %v1696_v44 = vsel %vm904_vm2, %v1692_v42, -inf }
 0x872   : > { %1697 = vmax.xlane.f32.xlu1 %v1696_v44  ;;  %v2215_v45 = vpop.f32.mrf.mxu1 }
 0x8fb   : > { %v1698_v46 = vpop.xlane.xlu1 %1697 }
 0x8fc   : > { %v1699_v47 = vsub.f32 %v1692_v42, %v1698_v46 }
 0x8fe   : > { %v1700_v48 = vmul.f32 1.442695, %v1699_v47 }
 0x900   : > { %2303 = vpow2.f32 %v1700_v48 }
 0x90d   : > { %v2304_v49 = vpop.eup %2303 }
 0x90e   : > { %v1702_v50 = vsel %vm904_vm2, %v2304_v49, 0.0 }
 0x90f   : > { %1703 = vadd.xlane.f32.xlu0 %v1702_v50 }
 0x925   : > { %1707 = vrot.lane.b32.xlu0 %v2788_v43, %s2459_s15 }
 0x92d   : > { %v1613_v52 = vpop.f32.mrf.mxu0 }
 0x92e   : > { %v1617_v53 = vadd.f32 %v1613_v52, %v1376_v16 }
 0x92f   : > { %v2210_v54 = vpop.f32.mrf.mxu0 }
 0x998   : > { %v1704_v55 = vpop.xlane.xlu0 %1703 }
 0x999   : > { %2305 = vrcp.f32 %v1704_v55 }
 0x99c   : > { %v1708_v56 = vpop.permute.xlu0 %1707 }
 0x99d   : > { %2217 = vmatpush3.msra.mxu0 %v1708_v56 }
 0x9a6   : > { %v2306_v57 = vpop.eup %2305 }
 0x9a7   : > { %v1706_v58 = vmul.f32 %v2306_v57, %v2304_v49 }
 0x9a9   : > { %2219 = vmatmul.mubr.msk.f32.vlgmr.msra.gmra.mxu0 %vm904_vm2, %v1706_v58 }
 0xa69   : > { %v1779_v59 = vpop.f32.mrf.mxu0 }
 0xa6a   : > { %2224 = vmatmul.mubr.msk.f32.vlgmr.msra.gmra.mxu1 %vm904_vm2, %v1779_v59 }
 0xa6b   : > { %v2220_v43 = vpop.f32.mrf.mxu0 }
 0xb2a   : > { %v1852_v60 = vpop.f32.mrf.mxu1 }
 0xb2b   : > { %v1856_v62 = vadd.f32 %v1852_v60, %v1617_v53 }
 0xb2c   : > { %v2225_v63 = vpop.f32.mrf.mxu1 }
 0xb2d   : > { %v1864_v0 = vadd.f32 %v2104_v61, %v1856_v62 }
 0xb2f   : > { %1865 = vst.msk [vmem:[%s668_s13] sm:$0xff] %vm672_vm0, %v1864_v0 }
 0xb30 PF: > { %s2933_s15 = sld [smem:[#allocation12_spill]]  ;;  %s2935_s30 = smov %s2435_s0 }
 0xb31   : > { %s2934_s26 = sld [smem:[#allocation13_spill]]  ;;  %s2936_s0 = smov %s2439_s14 }
 0xb36   : > { %p32_p2 = scmp.ge.s32.totalorder %s2933_s15, 5  }
 0xb37   : > { %s2937_s14 = smov %s2934_s26 }
 0xb38   :  { %34 = sbr.rel (!%p32_p2) target bundleno = 22 (0x16), region = 159 }
 0xb3d   :  { %1885 = vsyncpa [#allocation5], 1 }
 0xb3e   :  { %1887 = vsyncpa [#allocation5 + $0x1], 1 }
 0xb3f   :  { %1888 = vsyncpa [#allocation7], 1 }
 0xb40   :  { %1890 = vsyncpa [#allocation7 + $0x1], 1 }

// kernel: cross_modal_embedding.3
= control target key start
LH: loop header
LB: loop body
LE: loop exit
PB: predicated region body
PF: predicated region fallthrough
CT: control target
= control target key end

     0   :  { %v2304_v1 = vmov 0.0   ;;  %s2885_s0 = inlined_call_operand.vmem [shape: f32[3,8,32], index: 0, kind: input, shape index: {}]   ;;  %s2886_s1 = inlined_call_operand.vmem [shape: f32[32,96], index: 1, kind: input, shape index: {}]   ;;  %s2887_s2 = inlined_call_operand.vmem [shape: f32[1,96], index: 2, kind: input, shape index: {}]   ;;  %s2888_s3 = inlined_call_operand.vmem [shape: f32[32,32], index: 3, kind: input, shape index: {}]   ;;  %s2889_s4 = inlined_call_operand.vmem [shape: f32[1,32], index: 4, kind: input, shape index: {}]   ;;  %s2890_s5 = inlined_call_operand.vmem [shape: f32[1,32], index: 5, kind: input, shape index: {}]   ;;  %s2891_s6 = inlined_call_operand.vmem [shape: f32[1,32], index: 6, kind: input, shape index: {}]   ;;  %s2892_s7 = inlined_call_operand.vmem [shape: f32[2,32,32], index: 7, kind: input, shape index: {}]   ;;  %s2893_s8 = inlined_call_operand.vmem [shape: f32[2,1,32], index: 8, kind: input, shape index: {}]   ;;  %s2894_s9 = inlined_call_operand.hbm [shape: f32[8,32], index: 9, kind: output, shape index: {}]  }
   0x1   :  { %v36_v0 = vld [vmem:[%s2886_s1 + $0x18] sm:$0xff]  ;;  %2042 = vmatprep.subr.mxu0 %v2304_v1  ;;  %2053 = vmatprep.subr.mxu1 %v2304_v1  ;;  %v35_v2 = vld [vmem:[%s2886_s1 + $0x10] sm:$0xff] }
   0x2   :  { %2043 = vmatpush3.msra.mxu0 %v36_v0  ;;  %2054 = vmatpush3.msra.mxu1 %v36_v0 }
   0x3   :  { %14 = vsyncpa [#allocation3], 0  ;;  %2044 = vmatprep.subr.mxu0 %v2304_v1  ;;  %2055 = vmatprep.subr.mxu1 %v2304_v1  ;;  %v34_v3 = vld [vmem:[%s2886_s1 + $0x8] sm:$0xff]  ;;  %v33_v4 = vld [vmem:[%s2886_s1] sm:$0xff]  ;;  %vm2305_vm0 = vmmov 0   ;;  %vm50_vm1 = vcmask 261120  }
   0x4   :  { %2045 = vmatpush3.msra.mxu0 %v35_v2  ;;  %2056 = vmatpush3.msra.mxu1 %v35_v2  ;;  %v43_v5 = vld [vmem:[%s2885_s0] sm:$0xff]  ;;  %v1957_v6 = vld [vmem:[%s2885_s0 + $0x8] sm:$0xff]  ;;  %v1959_v7 = vld [vmem:[%s2885_s0 + $0x10] sm:$0xff]  ;;  %s2306_s0 = smov 96   ;;  %s2308_s24 = smov 112   ;;  %vm290_vm2 = vcmask 64512  }
   0x5   :  { %2046 = vmatprep.subr.mxu0 %v2304_v1  ;;  %2057 = vmatprep.subr.mxu1 %v2304_v1  ;;  %v1955_v8 = vld [vmem:[%s2887_s2] ss:$0 sm:$0xff]  ;;  %s2307_s2 = smov 120   ;;  %s2309_s25 = smov 104  }
   0x6   :  { %2047 = vmatpush3.msra.mxu0 %v34_v3  ;;  %2050 = vmatprep.mubr.msk.f32.mxu0 %vm2305_vm0, %v2304_v1  ;;  %s2310_s28 = smov 64   ;;  %s2311_s10 = smov 56  }
   0x7   :  { %2048 = vmatprep.subr.mxu0 %v2304_v1  ;;  %2058 = vmatpush3.msra.mxu1 %v34_v3  ;;  %s2312_s11 = smov 48   ;;  %s2313_s12 = smov 40  }
   0x8   :  { %2049 = vmatpush3.msra.mxu0 %v33_v4  ;;  %2059 = vmatprep.subr.mxu1 %v2304_v1  ;;  %s2314_s14 = smov [#allocation2]  }
   0x9   :  { %2051 = vmatmul.mubr.msk.f32.vlgmr.msra.gmra.mxu0 %vm50_vm1, %v43_v5  ;;  %2064 = vmatprep.subr.mxu0 %v2304_v1  ;;  %s1947_s15 = sshll.u32 %s2314_s14, 4  ;;  %s1948_s15 = int_to_ptr.vmem [resolvable:$true] %s1947_s15 }
   0xa   :  { %2060 = vmatpush3.msra.mxu1 %v33_v4  ;;  %2061 = vmatprep.mubr.msk.f32.mxu1 %vm2305_vm0, %v2304_v1  ;;  %s2282_s16 = scalar_lea.vmem %s1948_s15, 128  ;;  %p2287_p1 = scmp.lt.s32.totalorder %s1948_s15, %s1948_s15 }
   0xb   :  { %2065 = vmatpush3.msra.mxu0 %v36_v0  ;;  %2062 = vmatmul.mubr.msk.f32.vlgmr.msra.gmra.mxu1 %vm50_vm1, %v1957_v6  ;;  %p2283_p0 = scmp.ne.s32.totalorder %s1948_s15, %s2282_s16  ;;  %p2288_p2 = scmp.lt.s32.totalorder %s2282_s16, %s2282_s16 }
   0xc   :  { %2066 = vmatprep.subr.mxu0 %v2304_v1  ;;  %2072 = vmatprep.mubr.msk.f32.mxu0 %vm2305_vm0, %v2304_v1 }
   0xd   :  { %2067 = vmatpush3.msra.mxu0 %v35_v2  ;;  %2075 = vmatprep.subr.mxu1 %v2304_v1  ;;  %p2289_p3 = por %p2288_p2, %p2287_p1 }
   0xe   :  { %2068 = vmatprep.subr.mxu0 %v2304_v1  ;;  %2077 = vmatprep.mubr.msk.f32.mxu1 %vm2305_vm0, %v2304_v1 }
   0xf   :  { %2069 = vmatpush3.msra.mxu0 %v34_v3  ;;  %p2290_p4 = pnand %p2289_p3, %p2283_p0 }
  0x10   :  { %2070 = vmatprep.subr.mxu0 %v2304_v1 }
  0x11   :  { %2071 = vmatpush3.msra.mxu0 %v33_v4 }
  0x12   :  { %2073 = vmatmul.mubr.msk.f32.vlgmr.msra.gmra.mxu0 %vm50_vm1, %v1959_v7  ;;  %2085 = vmatprep.subr.mxu0 %v2304_v1 }
  0x13   :  { %2087 = vmatprep.mubr.msk.f32.mxu0 %vm2305_vm0, %v2304_v1 }
  0xc9   :  { %v120_v9 = vpop.f32.mrf.mxu0 }
  0xca   :  { %v2416_v10 = vadd.f32 %v1955_v8, %v120_v9 }
  0xcb   :  { %v2052_v11 = vpop.f32.mrf.mxu0  ;;  %v195_v12 = vpop.f32.mrf.mxu1 }
  0xcc   :  { %v2418_v13 = vadd.f32 %v1955_v8, %v195_v12  ;;  %276 = vrot.lane.b32.xlu0 %v2416_v10, %s2306_s0  ;;  %v274_v18 = vmul.f32 0.35355338, %v2416_v10 }
  0xcd   :  { %v2063_v14 = vpop.f32.mrf.mxu1 }
  0xce   :  { %v754_v23 = vmul.f32 0.35355338, %v2418_v13 }
  0xd0   :  { %281 = vrot.lane.b32.xlu0 %v2418_v13, %s2306_s0 }
  0xd2   :  { %v270_v15 = vpop.f32.mrf.mxu0 }
  0xd3   :  { %v2422_v16 = vadd.f32 %v1955_v8, %v270_v15 }
  0xd4   :  { %v2074_v17 = vpop.f32.mrf.mxu0 }
  0xd5   :  { %286 = vrot.lane.b32.xlu1 %v2422_v16, %s2306_s0  ;;  %v1215_v26 = vmul.f32 0.35355338, %v2422_v16 }
 0x13e   :  { %v277_v19 = vpop.permute.xlu0 %276 }
 0x13f   :  { %v279_v20 = vmul.f32 %v277_v19, %v274_v18  ;;  %v755_v25 = vmul.f32 %v754_v23, %v277_v19  ;;  %v1216_v27 = vmul.f32 %v1215_v26, %v277_v19 }
 0x141   :  { %323 = vrot.lane.b32.xlu1 %v279_v20, %s2307_s2  ;;  %v291_v29 = vsel %vm290_vm2, %v279_v20, 0.0  ;;  %v758_v32 = vsel %vm290_vm2, %v755_v25, 0.0  ;;  %v1219_v34 = vsel %vm290_vm2, %v1216_v27, 0.0 }
 0x142   :  { %v282_v21 = vpop.permute.xlu0 %281 }
 0x143   :  { %v284_v22 = vmul.f32 %v282_v21, %v274_v18  ;;  %v756_v24 = vmul.f32 %v754_v23, %v282_v21  ;;  %v1217_v28 = vmul.f32 %v1215_v26, %v282_v21 }
 0x145   :  { %330 = vrot.lane.b32.xlu0 %v284_v22, %s2307_s2  ;;  %521 = vrot.lane.b32.xlu1 %v284_v22, %s2308_s24  ;;  %v294_v30 = vsel %vm290_vm2, %v284_v22, 0.0  ;;  %v761_v31 = vsel %vm290_vm2, %v756_v24, 0.0  ;;  %v1222_v33 = vsel %vm290_vm2, %v1217_v28, 0.0 }
 0x147   :  { %v287_v35 = vpop.permute.xlu1 %286 }
 0x148   :  { %v289_v36 = vmul.f32 %v287_v35, %v274_v18  ;;  %v757_v37 = vmul.f32 %v754_v23, %v287_v35  ;;  %v2457_v38 = vmul.f32 %v1215_v26, %v287_v35 }
 0x149   :  { %515 = vrot.lane.b32.xlu0 %v279_v20, %s2308_s24  ;;  %631 = vrot.lane.b32.xlu1 %v279_v20, %s2309_s25 }
 0x14a   :  { %v297_v44 = vsel %vm290_vm2, %v289_v36, 0.0  ;;  %v764_v46 = vsel %vm290_vm2, %v757_v37, 0.0 }
 0x14d   :  { %637 = vrot.lane.b32.xlu0 %v284_v22, %s2309_s25  ;;  %797 = vrot.lane.b32.xlu1 %v756_v24, %s2307_s2 }
 0x151   :  { %790 = vrot.lane.b32.xlu0 %v755_v25, %s2307_s2  ;;  %982 = vrot.lane.b32.xlu1 %v755_v25, %s2308_s24 }
 0x155   :  { %988 = vrot.lane.b32.xlu0 %v756_v24, %s2308_s24  ;;  %1104 = vrot.lane.b32.xlu1 %v756_v24, %s2309_s25 }
 0x159   :  { %1098 = vrot.lane.b32.xlu0 %v755_v25, %s2309_s25  ;;  %1251 = vrot.lane.b32.xlu1 %v1216_v27, %s2307_s2 }
 0x15d   :  { %1258 = vrot.lane.b32.xlu0 %v1217_v28, %s2307_s2  ;;  %1449 = vrot.lane.b32.xlu1 %v1217_v28, %s2308_s24 }
 0x161   :  { %1443 = vrot.lane.b32.xlu0 %v1216_v27, %s2308_s24  ;;  %1559 = vrot.lane.b32.xlu1 %v1216_v27, %s2309_s25  ;;  %v1225_v27 = vsel %vm290_vm2, %v2457_v38, 0.0 }
 0x165   :  { %1565 = vrot.lane.b32.xlu0 %v1217_v28, %s2309_s25 }
 0x184   :  { %292 = vadd.xlane.f32.xlu0 %v291_v29 }
 0x185   :  { %295 = vadd.xlane.f32.xlu1 %v294_v30 }
 0x188   :  { %762 = vadd.xlane.f32.xlu0 %v761_v31 }
 0x189   :  { %759 = vadd.xlane.f32.xlu1 %v758_v32 }
 0x18c   :  { %1223 = vadd.xlane.f32.xlu0 %v1222_v33 }
 0x18d   :  { %1220 = vadd.xlane.f32.xlu1 %v1219_v34 }
 0x19e   :  { %337 = vrot.lane.b32.xlu1 %v289_v36, %s2307_s2 }
 0x1a2   :  { %527 = vrot.lane.b32.xlu0 %v289_v36, %s2308_s24  ;;  %643 = vrot.lane.b32.xlu1 %v289_v36, %s2309_s25 }
 0x1a6   :  { %804 = vrot.lane.b32.xlu0 %v757_v37, %s2307_s2  ;;  %994 = vrot.lane.b32.xlu1 %v757_v37, %s2308_s24 }
 0x1aa   :  { %1110 = vrot.lane.b32.xlu0 %v757_v37, %s2309_s25  ;;  %1265 = vrot.lane.b32.xlu1 %v2457_v38, %s2307_s2 }
 0x1ae   :  { %1455 = vrot.lane.b32.xlu0 %v2457_v38, %s2308_s24  ;;  %1571 = vrot.lane.b32.xlu1 %v2457_v38, %s2309_s25 }
 0x1b3   :  { %v324_v40 = vpop.permute.xlu1 %323 }
 0x1b4   :  { %v326_v50 = vsel %vm290_vm2, %v324_v40, 0.0 }
 0x1b7   :  { %v331_v39 = vpop.permute.xlu0 %330  ;;  %v522_v42 = vpop.permute.xlu1 %521 }
 0x1b8   :  { %v333_v47 = vsel %vm290_vm2, %v331_v39, 0.0  ;;  %v524_v53 = vsel %vm290_vm2, %v522_v42, 0.0 }
 0x1bb   :  { %v516_v41 = vpop.permute.xlu0 %515  ;;  %v632_v45 = vpop.permute.xlu1 %631 }
 0x1bc   :  { %v518_v51 = vsel %vm290_vm2, %v516_v41, 0.0  ;;  %v634_v56 = vsel %vm290_vm2, %v632_v45, 0.0 }
 0x1bf   :  { %v638_v43 = vpop.permute.xlu0 %637  ;;  %v798_v49 = vpop.permute.xlu1 %797 }
 0x1c0   :  { %v640_v54 = vsel %vm290_vm2, %v638_v43, 0.0  ;;  %v800_v60 = vsel %vm290_vm2, %v798_v49, 0.0 }
 0x1c3   :  { %v791_v48 = vpop.permute.xlu0 %790  ;;  %v983_v55 = vpop.permute.xlu1 %982 }
 0x1c4   :  { %v793_v57 = vsel %vm290_vm2, %v791_v48, 0.0  ;;  %v985_v61 = vsel %vm290_vm2, %v983_v55, 0.0 }
 0x1c7   :  { %v989_v52 = vpop.permute.xlu0 %988  ;;  %v1105_v59 = vpop.permute.xlu1 %1104 }
 0x1c8   :  { %v991_v63 = vsel %vm290_vm2, %v989_v52, 0.0  ;;  %v1107_v0 = vsel %vm290_vm2, %v1105_v59, 0.0 }
 0x1cb   :  { %v1099_v58 = vpop.permute.xlu0 %1098  ;;  %v1252_v2 = vpop.permute.xlu1 %1251 }
 0x1cc   :  { %v1101_v3 = vsel %vm290_vm2, %v1099_v58, 0.0  ;;  %v1254_v4 = vsel %vm290_vm2, %v1252_v2, 0.0  ;;  %v2510_v58 = vld [vmem:[%s2888_s3 + $0x8] sm:$0xff] }
 0x1cd   :  { %298 = vadd.xlane.f32.xlu0 %v297_v44  ;;  %2076 = vmatpush3.msra.mxu1 %v2510_v58 }
 0x1ce   :  { %2080 = vmatprep.subr.mxu1 %v2304_v1 }
 0x1cf   :  { %v1259_v62 = vpop.permute.xlu0 %1258  ;;  %v1450_v8 = vpop.permute.xlu1 %1449 }
 0x1d0   :  { %v1261_v6 = vsel %vm290_vm2, %v1259_v62, 0.0  ;;  %v1452_v33 = vsel %vm290_vm2, %v1450_v8, 0.0 }
 0x1d1   :  { %765 = vadd.xlane.f32.xlu0 %v764_v46 }
 0x1d2   :  { %334 = vadd.xlane.f32.xlu1 %v333_v47 }
 0x1d3   :  { %v1444_v5 = vpop.permute.xlu0 %1443  ;;  %v1560_v11 = vpop.permute.xlu1 %1559 }
 0x1d4   :  { %v1446_v7 = vsel %vm290_vm2, %v1444_v5, 0.0  ;;  %v1562_v38 = vsel %vm290_vm2, %v1560_v11, 0.0 }
 0x1d5   :  { %327 = vadd.xlane.f32.xlu0 %v326_v50 }
 0x1d6   :  { %519 = vadd.xlane.f32.xlu1 %v518_v51 }
 0x1d7   :  { %v1566_v9 = vpop.permute.xlu0 %1565 }
 0x1d8   :  { %v1568_v39 = vsel %vm290_vm2, %v1566_v9, 0.0 }
 0x1d9   :  { %525 = vadd.xlane.f32.xlu0 %v524_v53 }
 0x1da   :  { %641 = vadd.xlane.f32.xlu1 %v640_v54 }
 0x1dd   :  { %635 = vadd.xlane.f32.xlu0 %v634_v56 }
 0x1de   :  { %794 = vadd.xlane.f32.xlu1 %v793_v57 }
 0x1e1   :  { %801 = vadd.xlane.f32.xlu0 %v800_v60 }
 0x1e2   :  { %986 = vadd.xlane.f32.xlu1 %v985_v61 }
 0x1e5   :  { %992 = vadd.xlane.f32.xlu0 %v991_v63 }
 0x1e6   :  { %1108 = vadd.xlane.f32.xlu1 %v1107_v0 }
 0x1e9   :  { %1102 = vadd.xlane.f32.xlu0 %v1101_v3 }
 0x1ea   :  { %1255 = vadd.xlane.f32.xlu1 %v1254_v4 }
 0x1ed   :  { %1262 = vadd.xlane.f32.xlu0 %v1261_v6 }
 0x1ee   :  { %1447 = vadd.xlane.f32.xlu1 %v1446_v7 }
 0x20d   :  { %v293_v12 = vpop.xlane.xlu0 %292 }
 0x20e   :  { %v296_v14 = vpop.xlane.xlu1 %295 }
 0x20f   :  { %v300_v42 = vmax.f32 %v293_v12, %v296_v14 }
 0x211   :  { %v2483_v15 = vpop.xlane.xlu0 %762 }
 0x212   :  { %v2485_v17 = vpop.xlane.xlu1 %759 }
 0x213   :  { %v767_v7 = vmax.f32 %v2485_v17, %v2483_v15 }
 0x215   :  { %v2487_v18 = vpop.xlane.xlu0 %1223 }
 0x216   :  { %v2489_v19 = vpop.xlane.xlu1 %1220 }
 0x219   :  { %v528_v20 = vpop.permute.xlu0 %527 }
 0x21a   :  { %v338_v21 = vpop.permute.xlu1 %337  ;;  %v530_v22 = vsel %vm290_vm2, %v528_v20, 0.0 }
 0x21b   :  { %531 = vadd.xlane.f32.xlu1 %v530_v22  ;;  %v340_v23 = vsel %vm290_vm2, %v338_v21, 0.0 }
 0x21c   :  { %341 = vadd.xlane.f32.xlu0 %v340_v23 }
 0x21d   :  { %v805_v24 = vpop.permute.xlu0 %804 }
 0x21e   :  { %v644_v25 = vpop.permute.xlu1 %643  ;;  %v807_v26 = vsel %vm290_vm2, %v805_v24, 0.0 }
 0x21f   :  { %808 = vadd.xlane.f32.xlu1 %v807_v26  ;;  %v646_v30 = vsel %vm290_vm2, %v644_v25, 0.0 }
 0x220   :  { %1226 = vadd.xlane.f32.xlu0 %v1225_v27 }
 0x221   :  { %v1111_v28 = vpop.permute.xlu0 %1110 }
 0x222   :  { %v995_v29 = vpop.permute.xlu1 %994  ;;  %v1113_v36 = vsel %vm290_vm2, %v1111_v28, 0.0 }
 0x223   :  { %v997_v31 = vsel %vm290_vm2, %v995_v29, 0.0 }
 0x224   :  { %647 = vadd.xlane.f32.xlu0 %v646_v30  ;;  %998 = vadd.xlane.f32.xlu1 %v997_v31 }
 0x225   :  { %v1456_v35 = vpop.permute.xlu0 %1455 }
 0x226   :  { %v1266_v32 = vpop.permute.xlu1 %1265  ;;  %v1458_v37 = vsel %vm290_vm2, %v1456_v35, 0.0 }
 0x227   :  { %v1268_v34 = vsel %vm290_vm2, %v1266_v32, 0.0 }
 0x228   :  { %1453 = vadd.xlane.f32.xlu0 %v1452_v33  ;;  %1269 = vadd.xlane.f32.xlu1 %v1268_v34 }
 0x22a   :  { %v1572_v40 = vpop.permute.xlu1 %1571 }
 0x22b   :  { %v1574_v41 = vsel %vm290_vm2, %v1572_v40, 0.0 }
 0x22c   :  { %1114 = vadd.xlane.f32.xlu0 %v1113_v36  ;;  %1459 = vadd.xlane.f32.xlu1 %v1458_v37 }
 0x230   :  { %1563 = vadd.xlane.f32.xlu0 %v1562_v38  ;;  %1569 = vadd.xlane.f32.xlu1 %v1568_v39 }
 0x234   :  { %1575 = vadd.xlane.f32.xlu0 %v1574_v41 }
 0x256   :  { %v299_v43 = vpop.xlane.xlu0 %298 }
 0x257   :  { %v301_v44 = vmax.f32 %v300_v42, %v299_v43 }
 0x259   :  { %v302_v45 = vsub.f32 %v293_v12, %v301_v44  ;;  %v305_v46 = vsub.f32 %v296_v14, %v301_v44  ;;  %v308_v47 = vsub.f32 %v299_v43, %v301_v44 }
 0x25a   :  { %v766_v57 = vpop.xlane.xlu0 %765 }
 0x25b   :  { %v303_v48 = vmul.f32 1.442695, %v302_v45  ;;  %v306_v49 = vmul.f32 1.442695, %v305_v46  ;;  %v309_v50 = vmul.f32 1.442695, %v308_v47  ;;  %v2505_v56 = vpop.xlane.xlu1 %334  ;;  %v768_v11 = vmax.f32 %v767_v7, %v766_v57 }
 0x25c   :  { %v1228_v47 = vmax.f32 %v2489_v19, %v2487_v18 }
 0x25d   :  { %2180 = vpow2.f32 %v303_v48  ;;  %v769_v14 = vsub.f32 %v2485_v17, %v768_v11  ;;  %v772_v21 = vsub.f32 %v2483_v15, %v768_v11  ;;  %v775_v26 = vsub.f32 %v766_v57, %v768_v11 }
 0x25e   :  { %2182 = vpow2.f32 %v306_v49  ;;  %v328_v61 = vpop.xlane.xlu0 %327 }
 0x25f   :  { %2184 = vpow2.f32 %v309_v50  ;;  %v520_v59 = vpop.xlane.xlu1 %519  ;;  %v770_v22 = vmul.f32 1.442695, %v769_v14  ;;  %v773_v23 = vmul.f32 1.442695, %v772_v21  ;;  %v776_v27 = vmul.f32 1.442695, %v775_v26 }
 0x260   :  { %v343_v36 = vmax.f32 %v328_v61, %v2505_v56 }
 0x262   :  { %v526_v8 = vpop.xlane.xlu0 %525 }
 0x263   :  { %v2516_v4 = vpop.xlane.xlu1 %641  ;;  %v533_v35 = vmax.f32 %v520_v59, %v526_v8 }
 0x266   :  { %v2523_v20 = vpop.xlane.xlu0 %635 }
 0x267   :  { %v795_v12 = vpop.xlane.xlu1 %794 }
 0x26a   :  { %v2181_v51 = vpop.eup %2180  ;;  %v802_v25 = vpop.xlane.xlu0 %801 }
 0x26b   :  { %v2183_v52 = vpop.eup %2182  ;;  %v2526_v24 = vpop.xlane.xlu1 %986  ;;  %v810_v43 = vmax.f32 %v795_v12, %v802_v25 }
 0x26c   :  { %v311_v53 = vadd.f32 %v2183_v52, %v2181_v51  ;;  %v2185_v54 = vpop.eup %2184 }
 0x26e   :  { %v312_v55 = vadd.f32 %v2185_v54, %v311_v53  ;;  %v2530_v29 = vpop.xlane.xlu0 %992 }
 0x26f   :  { %v2528_v28 = vpop.xlane.xlu1 %1108 }
 0x270   :  { %2186 = vrcp.f32 %v312_v55 }
 0x271   :  { %2188 = vpow2.f32 %v770_v22 }
 0x272   :  { %2190 = vpow2.f32 %v773_v23  ;;  %v2534_v17 = vpop.xlane.xlu0 %1102 }
 0x273   :  { %2192 = vpow2.f32 %v776_v27  ;;  %v2532_v30 = vpop.xlane.xlu1 %1255 }
 0x276   :  { %v2542_v33 = vpop.xlane.xlu0 %1262 }
 0x277   :  { %v2540_v32 = vpop.xlane.xlu1 %1447 }
 0x27d   :  { %v2187_v60 = vpop.eup %2186 }
 0x27e   :  { %v314_v62 = vmul.f32 %v2187_v60, %v2181_v51  ;;  %v316_v63 = vmul.f32 %v2187_v60, %v2183_v52  ;;  %v319_v0 = vmul.f32 %v2187_v60, %v2185_v54  ;;  %v2536_v31 = vpop.eup %2188 }
 0x27f   :  { %v2538_v15 = vpop.eup %2190 }
 0x280   :  { %v315_v2 = vmul.f32 %v314_v62, %v2416_v10  ;;  %v317_v3 = vmul.f32 %v316_v63, %v2418_v13  ;;  %v320_v6 = vmul.f32 %v319_v0, %v2422_v16  ;;  %v778_v34 = vadd.f32 %v2538_v15, %v2536_v31  ;;  %v2547_v38 = vpop.eup %2192 }
 0x282   :  { %v318_v5 = vadd.f32 %v317_v3, %v315_v2  ;;  %v779_v41 = vadd.f32 %v2547_v38, %v778_v34 }
 0x284   :  { %v321_v9 = vadd.f32 %v320_v6, %v318_v5  ;;  %2194 = vrcp.f32 %v779_v41  ;;  %v649_v5 = vmax.f32 %v2523_v20, %v2516_v4  ;;  %v1000_v6 = vmax.f32 %v2526_v24, %v2530_v29 }
 0x286   :  { %441 = vrot.lane.b32.xlu0 %v321_v9, %s2310_s28 }
 0x2a4   :  { %v532_v37 = vpop.xlane.xlu1 %531 }
 0x2a5   :  { %v534_v39 = vmax.f32 %v533_v35, %v532_v37  ;;  %v342_v40 = vpop.xlane.xlu0 %341 }
 0x2a6   :  { %v344_v42 = vmax.f32 %v343_v36, %v342_v40 }
 0x2a7   :  { %v535_v44 = vsub.f32 %v520_v59, %v534_v39  ;;  %v538_v45 = vsub.f32 %v526_v8, %v534_v39  ;;  %v541_v46 = vsub.f32 %v532_v37, %v534_v39  ;;  %v1271_v37 = vmax.f32 %v2532_v30, %v2542_v33 }
 0x2a8   :  { %v345_v48 = vsub.f32 %v328_v61, %v344_v42  ;;  %v348_v49 = vsub.f32 %v2505_v56, %v344_v42  ;;  %v351_v50 = vsub.f32 %v342_v40, %v344_v42  ;;  %v809_v51 = vpop.xlane.xlu1 %808 }
 0x2a9   :  { %v536_v52 = vmul.f32 1.442695, %v535_v44  ;;  %v539_v53 = vmul.f32 1.442695, %v538_v45  ;;  %v542_v54 = vmul.f32 1.442695, %v541_v46  ;;  %v811_v55 = vmax.f32 %v810_v43, %v809_v51  ;;  %v1227_v57 = vpop.xlane.xlu0 %1226 }
 0x2aa   :  { %v346_v60 = vmul.f32 1.442695, %v345_v48  ;;  %v349_v62 = vmul.f32 1.442695, %v348_v49  ;;  %v1229_v63 = vmax.f32 %v1228_v47, %v1227_v57  ;;  %v352_v3 = vmul.f32 1.442695, %v351_v50  ;;  %v2571_v47 = vpop.eup %2194 }
 0x2ab   :  { %2196 = vpow2.f32 %v536_v52  ;;  %v812_v59 = vsub.f32 %v795_v12, %v811_v55  ;;  %v815_v0 = vsub.f32 %v802_v25, %v811_v55  ;;  %v818_v2 = vsub.f32 %v809_v51, %v811_v55 }
 0x2ac   :  { %2198 = vpow2.f32 %v539_v53  ;;  %v1230_v61 = vsub.f32 %v2489_v19, %v1229_v63  ;;  %v1233_v56 = vsub.f32 %v2487_v18, %v1229_v63  ;;  %v1236_v12 = vsub.f32 %v1227_v57, %v1229_v63 }
 0x2ad   :  { %2200 = vpow2.f32 %v542_v54  ;;  %v813_v7 = vmul.f32 1.442695, %v812_v59  ;;  %v648_v8 = vpop.xlane.xlu0 %647  ;;  %v999_v9 = vpop.xlane.xlu1 %998  ;;  %v816_v11 = vmul.f32 1.442695, %v815_v0  ;;  %v819_v14 = vmul.f32 1.442695, %v818_v2 }
 0x2ae   :  { %2202 = vpow2.f32 %v346_v60  ;;  %v650_v21 = vmax.f32 %v649_v5, %v648_v8  ;;  %v1001_v22 = vmax.f32 %v1000_v6, %v999_v9  ;;  %v1231_v19 = vmul.f32 1.442695, %v1230_v61 }
 0x2af   :  { %2204 = vpow2.f32 %v349_v62  ;;  %v1234_v18 = vmul.f32 1.442695, %v1233_v56  ;;  %v1237_v35 = vmul.f32 1.442695, %v1236_v12 }
 0x2b0   :  { %2206 = vpow2.f32 %v352_v3  ;;  %v651_v23 = vsub.f32 %v2523_v20, %v650_v21  ;;  %v654_v25 = vsub.f32 %v2516_v4, %v650_v21  ;;  %v657_v26 = vsub.f32 %v648_v8, %v650_v21 }
 0x2b1   :  { %2208 = vpow2.f32 %v813_v7  ;;  %v2561_v27 = vpop.xlane.xlu0 %1453  ;;  %v1270_v34 = vpop.xlane.xlu1 %1269  ;;  %v1002_v36 = vsub.f32 %v2526_v24, %v1001_v22  ;;  %v1005_v40 = vsub.f32 %v2530_v29, %v1001_v22  ;;  %v1116_v20 = vmax.f32 %v2534_v17, %v2528_v28 }
 0x2b2   :  { %2210 = vpow2.f32 %v816_v11  ;;  %v652_v39 = vmul.f32 1.442695, %v651_v23  ;;  %v655_v4 = vmul.f32 1.442695, %v654_v25  ;;  %v1008_v41 = vsub.f32 %v999_v9, %v1001_v22 }
 0x2b3   :  { %2212 = vpow2.f32 %v819_v14  ;;  %v658_v42 = vmul.f32 1.442695, %v657_v26  ;;  %v1272_v43 = vmax.f32 %v1271_v37, %v1270_v34  ;;  %v1003_v24 = vmul.f32 1.442695, %v1002_v36 }
 0x2b4   :  { %2214 = vpow2.f32 %v1231_v19  ;;  %v1006_v48 = vmul.f32 1.442695, %v1005_v40  ;;  %v1009_v51 = vmul.f32 1.442695, %v1008_v41  ;;  %v1461_v54 = vmax.f32 %v2540_v32, %v2561_v27 }
 0x2b5   :  { %2216 = vpow2.f32 %v1234_v18  ;;  %v1115_v44 = vpop.xlane.xlu0 %1114  ;;  %v2569_v45 = vpop.xlane.xlu1 %1459  ;;  %v1273_v29 = vsub.f32 %v2532_v30, %v1272_v43  ;;  %v1276_v49 = vsub.f32 %v2542_v33, %v1272_v43  ;;  %v1279_v52 = vsub.f32 %v1270_v34, %v1272_v43 }
 0x2b6   :  { %2218 = vpow2.f32 %v1237_v35  ;;  %v1117_v46 = vmax.f32 %v1116_v20, %v1115_v44  ;;  %v1462_v2 = vmax.f32 %v1461_v54, %v2569_v45 }
 0x2b7   :  { %2220 = vpow2.f32 %v652_v39  ;;  %v1274_v55 = vmul.f32 1.442695, %v1273_v29  ;;  %v1277_v59 = vmul.f32 1.442695, %v1276_v49  ;;  %v1280_v56 = vmul.f32 1.442695, %v1279_v52 }
 0x2b8   :  { %v2575_v50 = vpop.eup %2196  ;;  %2222 = vpow2.f32 %v655_v4  ;;  %v1118_v33 = vsub.f32 %v2534_v17, %v1117_v46  ;;  %v1121_v0 = vsub.f32 %v2528_v28, %v1117_v46  ;;  %v1124_v6 = vsub.f32 %v1115_v44, %v1117_v46 }
 0x2b9   :  { %v2577_v53 = vpop.eup %2198  ;;  %2224 = vpow2.f32 %v658_v42  ;;  %v1564_v57 = vpop.xlane.xlu0 %1563  ;;  %v1463_v11 = vsub.f32 %v2540_v32, %v1462_v2  ;;  %v1466_v23 = vsub.f32 %v2561_v27, %v1462_v2  ;;  %v1469_v32 = vsub.f32 %v2569_v45, %v1462_v2 }
 0x2ba   :  { %v2581_v60 = vpop.eup %2200  ;;  %v544_v30 = vadd.f32 %v2577_v53, %v2575_v50  ;;  %2226 = vpow2.f32 %v1003_v24  ;;  %v1570_v62 = vpop.xlane.xlu1 %1569  ;;  %v1119_v28 = vmul.f32 1.442695, %v1118_v33  ;;  %v1122_v21 = vmul.f32 1.442695, %v1121_v0  ;;  %v2641_v33 = vld [vmem:[%s2888_s3 + $0x10] sm:$0xff] }
 0x2bb   :  { %v2586_v63 = vpop.eup %2202  ;;  %2228 = vpow2.f32 %v1006_v48  ;;  %v1577_v7 = vmax.f32 %v1564_v57, %v1570_v62  ;;  %v1125_v26 = vmul.f32 1.442695, %v1124_v6  ;;  %v1464_v36 = vmul.f32 1.442695, %v1463_v11  ;;  %2086 = vmatpush3.msra.mxu0 %v2641_v33 }
 0x2bc   :  { %v2590_v3 = vpop.eup %2204  ;;  %v545_v61 = vadd.f32 %v2581_v60, %v544_v30  ;;  %2230 = vpow2.f32 %v1009_v51  ;;  %v1467_v27 = vmul.f32 1.442695, %v1466_v23  ;;  %v1470_v41 = vmul.f32 1.442695, %v1469_v32  ;;  %2095 = vmatprep.subr.mxu0 %v2304_v1 }
 0x2bd   :  { %v2593_v5 = vpop.eup %2206  ;;  %v354_v17 = vadd.f32 %v2590_v3, %v2586_v63  ;;  %2232 = vpow2.f32 %v1274_v55  ;;  %v1576_v8 = vpop.xlane.xlu0 %1575 }
 0x2be   :  { %v2597_v9 = vpop.eup %2208  ;;  %2234 = vrcp.f32 %v545_v61  ;;  %v1578_v22 = vmax.f32 %v1577_v7, %v1576_v8 }
 0x2bf   :  { %v2600_v12 = vpop.eup %2210  ;;  %v355_v14 = vadd.f32 %v2593_v5, %v354_v17  ;;  %2236 = vpow2.f32 %v1277_v59 }
 0x2c0   :  { %v2603_v19 = vpop.eup %2212  ;;  %v821_v18 = vadd.f32 %v2600_v12, %v2597_v9  ;;  %2238 = vpow2.f32 %v1280_v56  ;;  %v1579_v39 = vsub.f32 %v1564_v57, %v1578_v22  ;;  %v1582_v20 = vsub.f32 %v1570_v62, %v1578_v22 }
 0x2c1   :  { %v2608_v25 = vpop.eup %2214  ;;  %2240 = vrcp.f32 %v355_v14  ;;  %v1585_v44 = vsub.f32 %v1576_v8, %v1578_v22 }
 0x2c2   :  { %v2611_v34 = vpop.eup %2216  ;;  %v822_v35 = vadd.f32 %v2603_v19, %v821_v18  ;;  %2242 = vpow2.f32 %v1119_v28  ;;  %v1580_v24 = vmul.f32 1.442695, %v1579_v39  ;;  %v1583_v49 = vmul.f32 1.442695, %v1582_v20 }
 0x2c3   :  { %v2614_v37 = vpop.eup %2218  ;;  %2244 = vpow2.f32 %v1122_v21  ;;  %v1239_v48 = vadd.f32 %v2611_v34, %v2608_v25  ;;  %v1586_v55 = vmul.f32 1.442695, %v1585_v44  ;;  %v783_v44 = vmul.f32 %v2571_v47, %v2538_v15 }
 0x2c4   :  { %v2616_v40 = vpop.eup %2220  ;;  %2246 = vrcp.f32 %v822_v35 }
 0x2c5   :  { %v2618_v4 = vpop.eup %2222  ;;  %2248 = vpow2.f32 %v1125_v26  ;;  %v1240_v59 = vadd.f32 %v2614_v37, %v1239_v48 }
 0x2c6   :  { %v2620_v42 = vpop.eup %2224  ;;  %v660_v43 = vadd.f32 %v2618_v4, %v2616_v40  ;;  %2250 = vpow2.f32 %v1464_v36 }
 0x2c7   :  { %v2624_v45 = vpop.eup %2226  ;;  %2252 = vpow2.f32 %v1467_v27 }
 0x2c8   :  { %v2626_v46 = vpop.eup %2228  ;;  %v661_v29 = vadd.f32 %v2620_v42, %v660_v43  ;;  %2254 = vpow2.f32 %v1470_v41 }
 0x2c9   :  { %v2631_v51 = vpop.eup %2230  ;;  %v1011_v52 = vadd.f32 %v2626_v46, %v2624_v45 }
 0x2ca   :  { %v2635_v54 = vpop.eup %2232  ;;  %2256 = vrcp.f32 %v661_v29 }
 0x2cb   :  { %v2235_v57 = vpop.eup %2234  ;;  %v1012_v30 = vadd.f32 %v2631_v51, %v1011_v52  ;;  %2258 = vpow2.f32 %v1580_v24 }
 0x2cc   :  { %v2643_v62 = vpop.eup %2236  ;;  %2260 = vpow2.f32 %v1583_v49  ;;  %v547_v0 = vmul.f32 %v2235_v57, %v2575_v50  ;;  %v549_v2 = vmul.f32 %v2235_v57, %v2577_v53  ;;  %v552_v27 = vmul.f32 %v2235_v57, %v2581_v60 }
 0x2cd   :  { %v2649_v61 = vpop.eup %2238  ;;  %2262 = vrcp.f32 %v1012_v30  ;;  %v1282_v56 = vadd.f32 %v2643_v62, %v2635_v54 }
 0x2ce   :  { %v2241_v17 = vpop.eup %2240  ;;  %2264 = vpow2.f32 %v1586_v55  ;;  %v548_v11 = vmul.f32 %v547_v0, %v2416_v10  ;;  %v550_v14 = vmul.f32 %v549_v2, %v2418_v13 }
 0x2cf   :  { %v2654_v6 = vpop.eup %2242  ;;  %v1283_v7 = vadd.f32 %v2649_v61, %v1282_v56  ;;  %v357_v50 = vmul.f32 %v2241_v17, %v2586_v63  ;;  %v359_v53 = vmul.f32 %v2241_v17, %v2590_v3  ;;  %v362_v8 = vmul.f32 %v2241_v17, %v2593_v5 }
 0x2d0   :  { %v2660_v28 = vpop.eup %2244  ;;  %2266 = vrcp.f32 %v1240_v59  ;;  %v784_v17 = vmul.f32 %v783_v44, %v2418_v13 }
 0x2d1   :  { %v2247_v21 = vpop.eup %2246  ;;  %2268 = vrcp.f32 %v1283_v7  ;;  %v1127_v22 = vadd.f32 %v2660_v28, %v2654_v6  ;;  %v358_v18 = vmul.f32 %v357_v50, %v2416_v10  ;;  %v360_v63 = vmul.f32 %v359_v53, %v2418_v13 }
 0x2d2   :  { %v2668_v23 = vpop.eup %2248  ;;  %v824_v3 = vmul.f32 %v2247_v21, %v2597_v9  ;;  %v826_v5 = vmul.f32 %v2247_v21, %v2600_v12  ;;  %v829_v26 = vmul.f32 %v2247_v21, %v2603_v19  ;;  %v363_v39 = vmul.f32 %v362_v8, %v2422_v16 }
 0x2d3   :  { %v2673_v32 = vpop.eup %2250  ;;  %v1128_v35 = vadd.f32 %v2668_v23, %v1127_v22  ;;  %v361_v36 = vadd.f32 %v360_v63, %v358_v18  ;;  %v781_v9 = vmul.f32 %v2571_v47, %v2536_v31  ;;  %v551_v19 = vadd.f32 %v550_v14, %v548_v11 }
 0x2d4   :  { %v825_v20 = vmul.f32 %v824_v3, %v2416_v10  ;;  %v827_v41 = vmul.f32 %v826_v5, %v2418_v13  ;;  %v2682_v43 = vpop.eup %2252  ;;  %v830_v29 = vmul.f32 %v829_v26, %v2422_v16  ;;  %v553_v31 = vmul.f32 %v552_v27, %v2422_v16 }
 0x2d5   :  { %2270 = vrcp.f32 %v1128_v35  ;;  %v364_v12 = vadd.f32 %v363_v39, %v361_v36  ;;  %v2686_v24 = vpop.eup %2254  ;;  %v1472_v60 = vadd.f32 %v2682_v43, %v2673_v32  ;;  %v782_v56 = vmul.f32 %v781_v9, %v2416_v10 }
 0x2d6   :  { %v828_v48 = vadd.f32 %v827_v41, %v825_v20  ;;  %v554_v0 = vadd.f32 %v553_v31, %v551_v19  ;;  %v786_v18 = vmul.f32 %v2571_v47, %v2547_v38 }
 0x2d7   :  { %v2257_v49 = vpop.eup %2256  ;;  %366 = vrot.lane.b32.xlu1 %v364_v12, %s2311_s10  ;;  %v1473_v55 = vadd.f32 %v2686_v24, %v1472_v60  ;;  %v785_v35 = vadd.f32 %v784_v17, %v782_v56 }
 0x2d8   :  { %v2693_v52 = vpop.eup %2258  ;;  %v831_v57 = vadd.f32 %v830_v29, %v828_v48  ;;  %v663_v15 = vmul.f32 %v2257_v49, %v2616_v40  ;;  %v665_v30 = vmul.f32 %v2257_v49, %v2618_v4  ;;  %v668_v2 = vmul.f32 %v2257_v49, %v2620_v42 }
 0x2d9   :  { %v2698_v59 = vpop.eup %2260  ;;  %2272 = vrcp.f32 %v1473_v55  ;;  %v787_v38 = vmul.f32 %v786_v18, %v2422_v16 }
 0x2da   :  { %v2263_v7 = vpop.eup %2262  ;;  %v1588_v50 = vadd.f32 %v2698_v59, %v2693_v52  ;;  %833 = vrot.lane.b32.xlu0 %v831_v57, %s2311_s10  ;;  %v664_v40 = vmul.f32 %v663_v15, %v2416_v10  ;;  %v666_v4 = vmul.f32 %v665_v30, %v2418_v13  ;;  %v669_v22 = vmul.f32 %v668_v2, %v2422_v16 }
 0x2db   :  { %v2708_v53 = vpop.eup %2264  ;;  %556 = vrot.lane.b32.xlu1 %v554_v0, %s2312_s11  ;;  %v1014_v42 = vmul.f32 %v2263_v7, %v2624_v45  ;;  %v1016_v8 = vmul.f32 %v2263_v7, %v2626_v46  ;;  %v1019_v11 = vmul.f32 %v2263_v7, %v2631_v51 }
 0x2dc   :  { %v1589_v14 = vadd.f32 %v2708_v53, %v1588_v50  ;;  %v667_v21 = vadd.f32 %v666_v4, %v664_v40 }
 0x2dd   :  { %v2267_v63 = vpop.eup %2266  ;;  %v1015_v3 = vmul.f32 %v1014_v42, %v2416_v10  ;;  %v1017_v5 = vmul.f32 %v1016_v8, %v2418_v13  ;;  %v1020_v46 = vmul.f32 %v1019_v11, %v2422_v16 }
 0x2de   :  { %v2269_v26 = vpop.eup %2268  ;;  %2274 = vrcp.f32 %v1589_v14  ;;  %v670_v45 = vadd.f32 %v669_v22, %v667_v21  ;;  %v1242_v47 = vmul.f32 %v2267_v63, %v2608_v25  ;;  %v1244_v12 = vmul.f32 %v2267_v63, %v2611_v34 }
 0x2df   :  { %v1018_v51 = vadd.f32 %v1017_v5, %v1015_v3  ;;  %v1285_v36 = vmul.f32 %v2269_v26, %v2635_v54  ;;  %v1287_v39 = vmul.f32 %v2269_v26, %v2643_v62  ;;  %v1290_v27 = vmul.f32 %v2269_v26, %v2649_v61 }
 0x2e0   :  { %672 = vrot.lane.b32.xlu1 %v670_v45, %s2313_s12  ;;  %v788_v54 = vadd.f32 %v787_v38, %v785_v35  ;;  %v1243_v48 = vmul.f32 %v1242_v47, %v2416_v10  ;;  %v1245_v31 = vmul.f32 %v1244_v12, %v2418_v13 }
 0x2e1   :  { %v1021_v20 = vadd.f32 %v1020_v46, %v1018_v51  ;;  %v1286_v41 = vmul.f32 %v1285_v36, %v2416_v10  ;;  %v1288_v9 = vmul.f32 %v1287_v39, %v2418_v13  ;;  %v1291_v62 = vmul.f32 %v1290_v27, %v2422_v16 }
 0x2e2   :  { %v2271_v19 = vpop.eup %2270  ;;  %v1246_v2 = vadd.f32 %v1245_v31, %v1243_v48 }
 0x2e3   :  { %1023 = vrot.lane.b32.xlu0 %v1021_v20, %s2312_s11  ;;  %v1289_v61 = vadd.f32 %v1288_v9, %v1286_v41  ;;  %v1130_v44 = vmul.f32 %v2271_v19, %v2654_v6  ;;  %v1132_v60 = vmul.f32 %v2271_v19, %v2660_v28  ;;  %v1135_v25 = vmul.f32 %v2271_v19, %v2668_v23  ;;  %v1965_v9 = vld [vmem:[%s2889_s4] ss:$0 sm:$0xff] }
 0x2e4   :  { %908 = vrot.lane.b32.xlu1 %v788_v54, %s2310_s28  ;;  %v1247_v28 = vmul.f32 %v2267_v63, %v2614_v37 }
 0x2e5   :  { %v1292_v29 = vadd.f32 %v1291_v62, %v1289_v61  ;;  %v1131_v34 = vmul.f32 %v1130_v44, %v2416_v10  ;;  %v1133_v49 = vmul.f32 %v1132_v60, %v2418_v13  ;;  %v1136_v6 = vmul.f32 %v1135_v25, %v2422_v16 }
 0x2e6   :  { %v2273_v55 = vpop.eup %2272  ;;  %v1248_v40 = vmul.f32 %v1247_v28, %v2422_v16 }
 0x2e7   :  { %1294 = vrot.lane.b32.xlu0 %v1292_v29, %s2311_s10  ;;  %v1134_v57 = vadd.f32 %v1133_v49, %v1131_v34  ;;  %v1475_v23 = vmul.f32 %v2273_v55, %v2673_v32  ;;  %v1477_v15 = vmul.f32 %v2273_v55, %v2682_v43  ;;  %v1480_v30 = vmul.f32 %v2273_v55, %v2686_v24 }
 0x2e8   :  { %v1249_v4 = vadd.f32 %v1248_v40, %v1246_v2 }
 0x2e9   :  { %v1137_v0 = vadd.f32 %v1136_v6, %v1134_v57  ;;  %v1476_v56 = vmul.f32 %v1475_v23, %v2416_v10  ;;  %v1478_v17 = vmul.f32 %v1477_v15, %v2418_v13  ;;  %v1481_v50 = vmul.f32 %v1480_v30, %v2422_v16 }
 0x2eb   :  { %v2275_v7 = vpop.eup %2274  ;;  %1139 = vrot.lane.b32.xlu1 %v1137_v0, %s2313_s12  ;;  %v1479_v37 = vadd.f32 %v1478_v17, %v1476_v56 }
 0x2ec   :  { %v1591_v32 = vmul.f32 %v2275_v7, %v2693_v52  ;;  %v1593_v43 = vmul.f32 %v2275_v7, %v2698_v59  ;;  %v1596_v24 = vmul.f32 %v2275_v7, %v2708_v53  ;;  %v38_v52 = vld [vmem:[%s2888_s3] sm:$0xff] }
 0x2ed   :  { %v1482_v42 = vadd.f32 %v1481_v50, %v1479_v37 }
 0x2ee   :  { %v1592_v8 = vmul.f32 %v1591_v32, %v2416_v10  ;;  %v1594_v11 = vmul.f32 %v1593_v43, %v2418_v13  ;;  %v1597_v21 = vmul.f32 %v1596_v24, %v2422_v16  ;;  %v41_v13 = vld [vmem:[%s2888_s3 + $0x18] sm:$0xff] }
 0x2ef   :  { %1369 = vrot.lane.b32.xlu1 %v1249_v4, %s2310_s28  ;;  %1484 = vrot.lane.b32.xlu0 %v1482_v42, %s2312_s11 }
 0x2f0   :  { %v1595_v14 = vadd.f32 %v1594_v11, %v1592_v8 }
 0x2f2   :  { %v1598_v22 = vadd.f32 %v1597_v21, %v1595_v14 }
 0x2f4   :  { %1600 = vrot.lane.b32.xlu1 %v1598_v22, %s2313_s12 }
 0x2f8   :  { %v442_v10 = vpop.permute.xlu0 %441 }
 0x349   :  { %v367_v59 = vpop.permute.xlu1 %366 }
 0x34a   :  { %2078 = vmatmul.mubr.msk.f32.vlgmr.msra.gmra.mxu1 %vm290_vm2, %v367_v59 }
 0x34b   :  { %2081 = vmatpush3.msra.mxu1 %v38_v52  ;;  %2082 = vmatprep.mubr.msk.f32.mxu1 %vm2305_vm0, %v2304_v1 }
 0x34c   :  { %2090 = vmatprep.subr.mxu1 %v2304_v1  ;;  %v834_v53 = vpop.permute.xlu0 %833 }
 0x34d   :  { %v557_v16 = vpop.permute.xlu1 %556 }
 0x34e   :  { %2083 = vmatmul.mubr.msk.f32.vlgmr.msra.gmra.mxu1 %vm290_vm2, %v442_v10  ;;  %2088 = vmatmul.mubr.msk.f32.vlgmr.msra.gmra.mxu0 %vm290_vm2, %v557_v16 }
 0x34f   :  { %2091 = vmatpush3.msra.mxu1 %v41_v13  ;;  %2096 = vmatpush3.msra.mxu0 %v2510_v58 }
 0x350   :  { %2092 = vmatprep.mubr.msk.f32.mxu1 %vm2305_vm0, %v2304_v1  ;;  %2097 = vmatprep.mubr.msk.f32.mxu0 %vm2305_vm0, %v2304_v1 }
 0x351   :  { %2100 = vmatprep.subr.mxu1 %v2304_v1  ;;  %2105 = vmatprep.subr.mxu0 %v2304_v1 }
 0x352   :  { %v673_v18 = vpop.permute.xlu1 %672  ;;  %2098 = vmatmul.mubr.msk.f32.vlgmr.msra.gmra.mxu0 %vm290_vm2, %v834_v53 }
 0x353   :  { %2093 = vmatmul.mubr.msk.f32.vlgmr.msra.gmra.mxu1 %vm290_vm2, %v673_v18  ;;  %2106 = vmatpush3.msra.mxu0 %v2641_v33  ;;  %v1739_v18 = vld [vmem:[%s2892_s7 + $0x18] sm:$0xff] }
 0x354   :  { %2101 = vmatpush3.msra.mxu1 %v38_v52  ;;  %2102 = vmatprep.mubr.msk.f32.mxu1 %vm2305_vm0, %v2304_v1 }
 0x355   :  { %v1024_v63 = vpop.permute.xlu0 %1023  ;;  %2107 = vmatprep.mubr.msk.f32.mxu0 %vm2305_vm0, %v2304_v1  ;;  %2110 = vmatprep.subr.mxu1 %v2304_v1 }
 0x356   :  { %v909_v3 = vpop.permute.xlu1 %908  ;;  %2108 = vmatmul.mubr.msk.f32.vlgmr.msra.gmra.mxu0 %vm290_vm2, %v1024_v63  ;;  %2115 = vmatprep.subr.mxu0 %v2304_v1  ;;  %v1738_v63 = vld [vmem:[%s2892_s7 + $0x10] sm:$0xff] }
 0x357   :  { %2103 = vmatmul.mubr.msk.f32.vlgmr.msra.gmra.mxu1 %vm290_vm2, %v909_v3  ;;  %2116 = vmatpush3.msra.mxu0 %v2510_v58  ;;  %v1737_v3 = vld [vmem:[%s2892_s7 + $0x8] sm:$0xff] }
 0x358   :  { %2111 = vmatpush3.msra.mxu1 %v41_v13  ;;  %2112 = vmatprep.mubr.msk.f32.mxu1 %vm2305_vm0, %v2304_v1 }
 0x359   :  { %v1295_v5 = vpop.permute.xlu0 %1294  ;;  %2117 = vmatprep.mubr.msk.f32.mxu0 %vm2305_vm0, %v2304_v1  ;;  %2120 = vmatprep.subr.mxu1 %v2304_v1 }
 0x35a   :  { %2118 = vmatmul.mubr.msk.f32.vlgmr.msra.gmra.mxu0 %vm290_vm2, %v1295_v5  ;;  %2125 = vmatprep.subr.mxu0 %v2304_v1  ;;  %v1736_v5 = vld [vmem:[%s2892_s7] sm:$0xff] }
 0x35b   :  { %2126 = vmatpush3.msra.mxu0 %v2641_v33  ;;  %2127 = vmatprep.mubr.msk.f32.mxu0 %vm2305_vm0, %v2304_v1 }
 0x35c   :  { %2135 = vmatprep.subr.mxu0 %v2304_v1 }
 0x35d   :  { %v1140_v58 = vpop.permute.xlu1 %1139 }
 0x35e   :  { %2113 = vmatmul.mubr.msk.f32.vlgmr.msra.gmra.mxu1 %vm290_vm2, %v1140_v58  ;;  %v1983_v58 = vld [vmem:[%s2892_s7 + $0x38] sm:$0xff] }
 0x35f   :  { %2121 = vmatpush3.msra.mxu1 %v38_v52  ;;  %2122 = vmatprep.mubr.msk.f32.mxu1 %vm2305_vm0, %v2304_v1 }
 0x360   :  { %2130 = vmatprep.subr.mxu1 %v2304_v1 }
 0x361   :  { %v1370_v26 = vpop.permute.xlu1 %1369  ;;  %v1485_v45 = vpop.permute.xlu0 %1484 }
 0x362   :  { %2123 = vmatmul.mubr.msk.f32.vlgmr.msra.gmra.mxu1 %vm290_vm2, %v1370_v26  ;;  %2128 = vmatmul.mubr.msk.f32.vlgmr.msra.gmra.mxu0 %vm290_vm2, %v1485_v45  ;;  %v1982_v26 = vld [vmem:[%s2892_s7 + $0x30] sm:$0xff] }
 0x363   :  { %2131 = vmatpush3.msra.mxu1 %v41_v13  ;;  %2132 = vmatprep.mubr.msk.f32.mxu1 %vm2305_vm0, %v2304_v1 }
 0x364   :  { %2143 = vmatprep.mubr.msk.f32.mxu0 %vm2305_vm0, %v2304_v1  ;;  %2152 = vmatprep.subr.mxu1 %v2304_v1 }
 0x365   :  { %2136 = vmatpush3.msra.mxu0 %v1739_v18 }
 0x366   :  { %v1601_v33 = vpop.permute.xlu1 %1600  ;;  %2137 = vmatprep.subr.mxu0 %v2304_v1 }
 0x367   :  { %2133 = vmatmul.mubr.msk.f32.vlgmr.msra.gmra.mxu1 %vm290_vm2, %v1601_v33  ;;  %2138 = vmatpush3.msra.mxu0 %v1738_v63 }
 0x368   :  { %2160 = vmatprep.mubr.msk.f32.mxu1 %vm2305_vm0, %v2304_v1  ;;  %2139 = vmatprep.subr.mxu0 %v2304_v1 }
 0x369   :  { %2140 = vmatpush3.msra.mxu0 %v1737_v3  ;;  %2153 = vmatpush3.msra.mxu1 %v1983_v58 }
 0x36a   :  { %2141 = vmatprep.subr.mxu0 %v2304_v1  ;;  %2154 = vmatprep.subr.mxu1 %v2304_v1 }
 0x36b   :  { %2142 = vmatpush3.msra.mxu0 %v1736_v5  ;;  %2155 = vmatpush3.msra.mxu1 %v1982_v26 }
 0x36c   :  { %2156 = vmatprep.subr.mxu1 %v2304_v1 }
 0x40a   :  { %v436_v46 = vpop.f32.mrf.mxu1 }
 0x40c   :  { %v2079_v35 = vpop.f32.mrf.mxu1 }
 0x40e   :  { %v511_v51 = vpop.f32.mrf.mxu1  ;;  %v626_v36 = vpop.f32.mrf.mxu0 }
 0x40f   :  { %v512_v39 = vadd.f32 %v511_v51, %v436_v46 }
 0x410   :  { %v2084_v27 = vpop.f32.mrf.mxu1  ;;  %v2089_v38 = vpop.f32.mrf.mxu0 }
 0x411   :  { %v630_v47 = vadd.f32 %v626_v36, %v512_v39  ;;  %v1974_v27 = vld [vmem:[%s2890_s5] ss:$0 sm:$0xff] }
 0x412   :  { %v903_v20 = vpop.f32.mrf.mxu0 }
 0x413   :  { %v742_v41 = vpop.f32.mrf.mxu1 }
 0x414   :  { %v746_v12 = vadd.f32 %v742_v41, %v630_v47  ;;  %v2099_v19 = vpop.f32.mrf.mxu0 }
 0x415   :  { %v2094_v54 = vpop.f32.mrf.mxu1 }
 0x416   :  { %v1093_v62 = vpop.f32.mrf.mxu0  ;;  %v753_v61 = vadd.f32 %v1965_v9, %v746_v12 }
 0x417   :  { %v978_v44 = vpop.f32.mrf.mxu1 }
 0x418   :  { %v979_v60 = vadd.f32 %v978_v44, %v903_v20  ;;  %v1676_v25 = vsel %vm50_vm1, %v753_v61, 0.0  ;;  %v2109_v48 = vpop.f32.mrf.mxu0  ;;  %v1975_v20 = vld [vmem:[%s2891_s6] ss:$0 sm:$0xff] }
 0x419   :  { %v2104_v29 = vpop.f32.mrf.mxu1  ;;  %1677 = vadd.xlane.f32.xlu0 %v1676_v25 }
 0x41a   :  { %v1364_v34 = vpop.f32.mrf.mxu0  ;;  %v1097_v49 = vadd.f32 %v1093_v62, %v979_v60 }
 0x41c   :  { %v2119_v31 = vpop.f32.mrf.mxu0 }
 0x41d   :  { %v1976_v31 = vld [vmem:[%s2893_s8] ss:$0 sm:$0xff] }
 0x41e   :  { %v1209_v55 = vpop.f32.mrf.mxu1 }
 0x41f   :  { %v1213_v57 = vadd.f32 %v1209_v55, %v1097_v49  ;;  %v1980_v49 = vld [vmem:[%s2892_s7 + $0x20] sm:$0xff] }
 0x420   :  { %v2114_v6 = vpop.f32.mrf.mxu1 }
 0x421   :  { %v1214_v28 = vadd.f32 %v1965_v9, %v1213_v57 }
 0x422   :  { %v1439_v23 = vpop.f32.mrf.mxu1  ;;  %v1554_v30 = vpop.f32.mrf.mxu0 }
 0x423   :  { %v1440_v15 = vadd.f32 %v1439_v23, %v1364_v34  ;;  %v1679_v0 = vsel %vm50_vm1, %v1214_v28, 0.0  ;;  %v1981_v34 = vld [vmem:[%s2892_s7 + $0x28] sm:$0xff] }
 0x424   :  { %v2124_v2 = vpop.f32.mrf.mxu1  ;;  %1680 = vadd.xlane.f32.xlu1 %v1679_v0  ;;  %v2129_v17 = vpop.f32.mrf.mxu0  ;;  %2157 = vmatpush3.msra.mxu1 %v1981_v34 }
 0x425   :  { %v1558_v56 = vadd.f32 %v1554_v30, %v1440_v15  ;;  %2158 = vmatprep.subr.mxu1 %v2304_v1 }
 0x426   :  { %2159 = vmatpush3.msra.mxu1 %v1980_v49 }
 0x427   :  { %v1670_v7 = vpop.f32.mrf.mxu1 }
 0x428   :  { %v1674_v50 = vadd.f32 %v1670_v7, %v1558_v56 }
 0x429   :  { %v2134_v40 = vpop.f32.mrf.mxu1 }
 0x42a   :  { %v1675_v37 = vadd.f32 %v1965_v9, %v1674_v50  ;;  %v1985_v40 = vld [vmem:[%s2893_s8 + $0x1] ss:$0 sm:$0xff] }
 0x42c   :  { %v1682_v32 = vsel %vm50_vm1, %v1675_v37, 0.0 }
 0x42d   :  { %1683 = vadd.xlane.f32.xlu0 %v1682_v32 }
 0x4a2   :  { %v1678_v43 = vpop.xlane.xlu0 %1677 }
 0x4a3   :  { %v1686_v24 = vmul.f32 0.03125, %v1678_v43 }
 0x4a5   :  { %v1689_v4 = vsub.f32 %v753_v61, %v1686_v24 }
 0x4a7   :  { %v1692_v42 = vmul.f32 %v1689_v4, %v1689_v4 }
 0x4a9   :  { %v1695_v8 = vsel %vm50_vm1, %v1692_v42, 0.0 }
 0x4aa   :  { %1696 = vadd.xlane.f32.xlu0 %v1695_v8 }
 0x4ad   :  { %v1681_v11 = vpop.xlane.xlu1 %1680 }
 0x4ae   :  { %v1687_v14 = vmul.f32 0.03125, %v1681_v11 }
 0x4b0   :  { %v1690_v21 = vsub.f32 %v1214_v28, %v1687_v14 }
 0x4b2   :  { %v1693_v22 = vmul.f32 %v1690_v21, %v1690_v21 }
 0x4b4   :  { %v1698_v52 = vsel %vm50_vm1, %v1693_v22, 0.0 }
 0x4b5   :  { %1699 = vadd.xlane.f32.xlu1 %v1698_v52 }
 0x4b6   :  { %v1684_v59 = vpop.xlane.xlu0 %1683 }
 0x4b7   :  { %v1688_v10 = vmul.f32 0.03125, %v1684_v59 }
 0x4b9   :  { %v1691_v13 = vsub.f32 %v1675_v37, %v1688_v10 }
 0x4bb   :  { %v1694_v16 = vmul.f32 %v1691_v13, %v1691_v13 }
 0x4bd   :  { %v1701_v53 = vsel %vm50_vm1, %v1694_v16, 0.0 }
 0x4be   :  { %1702 = vadd.xlane.f32.xlu0 %v1701_v53 }
 0x533   :  { %v1697_v45 = vpop.xlane.xlu0 %1696 }
 0x534   :  { %v1704_v33 = vmul.f32 0.03125, %v1697_v45 }
 0x536   :  { %v1707_v46 = vadd.f32 1e-05, %v1704_v33 }
 0x538   :  { %2276 = vrsqrt.f32 %v1707_v46 }
 0x53e   :  { %v1700_v35 = vpop.xlane.xlu1 %1699 }
 0x53f   :  { %v1705_v51 = vmul.f32 0.03125, %v1700_v35 }
 0x541   :  { %v1708_v36 = vadd.f32 1e-05, %v1705_v51 }
 0x543   :  { %2278 = vrsqrt.f32 %v1708_v36 }
 0x545   :  { %v2277_v39 = vpop.eup %2276 }
 0x546   :  { %v1713_v38 = vmul.f32 %v2277_v39, %v1689_v4 }
 0x547   :  { %v1703_v47 = vpop.xlane.xlu0 %1702 }
 0x548   :  { %v1706_v41 = vmul.f32 0.03125, %v1703_v47  ;;  %v1723_v9 = vmul.f32 %v1974_v27, %v1713_v38 }
 0x54a   :  { %v1709_v12 = vadd.f32 1e-05, %v1706_v41  ;;  %v1733_v19 = vadd.f32 %v1975_v20, %v1723_v9 }
 0x54c   :  { %2280 = vrsqrt.f32 %v1709_v12  ;;  %2144 = vmatmul.mubr.msk.f32.vlgmr.msra.gmra.mxu0 %vm50_vm1, %v1733_v19 }
 0x54d   :  { %2146 = vmatprep.mubr.msk.f32.mxu0 %vm2305_vm0, %v2304_v1 }
 0x550   :  { %v2279_v54 = vpop.eup %2278 }
 0x551   :  { %v1714_v62 = vmul.f32 %v2279_v54, %v1690_v21 }
 0x553   :  { %v1724_v61 = vmul.f32 %v1974_v27, %v1714_v62 }
 0x555   :  { %v1734_v44 = vadd.f32 %v1975_v20, %v1724_v61 }
 0x557   :  { %2147 = vmatmul.mubr.msk.f32.gmra.mxu0 %vm50_vm1, %v1734_v44 }
 0x558   :  { %2149 = vmatprep.mubr.msk.f32.mxu0 %vm2305_vm0, %v2304_v1 }
 0x559   :  { %v2281_v60 = vpop.eup %2280 }
 0x55a   :  { %v1715_v25 = vmul.f32 %v2281_v60, %v1691_v13 }
 0x55c   :  { %v1725_v48 = vmul.f32 %v1974_v27, %v1715_v25 }
 0x55e   :  { %v1735_v29 = vadd.f32 %v1975_v20, %v1725_v48 }
 0x560   :  { %2150 = vmatmul.mubr.msk.f32.gmra.mxu0 %vm50_vm1, %v1735_v29 }
 0x60c   :  { %v1822_v55 = vpop.f32.mrf.mxu0 }
 0x60d   :  { %v1823_v57 = vadd.f32 %v1976_v31, %v1822_v55 }
 0x60e   :  { %v2145_v6 = vpop.f32.mrf.mxu0 }
 0x60f   :  { %2161 = vmatmul.mubr.msk.f32.vlgmr.msra.gmra.mxu1 %vm50_vm1, %v1823_v57 }
 0x610   :  { %2163 = vmatprep.mubr.msk.f32.mxu1 %vm2305_vm0, %v2304_v1 }
 0x617   :  { %v1827_v28 = vpop.f32.mrf.mxu0 }
 0x618   :  { %v1828_v23 = vadd.f32 %v1976_v31, %v1827_v28 }
 0x619   :  { %v2148_v15 = vpop.f32.mrf.mxu0 }
 0x61a   :  { %2164 = vmatmul.mubr.msk.f32.gmra.mxu1 %vm50_vm1, %v1828_v23 }
 0x61b   :  { %2166 = vmatprep.mubr.msk.f32.mxu1 %vm2305_vm0, %v2304_v1 }
 0x620   :  { %v1832_v30 = vpop.f32.mrf.mxu0 }
 0x621   :  { %v1833_v0 = vadd.f32 %v1976_v31, %v1832_v30 }
 0x622   :  { %v2151_v2 = vpop.f32.mrf.mxu0 }
 0x623   :  { %2167 = vmatmul.mubr.msk.f32.gmra.mxu1 %vm50_vm1, %v1833_v0 }
 0x6cf   :  { %v1924_v56 = vpop.f32.mrf.mxu1 }
 0x6d0   :  { %v1925_v32 = vadd.f32 %v1985_v40, %v1924_v56 }
 0x6d1   :  { %v2162_v17 = vpop.f32.mrf.mxu1 }
 0x6da   :  { %v1929_v7 = vpop.f32.mrf.mxu1 }
 0x6db   :  { %v1930_v37 = vadd.f32 %v1985_v40, %v1929_v7 }
 0x6dc   :  { %v2165_v50 = vpop.f32.mrf.mxu1 }
 0x6dd   :  { %v1938_v24 = vadd.f32 %v1930_v37, %v1925_v32 }
 0x6e3   :  { %v1934_v43 = vpop.f32.mrf.mxu1 }
 0x6e4   :  { %v1935_v1 = vadd.f32 %v1985_v40, %v1934_v43 }
 0x6e5   :  { %v2168_v4 = vpop.f32.mrf.mxu1 }
 0x6e6   :  { %v1939_v42 = vadd.f32 %v1938_v24, %v1935_v1 }
 0x6e8   :  { %1940 = vst.msk [vmem:[#allocation2] sm:$0xff] %vm50_vm1, %v1939_v42 }
 0x6e9   :  { %2293 = shalt.err (!%p2290_p4)
}
 0x6ea   :  { %1950 = dma.vmem_to_hbm [thread:$0]  %s1948_s15, 128, %s2894_s9, [#allocation3]  }
 0x6eb   :  { %2302 = dma.done.wait [#allocation3], 128  }
 0x6ec   :  { %2303 = vsyncadd [#allocation3], 4294967168 }
 0x6ed   :  { %1954 = vsyncpa [#allocation3], 1 }

</bundles_post_ra>
